<compile_context>
chip_gen: v5e
topology: v5e:2x2
jax: 0.10.0
libtpu: 0.0.40
codegen_flags: <defaults>
</compile_context>

<pallas_src>
import functools

import jax
import jax.numpy as jnp
from jax.experimental import pallas as pl
from jax.experimental.pallas import tpu as pltpu


_MIB = 1024 * 1024
_DEFAULT_TM = {5: 512, 6: 1024, 7: 1024}
_DEFAULT_TK = {5: 512, 6: 512, 7: 256}


def _round_up(x, m):
    return ((x + m - 1) // m) * m


def _cdiv(a, b):
    return -(-a // b)


def _tpu_generation():
    """Best-effort TPU generation (5/6/7) from device_kind; None if unknown."""
    try:
        kind = jax.devices()[0].device_kind.lower()
    except Exception:
        return None
    for g in (7, 6, 5, 4):
        if f"v{g}" in kind:
            return g
    return None


def _vmem_capacity_bytes(gen):
    try:
        info = pltpu.get_tpu_info()
        cap = int(getattr(info, "vmem_capacity_bytes", 0) or 0)
        if cap > 0:
            return cap
    except Exception:
        pass
    if gen is not None and gen <= 6:
        return 128 * _MIB
    return 64 * _MIB  # v7x / unknown: be conservative


def _vmem_estimate(tm, tk, d_model, x_bytes, w_bytes, out_bytes):
    return (2 * (tm * d_model * x_bytes            # x tile (double-buffered)
                 + d_model * 2 * tk * w_bytes      # fused gate_up tile
                 + tk * d_model * w_bytes          # down-proj tile
                 + tm * d_model * out_bytes)       # output tile
            + tm * d_model * 4                     # f32 accumulator scratch
            + 3 * tm * tk * 4)                     # gu / gate / up intermediates


def _phi3_mlp_kernel(x_ref, wgu_ref, wd_ref, o_ref, acc_ref, *, tk, epilogue_dtype):
    # x_ref:   (tm, d_model)        token tile
    # wgu_ref: (d_model, 2*tk)      fused [gate_k | up_k] weight tile
    # wd_ref:  (tk, d_model)        down_proj weight tile
    # o_ref:   (tm, d_model)        output tile (resident across k)
    # acc_ref: (tm, d_model) f32    accumulator scratch
    k = pl.program_id(1)

    @pl.when(k == 0)
    def _():
        acc_ref[...] = jnp.zeros_like(acc_ref)

    # Keep the MXU on the weight dtype path (bf16 x bf16 when weights are bf16).
    x = x_ref[...].astype(wgu_ref.dtype)
    # Fused gate+up matmul: (tm, d_model) @ (d_model, 2*tk) -> (tm, 2*tk), f32 acc.
    gu = jnp.dot(x, wgu_ref[...], preferred_element_type=jnp.float32)
    gu = gu.astype(epilogue_dtype)
    gate = gu[:, :tk]
    up = gu[:, tk:]
    # SiLU(gate) = gate * sigmoid(gate)
    h = up * (gate * jax.nn.sigmoid(gate))
    acc_ref[...] += jnp.dot(h.astype(wd_ref.dtype), wd_ref[...],
                            preferred_element_type=jnp.float32)

    @pl.when(k == pl.num_programs(1) - 1)
    def _():
        o_ref[...] = acc_ref[...].astype(o_ref.dtype)


class Phi3MLPWeights:
    """Prepared Phi3 MLP weights. `tk` is baked into the fused layout."""

    def __init__(self, w_gu_fused, w_down_t, tk):
        self.w_gu_fused = w_gu_fused
        self.w_down_t = w_down_t
        self.tk = int(tk)


def prepare_phi3_mlp_weights(w_gate_up, w_down, *, tk=None, dtype=None):
    """One-time weight preparation (call at model init, NOT per forward).

    w_gate_up: [2*d_inner, d_model]  (PyTorch nn.Linear layout)
    w_down:    [d_model, d_inner]    (PyTorch nn.Linear layout)

    Returns Phi3MLPWeights with:
      w_gu_fused: [d_model, 2*d_inner] with per-tk tiles interleaved as
                  [... gate_k | up_k ...] so each grid step reads one
                  contiguous (d_model, 2*tk) block carrying both halves.
      w_down_t:   [d_inner, d_model]
      tk:         the reduction tile size baked into w_gu_fused.
    For production, pass dtype=jnp.bfloat16 to hit the bf16 MXU peak
    (accumulation stays f32 inside the kernel).
    """
    two_d_inner, d_model = w_gate_up.shape
    d_inner = two_d_inner // 2
    assert d_model % 128 == 0, "d_model must be a multiple of 128"
    assert d_inner % 128 == 0, "d_inner must be a multiple of 128"

    if tk is None:
        tk = _DEFAULT_TK.get(_tpu_generation(), 256)
    tk = min(int(tk), d_inner)
    assert tk % 128 == 0, "tk must be a multiple of 128"
    assert d_inner % tk == 0, "tk must divide d_inner"

    n_k = d_inner // tk
    w_gate = w_gate_up[:d_inner, :].T          # [d_model, d_inner]
    w_up = w_gate_up[d_inner:, :].T            # [d_model, d_inner]
    wg = w_gate.reshape(d_model, n_k, tk)
    wu = w_up.reshape(d_model, n_k, tk)
    w_gu = jnp.stack([wg, wu], axis=2).reshape(d_model, 2 * d_inner)
    w_d = w_down.T                             # [d_inner, d_model]

    if dtype is not None:
        w_gu = w_gu.astype(dtype)
        w_d = w_d.astype(dtype)
    return Phi3MLPWeights(w_gu, w_d, tk)


@functools.partial(jax.jit,
                   static_argnames=("tm", "tk", "vmem_limit", "epilogue_bf16"))
def _phi3_mlp_forward_impl(hidden_states, w_gu_fused, w_down_t, *,
                           tm, tk, vmem_limit, epilogue_bf16):
    orig_shape = hidden_states.shape
    d_model = orig_shape[-1]
    d_inner = w_down_t.shape[0]

    M = 1
    for s in orig_shape[:-1]:
        M *= int(s)
    x2d = hidden_states.reshape(M, d_model)

    n_m = _cdiv(M, tm)          # ragged edge block handled by Pallas masking
    n_k = d_inner // tk

    kernel = functools.partial(
        _phi3_mlp_kernel, tk=tk,
        epilogue_dtype=jnp.bfloat16 if epilogue_bf16 else jnp.float32)

    out2d = pl.pallas_call(
        kernel,
        out_shape=jax.ShapeDtypeStruct((M, d_model), hidden_states.dtype),
        grid_spec=pltpu.PrefetchScalarGridSpec(
            num_scalar_prefetch=0,
            grid=(n_m, n_k),
            in_specs=[
                pl.BlockSpec((tm, d_model), lambda i, k: (i, 0)),
                pl.BlockSpec((d_model, 2 * tk), lambda i, k: (0, k)),
                pl.BlockSpec((tk, d_model), lambda i, k: (k, 0)),
            ],
            out_specs=pl.BlockSpec((tm, d_model), lambda i, k: (i, 0)),
            scratch_shapes=[pltpu.VMEM((tm, d_model), jnp.float32)],
        ),
        compiler_params=pltpu.CompilerParams(
            dimension_semantics=("parallel", "arbitrary"),
            vmem_limit_bytes=vmem_limit,
        ),
    )(x2d, w_gu_fused, w_down_t)

    return out2d.reshape(orig_shape)


def phi3_mlp_forward(hidden_states, weights, *, tm=None):
    """hidden_states: [..., d_model]; weights: Phi3MLPWeights from prepare_phi3_mlp_weights."""
    gen = _tpu_generation()
    vmem_cap = _vmem_capacity_bytes(gen)

    d_model = hidden_states.shape[-1]
    d_inner = weights.w_down_t.shape[0]
    tk = weights.tk
    assert d_model % 128 == 0, "d_model must be a multiple of 128"
    assert weights.w_gu_fused.shape == (d_model, 2 * d_inner), \
        "w_gu_fused shape inconsistent with w_down_t"
    assert weights.w_down_t.shape == (d_inner, d_model)
    assert tk % 128 == 0 and d_inner % tk == 0, \
        "tk baked into prepared weights must be a multiple of 128 dividing d_inner"

    M = 1
    for s in hidden_states.shape[:-1]:
        M *= int(s)
    M = max(M, 1)

    # Token tile: generation-aware default, capped to the problem size.
    if tm is None:
        tm = _DEFAULT_TM.get(gen, 512)
    tm = max(128, _round_up(int(tm), 128))
    tm_eff = min(tm, _round_up(M, 128))
    # v7x has 2 TensorCores: keep >= 2 tiles on the parallel axis when possible.
    if gen is not None and gen >= 7 and M >= 256:
        tm_eff = min(tm_eff, _round_up(_cdiv(M, 2), 128))

    # Generation-aware VMEM budget (~85% of capacity, <= ~56 MiB on v7x).
    budget = int(0.85 * vmem_cap)
    if gen is not None and gen >= 7:
        budget = min(budget, 56 * _MIB)

    x_b = hidden_states.dtype.itemsize
    w_b = weights.w_gu_fused.dtype.itemsize
    while tm_eff > 128 and _vmem_estimate(tm_eff, tk, d_model, x_b, w_b, x_b) > budget:
        tm_eff = max(128, _round_up(tm_eff // 2, 8))

    epilogue_bf16 = bool(weights.w_gu_fused.dtype == jnp.bfloat16
                         and gen is not None and gen >= 6)

    return _phi3_mlp_forward_impl(
        hidden_states, weights.w_gu_fused, weights.w_down_t,
        tm=tm_eff, tk=tk, vmem_limit=budget, epilogue_bf16=epilogue_bf16)


def _reference(hidden_states, w_gate_up, w_down):
    d_inner = w_gate_up.shape[0] // 2
    up_states = hidden_states @ w_gate_up.T
    gate, up = up_states[..., :d_inner], up_states[..., d_inner:]
    return (up * (gate * jax.nn.sigmoid(gate))) @ w_down.T


if __name__ == "__main__":
    # Small-but-tileable config: batch=2, seq=128, d_model=256, d_inner=512,
    # tk=256 -> grid has >= 2 reduction tiles, exercising the accumulator path.
    B, S, d_model, d_inner = 2, 128, 256, 512

    key = jax.random.PRNGKey(0)
    k_x, k_gu, k_d, k_x2 = jax.random.split(key, 4)

    hidden_states = jax.random.normal(k_x, (B, S, d_model), dtype=jnp.float32)
    # PyTorch nn.Linear layout [out_features, in_features].
    w_gate_up = jax.random.normal(k_gu, (2 * d_inner, d_model),
                                  dtype=jnp.float32) * 0.05
    w_down = jax.random.normal(k_d, (d_model, d_inner),
                               dtype=jnp.float32) * 0.05

    # One-time weight prep (model init). Kept f32 here for a tight correctness
    # check; pass dtype=jnp.bfloat16 in production.
    weights = prepare_phi3_mlp_weights(w_gate_up, w_down, tk=256)

    out = jax.block_until_ready(phi3_mlp_forward(hidden_states, weights))
    ref = _reference(hidden_states, w_gate_up, w_down)
    assert out.shape == (B, S, d_model)
    assert jnp.allclose(out, ref, atol=2e-3, rtol=2e-3), "mismatch vs reference"

    # Ragged token count (M=100 not a multiple of the 128-row tile): exercises
    # Pallas edge-block masking with no pad/slice HBM round-trip.
    x_ragged = jax.random.normal(k_x2, (1, 100, d_model), dtype=jnp.float32)
    out2 = jax.block_until_ready(phi3_mlp_forward(x_ragged, weights))
    ref2 = _reference(x_ragged, w_gate_up, w_down)
    assert out2.shape == (1, 100, d_model)
    assert jnp.allclose(out2, ref2, atol=2e-3, rtol=2e-3), "ragged mismatch vs reference"

    print("KERNEL_OK")
</pallas_src>

<mosaic_0001>
module attributes {stable_mosaic.version = 11 : i64} {
  func.func @_phi3_mlp_kernel(%arg0: i32, %arg1: i32, %arg2: memref<256x256xf32, #tpu.memory_space<vmem>>, %arg3: memref<256x512xf32, #tpu.memory_space<vmem>>, %arg4: memref<256x256xf32, #tpu.memory_space<vmem>>, %arg5: memref<256x256xf32, #tpu.memory_space<vmem>>, %arg6: memref<256x256xf32, #tpu.memory_space<vmem>>) attributes {dimension_semantics = [#tpu.dimension_semantics<parallel>, #tpu.dimension_semantics<arbitrary>], iteration_bounds = array<i64: 1, 2>, scalar_prefetch = 0 : i64, scratch_operands = 1 : i64, tpu.core_type = #tpu.core_type<tc>, window_params = [{transform_indices = @transform_0, window_bounds = array<i64: 256, 256>}, {transform_indices = @transform_1, window_bounds = array<i64: 256, 512>}, {transform_indices = @transform_2, window_bounds = array<i64: 256, 256>}, {transform_indices = @transform_3, window_bounds = array<i64: 256, 256>}]} {
    %c0_i32 = arith.constant 0 : i32
    %0 = arith.cmpi eq, %arg1, %c0_i32 : i32
    %1 = arith.extui %0 : i1 to i32
    %c0_i32_0 = arith.constant 0 : i32
    %2 = arith.cmpi ne, %1, %c0_i32_0 : i32
    scf.if %2 {
      %cst_13 = arith.constant 0.000000e+00 : f32
      %23 = vector.broadcast %cst_13 : f32 to vector<256x256xf32>
      %c0_14 = arith.constant 0 : index
      %c0_15 = arith.constant 0 : index
      %24 = vector.load %arg6[%c0_14, %c0_15] : memref<256x256xf32, #tpu.memory_space<vmem>>, vector<256x256xf32>
      tpu.vector_store %arg6[%c0_14, %c0_15], %23 {strides = array<i32>} : memref<256x256xf32, #tpu.memory_space<vmem>>, vector<256x256xf32>,
    } else {
    }
    %c0 = arith.constant 0 : index
    %c0_1 = arith.constant 0 : index
    %3 = vector.load %arg2[%c0, %c0_1] : memref<256x256xf32, #tpu.memory_space<vmem>>, vector<256x256xf32>
    %c0_2 = arith.constant 0 : index
    %c0_3 = arith.constant 0 : index
    %4 = vector.load %arg3[%c0_2, %c0_3] : memref<256x512xf32, #tpu.memory_space<vmem>>, vector<256x512xf32>
    %cst = arith.constant dense<0.000000e+00> : vector<256x512xf32>
    %5 = tpu.matmul %3, %4, %cst {dimension_numbers = #tpu.dot_dimension_numbers<[1], [0], [0], [1], [0, 0, 1, 1], [], []>} : vector<256x256xf32>, vector<256x512xf32>, vector<256x512xf32> -> vector<256x512xf32>
    %6 = vector.extract_strided_slice %5 {offsets = [0, 0], sizes = [256, 256], strides = [1, 1]} : vector<256x512xf32> to vector<256x256xf32>
    %7 = vector.extract_strided_slice %5 {offsets = [0, 256], sizes = [256, 256], strides = [1, 1]} : vector<256x512xf32> to vector<256x256xf32>
    %8 = arith.negf %6 : vector<256x256xf32>
    %9 = math.exp %8 : vector<256x256xf32>
    %cst_4 = arith.constant 1.000000e+00 : f32
    %10 = vector.broadcast %cst_4 : f32 to vector<256x256xf32>
    %11 = arith.addf %10, %9 : vector<256x256xf32>
    %12 = arith.divf %10, %11 : vector<256x256xf32>
    %13 = arith.mulf %6, %12 : vector<256x256xf32>
    %14 = arith.mulf %7, %13 : vector<256x256xf32>
    %c0_5 = arith.constant 0 : index
    %c0_6 = arith.constant 0 : index
    %15 = vector.load %arg6[%c0_5, %c0_6] : memref<256x256xf32, #tpu.memory_space<vmem>>, vector<256x256xf32>
    %c0_7 = arith.constant 0 : index
    %c0_8 = arith.constant 0 : index
    %16 = vector.load %arg4[%c0_7, %c0_8] : memref<256x256xf32, #tpu.memory_space<vmem>>, vector<256x256xf32>
    %cst_9 = arith.constant dense<0.000000e+00> : vector<256x256xf32>
    %17 = tpu.matmul %14, %16, %cst_9 {dimension_numbers = #tpu.dot_dimension_numbers<[1], [0], [0], [1], [0, 0, 1, 1], [], []>} : vector<256x256xf32>, vector<256x256xf32>, vector<256x256xf32> -> vector<256x256xf32>
    %18 = arith.addf %15, %17 : vector<256x256xf32>
    %c0_10 = arith.constant 0 : index
    %c0_11 = arith.constant 0 : index
    %19 = vector.load %arg6[%c0_10, %c0_11] : memref<256x256xf32, #tpu.memory_space<vmem>>, vector<256x256xf32>
    tpu.vector_store %arg6[%c0_10, %c0_11], %18 {strides = array<i32>} : memref<256x256xf32, #tpu.memory_space<vmem>>, vector<256x256xf32>,
    %c1_i32 = arith.constant 1 : i32
    %20 = arith.cmpi eq, %arg1, %c1_i32 : i32
    %21 = arith.extui %20 : i1 to i32
    %c0_i32_12 = arith.constant 0 : i32
    %22 = arith.cmpi ne, %21, %c0_i32_12 : i32
    scf.if %22 {
      %c0_13 = arith.constant 0 : index
      %c0_14 = arith.constant 0 : index
      %23 = vector.load %arg6[%c0_13, %c0_14] : memref<256x256xf32, #tpu.memory_space<vmem>>, vector<256x256xf32>
      %c0_15 = arith.constant 0 : index
      %c0_16 = arith.constant 0 : index
      %24 = vector.load %arg5[%c0_15, %c0_16] : memref<256x256xf32, #tpu.memory_space<vmem>>, vector<256x256xf32>
      tpu.vector_store %arg5[%c0_15, %c0_16], %23 {strides = array<i32>} : memref<256x256xf32, #tpu.memory_space<vmem>>, vector<256x256xf32>,
    } else {
    }
    return
  }
  func.func @transform_0(%arg0: i32, %arg1: i32) -> (i32, i32) {
    %c0_i32 = arith.constant 0 : i32
    %c0_i32_0 = arith.constant 0 : i32
    return %arg0, %c0_i32 : i32, i32
  }
  func.func @transform_1(%arg0: i32, %arg1: i32) -> (i32, i32) {
    %c0_i32 = arith.constant 0 : i32
    %c0_i32_0 = arith.constant 0 : i32
    return %c0_i32, %arg1 : i32, i32
  }
  func.func @transform_2(%arg0: i32, %arg1: i32) -> (i32, i32) {
    %c0_i32 = arith.constant 0 : i32
    %c0_i32_0 = arith.constant 0 : i32
    return %arg1, %c0_i32 : i32, i32
  }
  func.func @transform_3(%arg0: i32, %arg1: i32) -> (i32, i32) {
    %c0_i32 = arith.constant 0 : i32
    %c0_i32_0 = arith.constant 0 : i32
    return %arg0, %c0_i32 : i32, i32
  }
}

</mosaic_0001>

<bundles_post_ra>
// kernel: _phi3_mlp_forward_impl.1
= control target key start
LH: loop header
LB: loop body
LE: loop exit
PB: predicated region body
PF: predicated region fallthrough
CT: control target
= control target key end

     0   :  { %8 = vsyncpa [#allocation4], 0  ;;  %s7625_s0 = inlined_call_operand.hbm [shape: f32[256,256], index: 0, kind: input, shape index: {}]   ;;  %s7626_s1 = inlined_call_operand.hbm [shape: f32[256,1024], index: 1, kind: input, shape index: {}]   ;;  %s7627_s2 = inlined_call_operand.hbm [shape: f32[512,256], index: 2, kind: input, shape index: {}]   ;;  %s7628_s3 = inlined_call_operand.hbm [shape: f32[256,256], index: 3, kind: output, shape index: {}]  }
   0x1   :  { %9 = vsyncpa [#allocation7], 0 }
   0x2   :  { %11 = vsyncpa [#allocation7 + $0x1], 0 }
   0x3   :  { %12 = vsyncpa [#allocation5], 0  ;;  %s4400_s12 = smov 0   ;;  %s4402_s13 = smov 0  }
   0x4   :  { %s4404_s14 = smov 0   ;;  %s4406_s15 = smov 0  }
   0x5   :  { %s4408_s16 = smov 0   ;;  %s4410_s17 = smov 0  }
   0x6 LB: > { %s27_s18 = sadd.s32 1, %s4364_s16  ;;  %s63_s19 = sadd.s32 1, %s4356_s14  ;;  %s4368_s17 = sphi %s4410_s17, %s18_s17   ;;  %s4364_s16 = sphi %s4408_s16, %s8152_s16   ;;  %s4360_s15 = sphi %s4406_s15, %s8151_s15   ;;  %s4356_s14 = sphi %s4404_s14, %s8150_s14   ;;  %s4352_s13 = sphi %s4402_s13, %s8149_s13   ;;  %s4348_s12 = sphi %s4400_s12, %s8148_s12  }
   0x7   : > { %p28_p0 = scmp.ge.s32.totalorder %s27_s18, 2  ;;  %p70_p1 = scmp.ne.s32.totalorder %s4356_s14, %s4352_s13 }
   0x8   : > { %p71_p2 = scmp.eq.s32.totalorder %s4368_s17, 0  ;;  %p3836_p4 = scmp.lt.s32.totalorder %s4368_s17, 2 }
   0x9   : > { %s8154_s18 = smov (%p28_p0, %s27_s18), 0  ;;  %s170_s22 = sand.u32 1, %s4368_s17  }
   0xa   : > { %p4437_p3 = por %p71_p2, %p70_p1  ;;  %s60_s21 = ssub.s32 %s4364_s16, %s8154_s18 }
   0xb   : > { %p61_p5 = scmp.eq.s32.totalorder %s60_s21, 0  ;;  %s172_s23 = sand.u32 1, %s4356_s14  }
   0xc   : > { %s3809_s24 = sshll.u32 %s4364_s16, 5  ;;  %s3728_s26 = sshll.u32 %s172_s23, 10 }
   0xd   : > { %s4448_s25 = scalar_select %p61_p5, %s4356_s14, %s63_s19  }
   0xe   : > { %s179_s29 = scalar_lea.hbm %s7626_s1, %s3809_s24  ;;  %s174_s4 = scalar_lea.vmem [#allocation6], %s3728_s26 }
   0xf   : > { %s180_s30 = sshll.u32 %s179_s29, 4  ;;  %s182_s5 = sshll.u32 %s174_s4, 4  ;;  %s181_s30 = int_to_ptr.hbm [resolvable:$true] %s180_s30  ;;  %s183_s5 = int_to_ptr.vmem [resolvable:$true] %s182_s5 }
  0x10   : > { %p4457_p6 = pnand %p3836_p4, %p4437_p3  ;;  %s4461_s7 = scalar_lea.sflag [#allocation7], %s170_s22 }
  0x11   : > { %s4370_s8 = smov 1024   ;;  %s4371_s9 = smov 512  }
  0x12   : > { %s4372_s10 = smov 32   ;;  %s4467_s11 = sadd.s32 4294967295, %s4368_s17  }
  0x13   : > { %3831 = dma.hbm_to_vmem [thread:$0]  (!%p4457_p6), %s181_s30, 16384, %s183_s5, %s4461_s7, %s4370_s8, %s4371_s9, %s4372_s10  }
  0x14   : > { %p76_p7 = scmp.ne.s32.totalorder %s4352_s13, %s4348_s12  ;;  %p77_p8 = scmp.eq.s32.totalorder %s4467_s11, 0 }
  0x15   : > { %p3725_p9 = scmp.ge.s32.totalorder %s4368_s17, 1  ;;  %p139_p10 = scmp.lt.s32.totalorder %s4368_s17, 3 }
  0x16   : > { %p4476_p11 = por %p77_p8, %p76_p7  ;;  %s154_s22 = sshll.u32 %s7625_s0, 4  ;;  %s155_s22 = int_to_ptr.hbm [resolvable:$true] %s154_s22 }
  0x17   : > { %p4483_p12 = pnand %p3725_p9, %p139_p10  ;;  %s4373_s12 = smov [#allocation3]  }
  0x18   : > { %s156_s26 = sshll.u32 %s4373_s12, 4  ;;  %s3731_s27 = sshll.u32 %s172_s23, 9  ;;  %s157_s26 = int_to_ptr.vmem [resolvable:$true] %s156_s26 }
  0x19   : > { %p3824_p13 = pneg %p4483_p12  ;;  %s3811_s28 = sshll.u32 %s4364_s16, 9 }
  0x1a   : > { %s202_s4 = scalar_lea.hbm %s7627_s2, %s3811_s28  ;;  %s4374_s5 = smov 256  }
  0x1b   : > { %p3825_p0 = pnand %p3824_p13, %p77_p8  ;;  %s4375_s8 = smov 16  }
  0x1c   : > { %s203_s9 = sshll.u32 %s202_s4, 4  ;;  %s196_s10 = scalar_lea.vmem [#allocation8], %s3731_s27  ;;  %s204_s9 = int_to_ptr.hbm [resolvable:$true] %s203_s9 }
  0x1d   : > { %3827 = dma.hbm_to_vmem [thread:$0]  (!%p3825_p0), %s155_s22, 8192, %s157_s26, [#allocation4], %s4374_s5, %s4374_s5, %s4375_s8  }
  0x1e   : > { %s205_s20 = sshll.u32 %s196_s10, 4  ;;  %217 = sbr.rel (%p4483_p12) target bundleno = 1119 (0x45f), region = 32  ;;  %s206_s20 = int_to_ptr.vmem [resolvable:$true] %s205_s20 }
  0x1f   : > { %3834 = dma.hbm_to_vmem [thread:$0]  (!%p4457_p6), %s204_s9, 8192, %s206_s20, %s4461_s7, %s4374_s5, %s4374_s5, %s4375_s8  }
  0x23   : > { %4335 = dma.done.wait (%p77_p8), [#allocation4], 8192  }
  0x24   : > { %4337 = vsyncadd (%p77_p8), [#allocation4], 4294959104  ;;  %s224_s23 = sand.u32 1, %s4467_s11   ;;  %s226_s21 = sand.u32 1, %s4352_s13  }
  0x25   : > { %s3737_s22 = sshll.u32 %s226_s21, 10  ;;  %s225_s12 = scalar_lea.sflag [#allocation7], %s224_s23 }
  0x26   : > { %s4506_s26 = scalar_lea.vmem [#allocation6], %s3737_s22 }
  0x27   : > { %4339 = dma.done.wait (%p4476_p11), %s225_s12, 24576  }
  0x28   : > { %4341 = vsyncadd (%p4476_p11), %s225_s12, 4294942720  ;;  %s3738_s6 = sshll.u32 %s226_s21, 9  ;;  %p3739_p1 = scmp.ne.s32.totalorder %s4360_s15, 0 }
  0x29   : > { %s4512_s7 = scalar_lea.vmem [#allocation8], %s3738_s6 }
  0x2a   : > { %269 = sbr.rel (%p3739_p1) target bundleno = 112 (0x70), region = 48 }
  0x2f   : > { %v4376_v0 = vmov 0.0  }
  0x30   : > { %270 = vst [vmem:[#allocation2 + $0xb0] sm:$0xff] %v4376_v0 }
  0x31   : > { %271 = vst [vmem:[#allocation2 + $0x1b0] sm:$0xff] %v4376_v0 }
  0x32   : > { %272 = vst [vmem:[#allocation2 + $0xd8] sm:$0xff] %v4376_v0 }
  0x33   : > { %273 = vst [vmem:[#allocation2 + $0x18] sm:$0xff] %v4376_v0 }
  0x34   : > { %274 = vst [vmem:[#allocation2 + $0x50] sm:$0xff] %v4376_v0 }
  0x35   : > { %275 = vst [vmem:[#allocation2 + $0x168] sm:$0xff] %v4376_v0 }
  0x36   : > { %276 = vst [vmem:[#allocation2 + $0x130] sm:$0xff] %v4376_v0 }
  0x37   : > { %277 = vst [vmem:[#allocation2 + $0x48] sm:$0xff] %v4376_v0 }
  0x38   : > { %278 = vst [vmem:[#allocation2 + $0x180] sm:$0xff] %v4376_v0 }
  0x39   : > { %279 = vst [vmem:[#allocation2 + $0x110] sm:$0xff] %v4376_v0 }
  0x3a   : > { %280 = vst [vmem:[#allocation2 + $0x118] sm:$0xff] %v4376_v0 }
  0x3b   : > { %281 = vst [vmem:[#allocation2 + $0x98] sm:$0xff] %v4376_v0 }
  0x3c   : > { %282 = vst [vmem:[#allocation2 + $0x120] sm:$0xff] %v4376_v0 }
  0x3d   : > { %283 = vst [vmem:[#allocation2 + $0x150] sm:$0xff] %v4376_v0 }
  0x3e   : > { %284 = vst [vmem:[#allocation2 + $0x108] sm:$0xff] %v4376_v0 }
  0x3f   : > { %285 = vst [vmem:[#allocation2 + $0x60] sm:$0xff] %v4376_v0 }
  0x40   : > { %286 = vst [vmem:[#allocation2 + $0xe0] sm:$0xff] %v4376_v0 }
  0x41   : > { %287 = vst [vmem:[#allocation2 + $0x188] sm:$0xff] %v4376_v0 }
  0x42   : > { %288 = vst [vmem:[#allocation2 + $0x138] sm:$0xff] %v4376_v0 }
  0x43   : > { %289 = vst [vmem:[#allocation2 + $0x140] sm:$0xff] %v4376_v0 }
  0x44   : > { %290 = vst [vmem:[#allocation2 + $0x80] sm:$0xff] %v4376_v0 }
  0x45   : > { %291 = vst [vmem:[#allocation2 + $0x1a8] sm:$0xff] %v4376_v0 }
  0x46   : > { %292 = vst [vmem:[#allocation2 + $0x1b8] sm:$0xff] %v4376_v0 }
  0x47   : > { %293 = vst [vmem:[#allocation2 + $0x28] sm:$0xff] %v4376_v0 }
  0x48   : > { %294 = vst [vmem:[#allocation2 + $0x1e8] sm:$0xff] %v4376_v0 }
  0x49   : > { %295 = vst [vmem:[#allocation2 + $0xf8] sm:$0xff] %v4376_v0 }
  0x4a   : > { %296 = vst [vmem:[#allocation2 + $0x160] sm:$0xff] %v4376_v0 }
  0x4b   : > { %297 = vst [vmem:[#allocation2 + $0x30] sm:$0xff] %v4376_v0 }
  0x4c   : > { %298 = vst [vmem:[#allocation2 + $0x1e0] sm:$0xff] %v4376_v0 }
  0x4d   : > { %299 = vst [vmem:[#allocation2] sm:$0xff] %v4376_v0 }
  0x4e   : > { %300 = vst [vmem:[#allocation2 + $0xf0] sm:$0xff] %v4376_v0 }
  0x4f   : > { %301 = vst [vmem:[#allocation2 + $0x8] sm:$0xff] %v4376_v0 }
  0x50   : > { %302 = vst [vmem:[#allocation2 + $0x148] sm:$0xff] %v4376_v0 }
  0x51   : > { %303 = vst [vmem:[#allocation2 + $0x1d0] sm:$0xff] %v4376_v0 }
  0x52   : > { %304 = vst [vmem:[#allocation2 + $0x100] sm:$0xff] %v4376_v0 }
  0x53   : > { %305 = vst [vmem:[#allocation2 + $0xc8] sm:$0xff] %v4376_v0 }
  0x54   : > { %306 = vst [vmem:[#allocation2 + $0x40] sm:$0xff] %v4376_v0 }
  0x55   : > { %307 = vst [vmem:[#allocation2 + $0x1f8] sm:$0xff] %v4376_v0 }
  0x56   : > { %308 = vst [vmem:[#allocation2 + $0x20] sm:$0xff] %v4376_v0 }
  0x57   : > { %309 = vst [vmem:[#allocation2 + $0x128] sm:$0xff] %v4376_v0 }
  0x58   : > { %310 = vst [vmem:[#allocation2 + $0x1a0] sm:$0xff] %v4376_v0 }
  0x59   : > { %311 = vst [vmem:[#allocation2 + $0x1f0] sm:$0xff] %v4376_v0 }
  0x5a   : > { %312 = vst [vmem:[#allocation2 + $0xe8] sm:$0xff] %v4376_v0 }
  0x5b   : > { %313 = vst [vmem:[#allocation2 + $0x78] sm:$0xff] %v4376_v0 }
  0x5c   : > { %314 = vst [vmem:[#allocation2 + $0x70] sm:$0xff] %v4376_v0 }
  0x5d   : > { %315 = vst [vmem:[#allocation2 + $0x90] sm:$0xff] %v4376_v0 }
  0x5e   : > { %316 = vst [vmem:[#allocation2 + $0x1d8] sm:$0xff] %v4376_v0 }
  0x5f   : > { %317 = vst [vmem:[#allocation2 + $0xd0] sm:$0xff] %v4376_v0 }
  0x60   : > { %318 = vst [vmem:[#allocation2 + $0xb8] sm:$0xff] %v4376_v0 }
  0x61   : > { %319 = vst [vmem:[#allocation2 + $0x88] sm:$0xff] %v4376_v0 }
  0x62   : > { %320 = vst [vmem:[#allocation2 + $0xa8] sm:$0xff] %v4376_v0 }
  0x63   : > { %321 = vst [vmem:[#allocation2 + $0x1c8] sm:$0xff] %v4376_v0 }
  0x64   : > { %322 = vst [vmem:[#allocation2 + $0x170] sm:$0xff] %v4376_v0 }
  0x65   : > { %323 = vst [vmem:[#allocation2 + $0x178] sm:$0xff] %v4376_v0 }
  0x66   : > { %324 = vst [vmem:[#allocation2 + $0x68] sm:$0xff] %v4376_v0 }
  0x67   : > { %325 = vst [vmem:[#allocation2 + $0x190] sm:$0xff] %v4376_v0 }
  0x68   : > { %326 = vst [vmem:[#allocation2 + $0x198] sm:$0xff] %v4376_v0 }
  0x69   : > { %327 = vst [vmem:[#allocation2 + $0x38] sm:$0xff] %v4376_v0 }
  0x6a   : > { %328 = vst [vmem:[#allocation2 + $0xc0] sm:$0xff] %v4376_v0 }
  0x6b   : > { %329 = vst [vmem:[#allocation2 + $0x1c0] sm:$0xff] %v4376_v0 }
  0x6c   : > { %330 = vst [vmem:[#allocation2 + $0x158] sm:$0xff] %v4376_v0 }
  0x6d   : > { %331 = vst [vmem:[#allocation2 + $0x10] sm:$0xff] %v4376_v0 }
  0x6e   : > { %332 = vst [vmem:[#allocation2 + $0x58] sm:$0xff] %v4376_v0 }
  0x6f   : > { %333 = vst [vmem:[#allocation2 + $0xa0] sm:$0xff] %v4376_v0 }
  0x70 PF: > { %v458_v1 = vld [vmem:[%s4506_s26 + $0x1e0] sm:$0xff]  ;;  %v459_v3 = vld [vmem:[%s4506_s26 + $0x1e8] sm:$0xff]  ;;  %p3804_p2 = scmp.ne.s32.totalorder %s4360_s15, 1 }
  0x71   : > { %v522_v2 = vld [vmem:[%s4506_s26 + $0x3e0] sm:$0xff]  ;;  %526 = vmatpush.msra.mxu0 %v458_v1  ;;  %v523_v4 = vld [vmem:[%s4506_s26 + $0x3e8] sm:$0xff]  ;;  %752 = vmatpush.msra.mxu2 %v459_v3  ;;  %v461_v3 = vld [vmem:[%s4506_s26 + $0x1f8] sm:$0xff] }
  0x72   : > { %639 = vmatpush.msra.mxu1 %v522_v2  ;;  %v454_v5 = vld [vmem:[%s4506_s26 + $0x1c0] sm:$0xff]  ;;  %865 = vmatpush.msra.mxu3 %v523_v4  ;;  %v455_v7 = vld [vmem:[%s4506_s26 + $0x1c8] sm:$0xff]  ;;  %v525_v4 = vld [vmem:[%s4506_s26 + $0x3f8] sm:$0xff] }
  0x73   : > { %v518_v6 = vld [vmem:[%s4506_s26 + $0x3c0] sm:$0xff]  ;;  %v519_v8 = vld [vmem:[%s4506_s26 + $0x3c8] sm:$0xff]  ;;  %527 = vmatpush.msra.mxu0 %v454_v5  ;;  %753 = vmatpush.msra.mxu2 %v455_v7  ;;  %v460_v5 = vld [vmem:[%s4506_s26 + $0x1f0] sm:$0xff] }
  0x74   : > { %v450_v9 = vld [vmem:[%s4506_s26 + $0x1a0] sm:$0xff]  ;;  %640 = vmatpush.msra.mxu1 %v518_v6  ;;  %v451_v11 = vld [vmem:[%s4506_s26 + $0x1a8] sm:$0xff]  ;;  %866 = vmatpush.msra.mxu3 %v519_v8  ;;  %v524_v6 = vld [vmem:[%s4506_s26 + $0x3f0] sm:$0xff] }
  0x75   : > { %v514_v10 = vld [vmem:[%s4506_s26 + $0x3a0] sm:$0xff]  ;;  %v515_v12 = vld [vmem:[%s4506_s26 + $0x3a8] sm:$0xff]  ;;  %528 = vmatpush.msra.mxu0 %v450_v9  ;;  %754 = vmatpush.msra.mxu2 %v451_v11  ;;  %v457_v7 = vld [vmem:[%s4506_s26 + $0x1d8] sm:$0xff] }
  0x76   : > { %v446_v13 = vld [vmem:[%s4506_s26 + $0x180] sm:$0xff]  ;;  %641 = vmatpush.msra.mxu1 %v514_v10  ;;  %v447_v15 = vld [vmem:[%s4506_s26 + $0x188] sm:$0xff]  ;;  %867 = vmatpush.msra.mxu3 %v515_v12  ;;  %v521_v8 = vld [vmem:[%s4506_s26 + $0x3d8] sm:$0xff] }
  0x77   : > { %v510_v14 = vld [vmem:[%s4506_s26 + $0x380] sm:$0xff]  ;;  %v511_v16 = vld [vmem:[%s4506_s26 + $0x388] sm:$0xff]  ;;  %529 = vmatpush.msra.mxu0 %v446_v13  ;;  %755 = vmatpush.msra.mxu2 %v447_v15  ;;  %v456_v9 = vld [vmem:[%s4506_s26 + $0x1d0] sm:$0xff] }
  0x78   : > { %v442_v17 = vld [vmem:[%s4506_s26 + $0x160] sm:$0xff]  ;;  %642 = vmatpush.msra.mxu1 %v510_v14  ;;  %v443_v19 = vld [vmem:[%s4506_s26 + $0x168] sm:$0xff]  ;;  %868 = vmatpush.msra.mxu3 %v511_v16  ;;  %v520_v10 = vld [vmem:[%s4506_s26 + $0x3d0] sm:$0xff] }
  0x79   : > { %v506_v18 = vld [vmem:[%s4506_s26 + $0x360] sm:$0xff]  ;;  %v507_v20 = vld [vmem:[%s4506_s26 + $0x368] sm:$0xff]  ;;  %530 = vmatpush.msra.mxu0 %v442_v17  ;;  %756 = vmatpush.msra.mxu2 %v443_v19  ;;  %v453_v11 = vld [vmem:[%s4506_s26 + $0x1b8] sm:$0xff] }
  0x7a   : > { %v438_v21 = vld [vmem:[%s4506_s26 + $0x140] sm:$0xff]  ;;  %643 = vmatpush.msra.mxu1 %v506_v18  ;;  %v439_v23 = vld [vmem:[%s4506_s26 + $0x148] sm:$0xff]  ;;  %869 = vmatpush.msra.mxu3 %v507_v20  ;;  %v517_v12 = vld [vmem:[%s4506_s26 + $0x3b8] sm:$0xff] }
  0x7b   : > { %v502_v22 = vld [vmem:[%s4506_s26 + $0x340] sm:$0xff]  ;;  %v503_v24 = vld [vmem:[%s4506_s26 + $0x348] sm:$0xff]  ;;  %531 = vmatpush.msra.mxu0 %v438_v21  ;;  %757 = vmatpush.msra.mxu2 %v439_v23  ;;  %v452_v13 = vld [vmem:[%s4506_s26 + $0x1b0] sm:$0xff] }
  0x7c   : > { %v434_v25 = vld [vmem:[%s4506_s26 + $0x120] sm:$0xff]  ;;  %644 = vmatpush.msra.mxu1 %v502_v22  ;;  %v435_v27 = vld [vmem:[%s4506_s26 + $0x128] sm:$0xff]  ;;  %870 = vmatpush.msra.mxu3 %v503_v24  ;;  %v516_v14 = vld [vmem:[%s4506_s26 + $0x3b0] sm:$0xff] }
  0x7d   : > { %v498_v26 = vld [vmem:[%s4506_s26 + $0x320] sm:$0xff]  ;;  %v499_v28 = vld [vmem:[%s4506_s26 + $0x328] sm:$0xff]  ;;  %532 = vmatpush.msra.mxu0 %v434_v25  ;;  %758 = vmatpush.msra.mxu2 %v435_v27  ;;  %v4663_v15 = vld [vmem:[#allocation3 + $0x10] sm:$0xff] }
  0x7e   : > { %v430_v29 = vld [vmem:[%s4506_s26 + $0x100] sm:$0xff]  ;;  %645 = vmatpush.msra.mxu1 %v498_v26  ;;  %v431_v31 = vld [vmem:[%s4506_s26 + $0x108] sm:$0xff]  ;;  %871 = vmatpush.msra.mxu3 %v499_v28  ;;  %v4665_v16 = vld [vmem:[#allocation3 + $0x18] sm:$0xff] }
  0x7f   : > { %v494_v30 = vld [vmem:[%s4506_s26 + $0x300] sm:$0xff]  ;;  %v495_v32 = vld [vmem:[%s4506_s26 + $0x308] sm:$0xff]  ;;  %533 = vmatpush.msra.mxu0 %v430_v29  ;;  %759 = vmatpush.msra.mxu2 %v431_v31  ;;  %v449_v19 = vld [vmem:[%s4506_s26 + $0x198] sm:$0xff] }
  0x80   : > { %v426_v33 = vld [vmem:[%s4506_s26 + $0xe0] sm:$0xff]  ;;  %646 = vmatpush.msra.mxu1 %v494_v30  ;;  %v427_v35 = vld [vmem:[%s4506_s26 + $0xe8] sm:$0xff]  ;;  %872 = vmatpush.msra.mxu3 %v495_v32  ;;  %v513_v20 = vld [vmem:[%s4506_s26 + $0x398] sm:$0xff] }
  0x81   : > { %v490_v34 = vld [vmem:[%s4506_s26 + $0x2e0] sm:$0xff]  ;;  %v491_v36 = vld [vmem:[%s4506_s26 + $0x2e8] sm:$0xff]  ;;  %534 = vmatpush.msra.mxu0 %v426_v33  ;;  %760 = vmatpush.msra.mxu2 %v427_v35  ;;  %v448_v21 = vld [vmem:[%s4506_s26 + $0x190] sm:$0xff] }
  0x82   : > { %v422_v37 = vld [vmem:[%s4506_s26 + $0xc0] sm:$0xff]  ;;  %647 = vmatpush.msra.mxu1 %v490_v34  ;;  %v423_v39 = vld [vmem:[%s4506_s26 + $0xc8] sm:$0xff]  ;;  %873 = vmatpush.msra.mxu3 %v491_v36  ;;  %v512_v22 = vld [vmem:[%s4506_s26 + $0x390] sm:$0xff] }
  0x83   : > { %v486_v38 = vld [vmem:[%s4506_s26 + $0x2c0] sm:$0xff]  ;;  %v487_v40 = vld [vmem:[%s4506_s26 + $0x2c8] sm:$0xff]  ;;  %535 = vmatpush.msra.mxu0 %v422_v37  ;;  %761 = vmatpush.msra.mxu2 %v423_v39  ;;  %v4683_v23 = vld [vmem:[#allocation3 + $0x30] sm:$0xff] }
  0x84   : > { %v418_v41 = vld [vmem:[%s4506_s26 + $0xa0] sm:$0xff]  ;;  %648 = vmatpush.msra.mxu1 %v486_v38  ;;  %v419_v43 = vld [vmem:[%s4506_s26 + $0xa8] sm:$0xff]  ;;  %874 = vmatpush.msra.mxu3 %v487_v40  ;;  %v4685_v24 = vld [vmem:[#allocation3 + $0x38] sm:$0xff] }
  0x85   : > { %v482_v42 = vld [vmem:[%s4506_s26 + $0x2a0] sm:$0xff]  ;;  %v483_v44 = vld [vmem:[%s4506_s26 + $0x2a8] sm:$0xff]  ;;  %536 = vmatpush.msra.mxu0 %v418_v41  ;;  %762 = vmatpush.msra.mxu2 %v419_v43  ;;  %v445_v27 = vld [vmem:[%s4506_s26 + $0x178] sm:$0xff] }
  0x86   : > { %v414_v45 = vld [vmem:[%s4506_s26 + $0x80] sm:$0xff]  ;;  %649 = vmatpush.msra.mxu1 %v482_v42  ;;  %v415_v47 = vld [vmem:[%s4506_s26 + $0x88] sm:$0xff]  ;;  %875 = vmatpush.msra.mxu3 %v483_v44  ;;  %v509_v28 = vld [vmem:[%s4506_s26 + $0x378] sm:$0xff] }
  0x87   : > { %v478_v46 = vld [vmem:[%s4506_s26 + $0x280] sm:$0xff]  ;;  %v479_v48 = vld [vmem:[%s4506_s26 + $0x288] sm:$0xff]  ;;  %537 = vmatpush.msra.mxu0 %v414_v45  ;;  %763 = vmatpush.msra.mxu2 %v415_v47  ;;  %v444_v29 = vld [vmem:[%s4506_s26 + $0x170] sm:$0xff] }
  0x88   : > { %v410_v49 = vld [vmem:[%s4506_s26 + $0x60] sm:$0xff]  ;;  %650 = vmatpush.msra.mxu1 %v478_v46  ;;  %v411_v51 = vld [vmem:[%s4506_s26 + $0x68] sm:$0xff]  ;;  %876 = vmatpush.msra.mxu3 %v479_v48  ;;  %v508_v30 = vld [vmem:[%s4506_s26 + $0x370] sm:$0xff] }
  0x89   : > { %v474_v50 = vld [vmem:[%s4506_s26 + $0x260] sm:$0xff]  ;;  %v475_v52 = vld [vmem:[%s4506_s26 + $0x268] sm:$0xff]  ;;  %538 = vmatpush.msra.mxu0 %v410_v49  ;;  %764 = vmatpush.msra.mxu2 %v411_v51  ;;  %v4703_v31 = vld [vmem:[#allocation3 + $0x50] sm:$0xff] }
  0x8a   : > { %v406_v53 = vld [vmem:[%s4506_s26 + $0x40] sm:$0xff]  ;;  %651 = vmatpush.msra.mxu1 %v474_v50  ;;  %v407_v55 = vld [vmem:[%s4506_s26 + $0x48] sm:$0xff]  ;;  %877 = vmatpush.msra.mxu3 %v475_v52  ;;  %v4705_v32 = vld [vmem:[#allocation3 + $0x58] sm:$0xff] }
  0x8b   : > { %v470_v54 = vld [vmem:[%s4506_s26 + $0x240] sm:$0xff]  ;;  %v471_v56 = vld [vmem:[%s4506_s26 + $0x248] sm:$0xff]  ;;  %539 = vmatpush.msra.mxu0 %v406_v53  ;;  %765 = vmatpush.msra.mxu2 %v407_v55  ;;  %v441_v35 = vld [vmem:[%s4506_s26 + $0x158] sm:$0xff] }
  0x8c   : > { %v402_v57 = vld [vmem:[%s4506_s26 + $0x20] sm:$0xff]  ;;  %652 = vmatpush.msra.mxu1 %v470_v54  ;;  %v403_v59 = vld [vmem:[%s4506_s26 + $0x28] sm:$0xff]  ;;  %878 = vmatpush.msra.mxu3 %v471_v56  ;;  %v505_v36 = vld [vmem:[%s4506_s26 + $0x358] sm:$0xff] }
  0x8d   : > { %v466_v58 = vld [vmem:[%s4506_s26 + $0x220] sm:$0xff]  ;;  %v467_v60 = vld [vmem:[%s4506_s26 + $0x228] sm:$0xff]  ;;  %540 = vmatpush.msra.mxu0 %v402_v57  ;;  %766 = vmatpush.msra.mxu2 %v403_v59  ;;  %v440_v37 = vld [vmem:[%s4506_s26 + $0x150] sm:$0xff] }
  0x8e   : > { %v398_v61 = vld [vmem:[%s4506_s26] sm:$0xff]  ;;  %653 = vmatpush.msra.mxu1 %v466_v58  ;;  %v399_v63 = vld [vmem:[%s4506_s26 + $0x8] sm:$0xff]  ;;  %879 = vmatpush.msra.mxu3 %v467_v60  ;;  %v504_v38 = vld [vmem:[%s4506_s26 + $0x350] sm:$0xff] }
  0x8f   : > { %v462_v62 = vld [vmem:[%s4506_s26 + $0x200] sm:$0xff]  ;;  %v463_v0 = vld [vmem:[%s4506_s26 + $0x208] sm:$0xff]  ;;  %541 = vmatpush.msra.mxu0 %v398_v61  ;;  %767 = vmatpush.msra.mxu2 %v399_v63  ;;  %v4723_v39 = vld [vmem:[#allocation3 + $0x70] sm:$0xff] }
  0x90   : > { %v4643_v1 = vld [vmem:[#allocation3] sm:$0xff]  ;;  %v4645_v2 = vld [vmem:[#allocation3 + $0x8] sm:$0xff]  ;;  %654 = vmatpush.msra.mxu1 %v462_v62  ;;  %880 = vmatpush.msra.mxu3 %v463_v0  ;;  %v4725_v40 = vld [vmem:[#allocation3 + $0x78] sm:$0xff] }
  0x91   : > { %542 = vmatmul.f32.vlgmr.msra.gmra.mxu0 %v4643_v1  ;;  %655 = vmatmul.f32.vlgmr.msra.gmra.mxu1 %v4645_v2  ;;  %v4671_v17 = vld [vmem:[#allocation3 + $0x20] sm:$0xff]  ;;  %v4673_v18 = vld [vmem:[#allocation3 + $0x28] sm:$0xff]  ;;  %v437_v43 = vld [vmem:[%s4506_s26 + $0x138] sm:$0xff] }
  0x92   : > { %768 = vmatmul.f32.vlgmr.msra.gmra.mxu2 %v4643_v1  ;;  %881 = vmatmul.f32.vlgmr.msra.gmra.mxu3 %v4645_v2  ;;  %v4691_v25 = vld [vmem:[#allocation3 + $0x40] sm:$0xff]  ;;  %v4693_v26 = vld [vmem:[#allocation3 + $0x48] sm:$0xff]  ;;  %v501_v44 = vld [vmem:[%s4506_s26 + $0x338] sm:$0xff] }
  0x93   : > { %1204 = vmatpush.msrb.mxu2 %v461_v3  ;;  %1317 = vmatpush.msrb.mxu3 %v525_v4  ;;  %v4711_v33 = vld [vmem:[#allocation3 + $0x60] sm:$0xff]  ;;  %v4713_v34 = vld [vmem:[#allocation3 + $0x68] sm:$0xff]  ;;  %v436_v45 = vld [vmem:[%s4506_s26 + $0x130] sm:$0xff] }
  0x94   : > { %978 = vmatpush.msrb.mxu0 %v460_v5  ;;  %1091 = vmatpush.msrb.mxu1 %v524_v6  ;;  %v4731_v41 = vld [vmem:[#allocation3 + $0x80] sm:$0xff]  ;;  %v4733_v42 = vld [vmem:[#allocation3 + $0x88] sm:$0xff]  ;;  %v500_v46 = vld [vmem:[%s4506_s26 + $0x330] sm:$0xff] }
  0x95   : > { %1205 = vmatpush.msrb.mxu2 %v457_v7  ;;  %1318 = vmatpush.msrb.mxu3 %v521_v8  ;;  %v4743_v47 = vld [vmem:[#allocation3 + $0x90] sm:$0xff]  ;;  %v4745_v48 = vld [vmem:[#allocation3 + $0x98] sm:$0xff]  ;;  %v4751_v49 = vld [vmem:[#allocation3 + $0xa0] sm:$0xff] }
  0x96   : > { %979 = vmatpush.msrb.mxu0 %v456_v9  ;;  %1092 = vmatpush.msrb.mxu1 %v520_v10  ;;  %v4753_v50 = vld [vmem:[#allocation3 + $0xa8] sm:$0xff]  ;;  %v433_v51 = vld [vmem:[%s4506_s26 + $0x118] sm:$0xff]  ;;  %v432_v53 = vld [vmem:[%s4506_s26 + $0x110] sm:$0xff] }
  0x97   : > { %1206 = vmatpush.msrb.mxu2 %v453_v11  ;;  %1319 = vmatpush.msrb.mxu3 %v517_v12  ;;  %v497_v52 = vld [vmem:[%s4506_s26 + $0x318] sm:$0xff]  ;;  %v496_v54 = vld [vmem:[%s4506_s26 + $0x310] sm:$0xff]  ;;  %v4771_v57 = vld [vmem:[#allocation3 + $0xc0] sm:$0xff] }
  0x98   : > { %980 = vmatpush.msrb.mxu0 %v452_v13  ;;  %1093 = vmatpush.msrb.mxu1 %v516_v14  ;;  %v4763_v55 = vld [vmem:[#allocation3 + $0xb0] sm:$0xff]  ;;  %v4765_v56 = vld [vmem:[#allocation3 + $0xb8] sm:$0xff]  ;;  %v4773_v58 = vld [vmem:[#allocation3 + $0xc8] sm:$0xff] }
  0x99   : > { %545 = vmatmul.f32.gmra.mxu0 %v4663_v15  ;;  %658 = vmatmul.f32.gmra.mxu1 %v4665_v16  ;;  %v360_v59 = vld [vmem:[#allocation3 + $0xd0] sm:$0xff]  ;;  %v361_v60 = vld [vmem:[#allocation3 + $0xd8] sm:$0xff]  ;;  %v362_v61 = vld [vmem:[#allocation3 + $0xe0] sm:$0xff] }
  0x9a   : > { %771 = vmatmul.f32.gmra.mxu2 %v4663_v15  ;;  %884 = vmatmul.f32.gmra.mxu3 %v4665_v16  ;;  %v363_v62 = vld [vmem:[#allocation3 + $0xe8] sm:$0xff]  ;;  %v364_v63 = vld [vmem:[#allocation3 + $0xf0] sm:$0xff]  ;;  %v365_v0 = vld [vmem:[#allocation3 + $0xf8] sm:$0xff] }
  0x9b   : > { %1207 = vmatpush.msrb.mxu2 %v449_v19  ;;  %1320 = vmatpush.msrb.mxu3 %v513_v20  ;;  %v429_v3 = vld [vmem:[%s4506_s26 + $0xf8] sm:$0xff]  ;;  %v366_v7 = vld [vmem:[#allocation3 + $0x100] sm:$0xff]  ;;  %v367_v8 = vld [vmem:[#allocation3 + $0x108] sm:$0xff] }
  0x9c   : > { %981 = vmatpush.msrb.mxu0 %v448_v21  ;;  %1094 = vmatpush.msrb.mxu1 %v512_v22  ;;  %v493_v4 = vld [vmem:[%s4506_s26 + $0x2f8] sm:$0xff]  ;;  %v428_v11 = vld [vmem:[%s4506_s26 + $0xf0] sm:$0xff] }
  0x9d   : > { %1208 = vmatpush.msrb.mxu2 %v445_v27  ;;  %1321 = vmatpush.msrb.mxu3 %v509_v28  ;;  %v492_v12 = vld [vmem:[%s4506_s26 + $0x2f0] sm:$0xff]  ;;  %v369_v21 = vld [vmem:[#allocation3 + $0x118] sm:$0xff] }
  0x9e   : > { %982 = vmatpush.msrb.mxu0 %v444_v29  ;;  %1095 = vmatpush.msrb.mxu1 %v508_v30  ;;  %v368_v20 = vld [vmem:[#allocation3 + $0x110] sm:$0xff] }
  0x9f   : > { %1209 = vmatpush.msrb.mxu2 %v441_v35  ;;  %1322 = vmatpush.msrb.mxu3 %v505_v36  ;;  %v370_v35 = vld [vmem:[#allocation3 + $0x120] sm:$0xff]  ;;  %v371_v36 = vld [vmem:[#allocation3 + $0x128] sm:$0xff] }
  0xa0   : > { %983 = vmatpush.msrb.mxu0 %v440_v37  ;;  %1096 = vmatpush.msrb.mxu1 %v504_v38  ;;  %v425_v37 = vld [vmem:[%s4506_s26 + $0xd8] sm:$0xff] }
  0xa1   : > { %548 = vmatmul.f32.gmra.mxu0 %v4671_v17  ;;  %661 = vmatmul.f32.gmra.mxu1 %v4673_v18  ;;  %v489_v38 = vld [vmem:[%s4506_s26 + $0x2d8] sm:$0xff] }
  0xa2   : > { %774 = vmatmul.f32.gmra.mxu2 %v4671_v17  ;;  %887 = vmatmul.f32.gmra.mxu3 %v4673_v18 }
  0xa3   : > { %1210 = vmatpush.msrb.mxu2 %v437_v43  ;;  %1323 = vmatpush.msrb.mxu3 %v501_v44 }
  0xa4   : > { %984 = vmatpush.msrb.mxu0 %v436_v45  ;;  %1097 = vmatpush.msrb.mxu1 %v500_v46 }
  0xa5   : > { %1211 = vmatpush.msrb.mxu2 %v433_v51  ;;  %1324 = vmatpush.msrb.mxu3 %v497_v52  ;;  %v372_v52 = vld [vmem:[#allocation3 + $0x130] sm:$0xff] }
  0xa6   : > { %985 = vmatpush.msrb.mxu0 %v432_v53  ;;  %1098 = vmatpush.msrb.mxu1 %v496_v54  ;;  %v373_v53 = vld [vmem:[#allocation3 + $0x138] sm:$0xff]  ;;  %v424_v54 = vld [vmem:[%s4506_s26 + $0xd0] sm:$0xff] }
  0xa7   : > { %1212 = vmatpush.msrb.mxu2 %v429_v3  ;;  %1325 = vmatpush.msrb.mxu3 %v493_v4  ;;  %v374_v3 = vld [vmem:[#allocation3 + $0x140] sm:$0xff]  ;;  %v375_v4 = vld [vmem:[#allocation3 + $0x148] sm:$0xff] }
  0xa8   : > { %986 = vmatpush.msrb.mxu0 %v428_v11  ;;  %1099 = vmatpush.msrb.mxu1 %v492_v12 }
  0xa9   : > { %551 = vmatmul.f32.gmra.mxu0 %v4683_v23  ;;  %664 = vmatmul.f32.gmra.mxu1 %v4685_v24 }
  0xaa   : > { %777 = vmatmul.f32.gmra.mxu2 %v4683_v23  ;;  %890 = vmatmul.f32.gmra.mxu3 %v4685_v24 }
  0xab   : > { %1213 = vmatpush.msrb.mxu2 %v425_v37  ;;  %1326 = vmatpush.msrb.mxu3 %v489_v38  ;;  %v484_v37 = vld [vmem:[%s4506_s26 + $0x2b0] sm:$0xff] }
  0xac   : > { %987 = vmatpush.msrb.mxu0 %v424_v54  ;;  %v417_v54 = vld [vmem:[%s4506_s26 + $0x98] sm:$0xff] }
  0xb1   : > { %554 = vmatmul.f32.gmra.mxu0 %v4691_v25  ;;  %667 = vmatmul.f32.gmra.mxu1 %v4693_v26 }
  0xb2   : > { %780 = vmatmul.f32.gmra.mxu2 %v4691_v25  ;;  %893 = vmatmul.f32.gmra.mxu3 %v4693_v26 }
  0xb9   : > { %557 = vmatmul.f32.gmra.mxu0 %v4703_v31  ;;  %670 = vmatmul.f32.gmra.mxu1 %v4705_v32 }
  0xba   : > { %783 = vmatmul.f32.gmra.mxu2 %v4703_v31  ;;  %896 = vmatmul.f32.gmra.mxu3 %v4705_v32 }
  0xc1   : > { %560 = vmatmul.f32.gmra.mxu0 %v4711_v33  ;;  %673 = vmatmul.f32.gmra.mxu1 %v4713_v34 }
  0xc2   : > { %786 = vmatmul.f32.gmra.mxu2 %v4711_v33  ;;  %899 = vmatmul.f32.gmra.mxu3 %v4713_v34 }
  0xc9   : > { %563 = vmatmul.f32.gmra.mxu0 %v4723_v39  ;;  %676 = vmatmul.f32.gmra.mxu1 %v4725_v40 }
  0xca   : > { %789 = vmatmul.f32.gmra.mxu2 %v4723_v39  ;;  %902 = vmatmul.f32.gmra.mxu3 %v4725_v40 }
  0xd1   : > { %566 = vmatmul.f32.gmra.mxu0 %v4731_v41  ;;  %679 = vmatmul.f32.gmra.mxu1 %v4733_v42 }
  0xd2   : > { %792 = vmatmul.f32.gmra.mxu2 %v4731_v41  ;;  %905 = vmatmul.f32.gmra.mxu3 %v4733_v42 }
  0xd9   : > { %569 = vmatmul.f32.gmra.mxu0 %v4743_v47  ;;  %682 = vmatmul.f32.gmra.mxu1 %v4745_v48 }
  0xda   : > { %795 = vmatmul.f32.gmra.mxu2 %v4743_v47  ;;  %908 = vmatmul.f32.gmra.mxu3 %v4745_v48 }
  0xe1   : > { %572 = vmatmul.f32.gmra.mxu0 %v4751_v49  ;;  %685 = vmatmul.f32.gmra.mxu1 %v4753_v50 }
  0xe2   : > { %798 = vmatmul.f32.gmra.mxu2 %v4751_v49  ;;  %911 = vmatmul.f32.gmra.mxu3 %v4753_v50 }
  0xe9   : > { %575 = vmatmul.f32.gmra.mxu0 %v4763_v55  ;;  %688 = vmatmul.f32.gmra.mxu1 %v4765_v56 }
  0xea   : > { %801 = vmatmul.f32.gmra.mxu2 %v4763_v55  ;;  %914 = vmatmul.f32.gmra.mxu3 %v4765_v56 }
  0xf1   : > { %578 = vmatmul.f32.gmra.mxu0 %v4771_v57  ;;  %691 = vmatmul.f32.gmra.mxu1 %v4773_v58 }
  0xf2   : > { %804 = vmatmul.f32.gmra.mxu2 %v4771_v57  ;;  %917 = vmatmul.f32.gmra.mxu3 %v4773_v58 }
  0xf9   : > { %581 = vmatmul.f32.gmra.mxu0 %v360_v59  ;;  %694 = vmatmul.f32.gmra.mxu1 %v361_v60 }
  0xfa   : > { %807 = vmatmul.f32.gmra.mxu2 %v360_v59  ;;  %920 = vmatmul.f32.gmra.mxu3 %v361_v60  ;;  %v488_v59 = vld [vmem:[%s4506_s26 + $0x2d0] sm:$0xff] }
  0xfb   : > { %1100 = vmatpush.msrb.mxu1 %v488_v59  ;;  %v481_v59 = vld [vmem:[%s4506_s26 + $0x298] sm:$0xff] }
  0xfd   : > { %1101 = vmatpush.msrb.mxu1 %v484_v37 }
 0x101   : > { %584 = vmatmul.f32.gmra.mxu0 %v362_v61  ;;  %697 = vmatmul.f32.gmra.mxu1 %v363_v62 }
 0x102   : > { %810 = vmatmul.f32.gmra.mxu2 %v362_v61  ;;  %923 = vmatmul.f32.gmra.mxu3 %v363_v62 }
 0x109   : > { %587 = vmatmul.f32.gmra.mxu0 %v364_v63  ;;  %700 = vmatmul.f32.gmra.mxu1 %v365_v0 }
 0x10a   : > { %813 = vmatmul.f32.gmra.mxu2 %v364_v63  ;;  %926 = vmatmul.f32.gmra.mxu3 %v365_v0 }
 0x10e   : > { %v4781_v5 = vpop.f32.mrf.mxu0  ;;  %v4783_v6 = vpop.f32.mrf.mxu1 }
 0x111   : > { %590 = vmatmul.f32.gmra.mxu0 %v366_v7  ;;  %703 = vmatmul.f32.gmra.mxu1 %v367_v8 }
 0x112   : > { %816 = vmatmul.f32.gmra.mxu2 %v366_v7  ;;  %929 = vmatmul.f32.gmra.mxu3 %v367_v8  ;;  %v421_v7 = vld [vmem:[%s4506_s26 + $0xb8] sm:$0xff] }
 0x113   : > { %v485_v8 = vld [vmem:[%s4506_s26 + $0x2b8] sm:$0xff]  ;;  %1214 = vmatpush.msrb.mxu2 %v421_v7 }
 0x114   : > { %1327 = vmatpush.msrb.mxu3 %v485_v8  ;;  %v380_v8 = vld [vmem:[#allocation3 + $0x170] sm:$0xff] }
 0x115   : > { %v769_v9 = vpop.f32.mrf.mxu2  ;;  %v882_v10 = vpop.f32.mrf.mxu3  ;;  %1215 = vmatpush.msrb.mxu2 %v417_v54 }
 0x116   : > { %v4787_v13 = vadd.f32 %v882_v10, %v769_v9  ;;  %v4789_v14 = vpop.f32.mrf.mxu0  ;;  %v4791_v19 = vpop.f32.mrf.mxu1  ;;  %1328 = vmatpush.msrb.mxu3 %v481_v59 }
 0x119   : > { %593 = vmatmul.f32.gmra.mxu0 %v368_v20  ;;  %706 = vmatmul.f32.gmra.mxu1 %v369_v21 }
 0x11a   : > { %819 = vmatmul.f32.gmra.mxu2 %v368_v20  ;;  %932 = vmatmul.f32.gmra.mxu3 %v369_v21  ;;  %v376_v20 = vld [vmem:[#allocation3 + $0x150] sm:$0xff]  ;;  %v377_v21 = vld [vmem:[#allocation3 + $0x158] sm:$0xff] }
 0x11d   : > { %v772_v22 = vpop.f32.mrf.mxu2  ;;  %v885_v27 = vpop.f32.mrf.mxu3 }
 0x11e   : > { %v4793_v28 = vadd.f32 %v885_v27, %v772_v22  ;;  %v4795_v29 = vpop.f32.mrf.mxu0  ;;  %v4797_v30 = vpop.f32.mrf.mxu1 }
 0x121   : > { %596 = vmatmul.f32.gmra.mxu0 %v370_v35  ;;  %709 = vmatmul.f32.gmra.mxu1 %v371_v36 }
 0x122   : > { %822 = vmatmul.f32.gmra.mxu2 %v370_v35  ;;  %935 = vmatmul.f32.gmra.mxu3 %v371_v36  ;;  %v420_v36 = vld [vmem:[%s4506_s26 + $0xb0] sm:$0xff] }
 0x123   : > { %988 = vmatpush.msrb.mxu0 %v420_v36  ;;  %v383_v36 = vld [vmem:[#allocation3 + $0x188] sm:$0xff] }
 0x125   : > { %v775_v43 = vpop.f32.mrf.mxu2  ;;  %v888_v44 = vpop.f32.mrf.mxu3 }
 0x126   : > { %v4801_v45 = vadd.f32 %v888_v44, %v775_v43  ;;  %v4803_v46 = vpop.f32.mrf.mxu0  ;;  %v4805_v51 = vpop.f32.mrf.mxu1  ;;  %v378_v44 = vld [vmem:[#allocation3 + $0x160] sm:$0xff] }
 0x129   : > { %599 = vmatmul.f32.gmra.mxu0 %v372_v52  ;;  %712 = vmatmul.f32.gmra.mxu1 %v373_v53 }
 0x12a   : > { %825 = vmatmul.f32.gmra.mxu2 %v372_v52  ;;  %938 = vmatmul.f32.gmra.mxu3 %v373_v53  ;;  %v379_v52 = vld [vmem:[#allocation3 + $0x168] sm:$0xff] }
 0x12d   : > { %v778_v60 = vpop.f32.mrf.mxu2  ;;  %v891_v61 = vpop.f32.mrf.mxu3 }
 0x12e   : > { %v4809_v62 = vadd.f32 %v891_v61, %v778_v60  ;;  %v4811_v63 = vpop.f32.mrf.mxu0  ;;  %v4813_v0 = vpop.f32.mrf.mxu1 }
 0x131   : > { %602 = vmatmul.f32.gmra.mxu0 %v374_v3  ;;  %715 = vmatmul.f32.gmra.mxu1 %v375_v4 }
 0x132   : > { %828 = vmatmul.f32.gmra.mxu2 %v374_v3  ;;  %941 = vmatmul.f32.gmra.mxu3 %v375_v4 }
 0x135   : > { %v781_v9 = vpop.f32.mrf.mxu2  ;;  %v894_v10 = vpop.f32.mrf.mxu3 }
 0x136   : > { %v4817_v11 = vpop.f32.mrf.mxu0  ;;  %v4819_v12 = vpop.f32.mrf.mxu1  ;;  %v4821_v22 = vadd.f32 %v894_v10, %v781_v9  ;;  %v381_v9 = vld [vmem:[#allocation3 + $0x178] sm:$0xff] }
 0x138   : > { %7711 = vst [vmem:[#allocation13_spill] sm:$0xff] %v4821_v22  ;;  %v400_v22 = vld [vmem:[%s4506_s26 + $0x10] sm:$0xff] }
 0x139   : > { %605 = vmatmul.f32.gmra.mxu0 %v376_v20  ;;  %718 = vmatmul.f32.gmra.mxu1 %v377_v21 }
 0x13a   : > { %831 = vmatmul.f32.gmra.mxu2 %v376_v20  ;;  %944 = vmatmul.f32.gmra.mxu3 %v377_v21 }
 0x13d   : > { %v784_v27 = vpop.f32.mrf.mxu2  ;;  %v897_v35 = vpop.f32.mrf.mxu3 }
 0x13e   : > { %v4825_v38 = vpop.f32.mrf.mxu0  ;;  %v4827_v43 = vpop.f32.mrf.mxu1  ;;  %v4829_v53 = vadd.f32 %v897_v35, %v784_v27  ;;  %v382_v35 = vld [vmem:[#allocation3 + $0x180] sm:$0xff] }
 0x13f   : > { %7712 = vst [vmem:[#allocation14_spill] sm:$0xff] %v4825_v38  ;;  %v465_v38 = vld [vmem:[%s4506_s26 + $0x218] sm:$0xff] }
 0x140   : > { %7713 = vst [vmem:[#allocation15_spill] sm:$0xff] %v4827_v43  ;;  %v401_v43 = vld [vmem:[%s4506_s26 + $0x18] sm:$0xff] }
 0x141   : > { %7714 = vst [vmem:[#allocation16_spill] sm:$0xff] %v4829_v53  ;;  %608 = vmatmul.f32.gmra.mxu0 %v378_v44  ;;  %721 = vmatmul.f32.gmra.mxu1 %v379_v52  ;;  %v405_v53 = vld [vmem:[%s4506_s26 + $0x38] sm:$0xff] }
 0x142   : > { %834 = vmatmul.f32.gmra.mxu2 %v378_v44  ;;  %947 = vmatmul.f32.gmra.mxu3 %v379_v52  ;;  %v416_v44 = vld [vmem:[%s4506_s26 + $0x90] sm:$0xff] }
 0x143   : > { %v480_v52 = vld [vmem:[%s4506_s26 + $0x290] sm:$0xff]  ;;  %989 = vmatpush.msrb.mxu0 %v416_v44 }
 0x144   : > { %1102 = vmatpush.msrb.mxu1 %v480_v52 }
 0x145   : > { %v787_v60 = vpop.f32.mrf.mxu2  ;;  %v900_v61 = vpop.f32.mrf.mxu3 }
 0x146   : > { %v4833_v3 = vpop.f32.mrf.mxu0  ;;  %v4835_v4 = vpop.f32.mrf.mxu1  ;;  %v4837_v7 = vadd.f32 %v900_v61, %v787_v60 }
 0x147   : > { %7715 = vst [vmem:[#allocation17_spill] sm:$0xff] %v4833_v3  ;;  %v476_v3 = vld [vmem:[%s4506_s26 + $0x270] sm:$0xff] }
 0x148   : > { %7716 = vst [vmem:[#allocation18_spill] sm:$0xff] %v4835_v4  ;;  %v385_v4 = vld [vmem:[#allocation3 + $0x198] sm:$0xff]  ;;  %1103 = vmatpush.msrb.mxu1 %v476_v3 }
 0x149   : > { %7717 = vst [vmem:[#allocation19_spill] sm:$0xff] %v4837_v7  ;;  %611 = vmatmul.f32.gmra.mxu0 %v380_v8  ;;  %724 = vmatmul.f32.gmra.mxu1 %v381_v9 }
 0x14a   : > { %837 = vmatmul.f32.gmra.mxu2 %v380_v8  ;;  %950 = vmatmul.f32.gmra.mxu3 %v381_v9  ;;  %v384_v9 = vld [vmem:[#allocation3 + $0x190] sm:$0xff] }
 0x14d   : > { %v790_v10 = vpop.f32.mrf.mxu2  ;;  %v903_v20 = vpop.f32.mrf.mxu3 }
 0x14e   : > { %v567_v21 = vpop.f32.mrf.mxu0  ;;  %v680_v27 = vpop.f32.mrf.mxu1  ;;  %v4839_v37 = vadd.f32 %v903_v20, %v790_v10  ;;  %v413_v10 = vld [vmem:[%s4506_s26 + $0x78] sm:$0xff] }
 0x14f   : > { %v4843_v54 = vadd.f32 %v680_v27, %v567_v21  ;;  %v477_v20 = vld [vmem:[%s4506_s26 + $0x278] sm:$0xff]  ;;  %1216 = vmatpush.msrb.mxu2 %v413_v10  ;;  %v386_v10 = vld [vmem:[#allocation3 + $0x1a0] sm:$0xff] }
 0x150   : > { %7718 = vst [vmem:[#allocation20_spill] sm:$0xff] %v4839_v37  ;;  %1329 = vmatpush.msrb.mxu3 %v477_v20  ;;  %v387_v20 = vld [vmem:[#allocation3 + $0x1a8] sm:$0xff]  ;;  %v412_v37 = vld [vmem:[%s4506_s26 + $0x70] sm:$0xff] }
 0x151   : > { %614 = vmatmul.f32.gmra.mxu0 %v382_v35  ;;  %727 = vmatmul.f32.gmra.mxu1 %v383_v36  ;;  %7719 = vst [vmem:[#allocation21_spill] sm:$0xff] %v4843_v54 }
 0x152   : > { %840 = vmatmul.f32.gmra.mxu2 %v382_v35  ;;  %953 = vmatmul.f32.gmra.mxu3 %v383_v36 }
 0x153   : > { %990 = vmatpush.msrb.mxu0 %v412_v37 }
 0x155   : > { %v793_v59 = vpop.f32.mrf.mxu2  ;;  %v906_v60 = vpop.f32.mrf.mxu3 }
 0x156   : > { %v570_v61 = vpop.f32.mrf.mxu0  ;;  %v683_v8 = vpop.f32.mrf.mxu1  ;;  %v4847_v21 = vadd.f32 %v906_v60, %v793_v59 }
 0x157   : > { %v4853_v52 = vadd.f32 %v683_v8, %v570_v61  ;;  %v409_v61 = vld [vmem:[%s4506_s26 + $0x58] sm:$0xff] }
 0x158   : > { %7720 = vst [vmem:[#allocation22_spill] sm:$0xff] %v4847_v21  ;;  %v473_v8 = vld [vmem:[%s4506_s26 + $0x258] sm:$0xff]  ;;  %1217 = vmatpush.msrb.mxu2 %v409_v61  ;;  %v395_v21 = vld [vmem:[#allocation3 + $0x1e8] sm:$0xff] }
 0x159   : > { %617 = vmatmul.f32.gmra.mxu0 %v384_v9  ;;  %730 = vmatmul.f32.gmra.mxu1 %v385_v4  ;;  %7723 = vst [vmem:[#allocation25_spill] sm:$0xff] %v4853_v52  ;;  %v391_v52 = vld [vmem:[#allocation3 + $0x1c8] sm:$0xff] }
 0x15a   : > { %843 = vmatmul.f32.gmra.mxu2 %v384_v9  ;;  %956 = vmatmul.f32.gmra.mxu3 %v385_v4 }
 0x15b   : > { %1330 = vmatpush.msrb.mxu3 %v473_v8  ;;  %1218 = vmatpush.msrb.mxu2 %v405_v53 }
 0x15d   : > { %v796_v27 = vpop.f32.mrf.mxu2  ;;  %v909_v35 = vpop.f32.mrf.mxu3  ;;  %1219 = vmatpush.msrb.mxu2 %v401_v43 }
 0x15e   : > { %v4849_v36 = vpop.f32.mrf.mxu0  ;;  %v4851_v44 = vpop.f32.mrf.mxu1  ;;  %v4855_v54 = vadd.f32 %v909_v35, %v796_v27  ;;  %v388_v27 = vld [vmem:[#allocation3 + $0x1b0] sm:$0xff]  ;;  %v389_v35 = vld [vmem:[#allocation3 + $0x1b8] sm:$0xff] }
 0x15f   : > { %7721 = vst [vmem:[#allocation23_spill] sm:$0xff] %v4849_v36  ;;  %v390_v36 = vld [vmem:[#allocation3 + $0x1c0] sm:$0xff] }
 0x160   : > { %7722 = vst [vmem:[#allocation24_spill] sm:$0xff] %v4851_v44 }
 0x161   : > { %7724 = vst [vmem:[#allocation26_spill] sm:$0xff] %v4855_v54  ;;  %620 = vmatmul.f32.gmra.mxu0 %v386_v10  ;;  %733 = vmatmul.f32.gmra.mxu1 %v387_v20 }
 0x162   : > { %846 = vmatmul.f32.gmra.mxu2 %v386_v10  ;;  %959 = vmatmul.f32.gmra.mxu3 %v387_v20 }
 0x165   : > { %v799_v4 = vpop.f32.mrf.mxu2  ;;  %v912_v59 = vpop.f32.mrf.mxu3 }
 0x166   : > { %v576_v60 = vpop.f32.mrf.mxu0  ;;  %v689_v9 = vpop.f32.mrf.mxu1  ;;  %v4861_v44 = vadd.f32 %v912_v59, %v799_v4  ;;  %v408_v4 = vld [vmem:[%s4506_s26 + $0x50] sm:$0xff] }
 0x167   : > { %v4863_v54 = vadd.f32 %v689_v9, %v576_v60  ;;  %v472_v59 = vld [vmem:[%s4506_s26 + $0x250] sm:$0xff]  ;;  %991 = vmatpush.msrb.mxu0 %v408_v4 }
 0x168   : > { %7725 = vst [vmem:[#allocation27_spill] sm:$0xff] %v4861_v44  ;;  %1104 = vmatpush.msrb.mxu1 %v472_v59  ;;  %v394_v59 = vld [vmem:[#allocation3 + $0x1e0] sm:$0xff] }
 0x169   : > { %7726 = vst [vmem:[#allocation28_spill] sm:$0xff] %v4863_v54  ;;  %623 = vmatmul.f32.gmra.mxu0 %v388_v27  ;;  %736 = vmatmul.f32.gmra.mxu1 %v389_v35 }
 0x16a   : > { %849 = vmatmul.f32.gmra.mxu2 %v388_v27  ;;  %962 = vmatmul.f32.gmra.mxu3 %v389_v35  ;;  %v392_v27 = vld [vmem:[#allocation3 + $0x1d0] sm:$0xff]  ;;  %v393_v35 = vld [vmem:[#allocation3 + $0x1d8] sm:$0xff] }
 0x16d   : > { %v802_v3 = vpop.f32.mrf.mxu2  ;;  %v915_v37 = vpop.f32.mrf.mxu3 }
 0x16e   : > { %v579_v10 = vpop.f32.mrf.mxu0  ;;  %v692_v20 = vpop.f32.mrf.mxu1  ;;  %v4867_v54 = vadd.f32 %v915_v37, %v802_v3  ;;  %v469_v3 = vld [vmem:[%s4506_s26 + $0x238] sm:$0xff]  ;;  %v404_v37 = vld [vmem:[%s4506_s26 + $0x30] sm:$0xff] }
 0x16f   : > { %v4869_v7 = vadd.f32 %v692_v20, %v579_v10  ;;  %1331 = vmatpush.msrb.mxu3 %v469_v3  ;;  %992 = vmatpush.msrb.mxu0 %v404_v37  ;;  %v464_v10 = vld [vmem:[%s4506_s26 + $0x210] sm:$0xff]  ;;  %v397_v37 = vld [vmem:[#allocation3 + $0x1f8] sm:$0xff] }
 0x170   : > { %7727 = vst [vmem:[#allocation29_spill] sm:$0xff] %v4867_v54  ;;  %v468_v54 = vld [vmem:[%s4506_s26 + $0x230] sm:$0xff] }
 0x171   : > { %626 = vmatmul.f32.gmra.mxu0 %v390_v36  ;;  %739 = vmatmul.f32.gmra.mxu1 %v391_v52 }
 0x172   : > { %852 = vmatmul.f32.gmra.mxu2 %v390_v36  ;;  %965 = vmatmul.f32.gmra.mxu3 %v391_v52 }
 0x173   : > { %1105 = vmatpush.msrb.mxu1 %v468_v54  ;;  %1332 = vmatpush.msrb.mxu3 %v465_v38 }
 0x174   : > { %993 = vmatpush.msrb.mxu0 %v400_v22 }
 0x175   : > { %v805_v61 = vpop.f32.mrf.mxu2  ;;  %v918_v60 = vpop.f32.mrf.mxu3  ;;  %1106 = vmatpush.msrb.mxu1 %v464_v10 }
 0x176   : > { %v582_v9 = vpop.f32.mrf.mxu0  ;;  %v695_v8 = vpop.f32.mrf.mxu1 }
 0x179   : > { %629 = vmatmul.f32.gmra.mxu0 %v392_v27  ;;  %742 = vmatmul.f32.gmra.mxu1 %v393_v35 }
 0x17a   : > { %855 = vmatmul.f32.gmra.mxu2 %v392_v27  ;;  %968 = vmatmul.f32.gmra.mxu3 %v393_v35  ;;  %v4875_v27 = vadd.f32 %v918_v60, %v805_v61  ;;  %v4877_v35 = vadd.f32 %v695_v8, %v582_v9  ;;  %v396_v8 = vld [vmem:[#allocation3 + $0x1f0] sm:$0xff] }
 0x17c   : > { %7728 = vst [vmem:[#allocation30_spill] sm:$0xff] %v4875_v27 }
 0x17d   : > { %v808_v36 = vpop.f32.mrf.mxu2  ;;  %v921_v52 = vpop.f32.mrf.mxu3  ;;  %7729 = vst [vmem:[#allocation31_spill] sm:$0xff] %v4877_v35 }
 0x17e   : > { %v585_v44 = vpop.f32.mrf.mxu0  ;;  %v698_v4 = vpop.f32.mrf.mxu1  ;;  %v4887_v60 = vadd.f32 %v921_v52, %v808_v36 }
 0x17f   : > { %v4889_v54 = vadd.f32 %v698_v4, %v585_v44 }
 0x180   : > { %7732 = vst [vmem:[#allocation34_spill] sm:$0xff] %v4887_v60 }
 0x181   : > { %632 = vmatmul.f32.gmra.mxu0 %v394_v59  ;;  %745 = vmatmul.f32.gmra.mxu1 %v395_v21  ;;  %7733 = vst [vmem:[#allocation35_spill] sm:$0xff] %v4889_v54 }
 0x182   : > { %858 = vmatmul.f32.gmra.mxu2 %v394_v59  ;;  %971 = vmatmul.f32.gmra.mxu3 %v395_v21 }
 0x185   : > { %v811_v20 = vpop.f32.mrf.mxu2  ;;  %v924_v53 = vpop.f32.mrf.mxu3 }
 0x186   : > { %v4883_v3 = vpop.f32.mrf.mxu0  ;;  %v4885_v61 = vpop.f32.mrf.mxu1  ;;  %v4891_v9 = vadd.f32 %v924_v53, %v811_v20 }
 0x187   : > { %7730 = vst [vmem:[#allocation32_spill] sm:$0xff] %v4883_v3 }
 0x188   : > { %7731 = vst [vmem:[#allocation33_spill] sm:$0xff] %v4885_v61  ;;  %v2868_v61 = vld [vmem:[%s4512_s7 + $0xf0] sm:$0xff] }
 0x189   : > { %7734 = vst [vmem:[#allocation36_spill] sm:$0xff] %v4891_v9  ;;  %635 = vmatmul.f32.gmra.mxu0 %v396_v8  ;;  %748 = vmatmul.f32.gmra.mxu1 %v397_v37 }
 0x18a   : > { %861 = vmatmul.f32.gmra.mxu2 %v396_v8  ;;  %974 = vmatmul.f32.gmra.mxu3 %v397_v37 }
 0x18b   : > { %2902 = vmatpush.msra.mxu0 %v2868_v61  ;;  %v2899_v61 = vld [vmem:[%s4512_s7 + $0x1e8] sm:$0xff] }
 0x18d   : > { %v814_v38 = vpop.f32.mrf.mxu2  ;;  %v927_v43 = vpop.f32.mrf.mxu3 }
 0x18e   : > { %v591_v21 = vpop.f32.mrf.mxu0  ;;  %v704_v59 = vpop.f32.mrf.mxu1  ;;  %v4893_v3 = vadd.f32 %v927_v43, %v814_v38 }
 0x18f   : > { %v4907_v8 = vadd.f32 %v704_v59, %v591_v21 }
 0x190   : > { %7735 = vst [vmem:[#allocation37_spill] sm:$0xff] %v4893_v3 }
 0x191   : > { %994 = vmatmul.f32.vlgmr.msrb.gmra.mxu0 %v4643_v1  ;;  %1107 = vmatmul.f32.vlgmr.msrb.gmra.mxu1 %v4645_v2  ;;  %7736 = vst [vmem:[#allocation38_spill] sm:$0xff] %v4907_v8 }
 0x192   : > { %1220 = vmatmul.f32.vlgmr.msrb.gmra.mxu2 %v4643_v1  ;;  %1333 = vmatmul.f32.vlgmr.msrb.gmra.mxu3 %v4645_v2 }
 0x195   : > { %v817_v22 = vpop.f32.mrf.mxu2  ;;  %v930_v44 = vpop.f32.mrf.mxu3 }
 0x196   : > { %v594_v36 = vpop.f32.mrf.mxu0  ;;  %v707_v52 = vpop.f32.mrf.mxu1  ;;  %v4911_v37 = vadd.f32 %v930_v44, %v817_v22 }
 0x197   : > { %v4913_v3 = vadd.f32 %v707_v52, %v594_v36 }
 0x198   : > { %7737 = vst [vmem:[#allocation39_spill] sm:$0xff] %v4911_v37  ;;  %v4159_v37 = vld [vmem:[#allocation3 + $0xf8] sm:$0xff] }
 0x199   : > { %997 = vmatmul.f32.gmra.mxu0 %v4663_v15  ;;  %1110 = vmatmul.f32.gmra.mxu1 %v4665_v16  ;;  %7738 = vst [vmem:[#allocation40_spill] sm:$0xff] %v4913_v3  ;;  %v4158_v3 = vld [vmem:[#allocation3 + $0xf0] sm:$0xff] }
 0x19a   : > { %1223 = vmatmul.f32.gmra.mxu2 %v4663_v15  ;;  %1336 = vmatmul.f32.gmra.mxu3 %v4665_v16  ;;  %v2869_v15 = vld [vmem:[%s4512_s7 + $0xf8] sm:$0xff] }
 0x19b   : > { %v2901_v16 = vld [vmem:[%s4512_s7 + $0x1f8] sm:$0xff]  ;;  %3128 = vmatpush.msra.mxu2 %v2869_v15  ;;  %v2867_v15 = vld [vmem:[%s4512_s7 + $0xe8] sm:$0xff] }
 0x19c   : > { %3241 = vmatpush.msra.mxu3 %v2901_v16 }
 0x19d   : > { %v820_v4 = vpop.f32.mrf.mxu2  ;;  %v933_v10 = vpop.f32.mrf.mxu3  ;;  %3129 = vmatpush.msra.mxu2 %v2867_v15  ;;  %v4955_v15 = vadd.f32 %v4783_v6, %v4781_v5  ;;  %v2864_v5 = vld [vmem:[%s4512_s7 + $0xd0] sm:$0xff] }
 0x19e   : > { %v597_v20 = vpop.f32.mrf.mxu0  ;;  %v710_v1 = vpop.f32.mrf.mxu1  ;;  %3242 = vmatpush.msra.mxu3 %v2899_v61  ;;  %v2896_v6 = vld [vmem:[%s4512_s7 + $0x1d0] sm:$0xff] }
 0x19f   : > { %v4921_v21 = vadd.f32 %v710_v1, %v597_v20  ;;  %v3740_v61 = vmul.f32 -1.442695, %v4955_v15 }
 0x1a1   : > { %1000 = vmatmul.f32.gmra.mxu0 %v4671_v17  ;;  %1113 = vmatmul.f32.gmra.mxu1 %v4673_v18  ;;  %7740 = vst [vmem:[#allocation42_spill] sm:$0xff] %v4921_v21  ;;  %3898 = vpow2.f32 %v3740_v61 }
 0x1a2   : > { %1226 = vmatmul.f32.gmra.mxu2 %v4671_v17  ;;  %1339 = vmatmul.f32.gmra.mxu3 %v4673_v18  ;;  %v2900_v17 = vld [vmem:[%s4512_s7 + $0x1f0] sm:$0xff]  ;;  %v4919_v18 = vadd.f32 %v933_v10, %v820_v4 }
 0x1a3   : > { %3015 = vmatpush.msra.mxu1 %v2900_v17 }
 0x1a4   : > { %7739 = vst [vmem:[#allocation41_spill] sm:$0xff] %v4919_v18 }
 0x1a5   : > { %v823_v2 = vpop.f32.mrf.mxu2  ;;  %v936_v53 = vpop.f32.mrf.mxu3 }
 0x1a6   : > { %v600_v38 = vpop.f32.mrf.mxu0  ;;  %v713_v43 = vpop.f32.mrf.mxu1  ;;  %v4925_v44 = vadd.f32 %v936_v53, %v823_v2  ;;  %v2866_v2 = vld [vmem:[%s4512_s7 + $0xe0] sm:$0xff] }
 0x1a7   : > { %v4933_v4 = vadd.f32 %v713_v43, %v600_v38  ;;  %v2898_v53 = vld [vmem:[%s4512_s7 + $0x1e0] sm:$0xff]  ;;  %2903 = vmatpush.msra.mxu0 %v2866_v2 }
 0x1a8   : > { %7741 = vst [vmem:[#allocation43_spill] sm:$0xff] %v4925_v44  ;;  %3016 = vmatpush.msra.mxu1 %v2898_v53 }
 0x1a9   : > { %1003 = vmatmul.f32.gmra.mxu0 %v4683_v23  ;;  %1116 = vmatmul.f32.gmra.mxu1 %v4685_v24  ;;  %7744 = vst [vmem:[#allocation46_spill] sm:$0xff] %v4933_v4 }
 0x1aa   : > { %1229 = vmatmul.f32.gmra.mxu2 %v4683_v23  ;;  %1342 = vmatmul.f32.gmra.mxu3 %v4685_v24 }
 0x1ab   : > { %2904 = vmatpush.msra.mxu0 %v2864_v5  ;;  %3017 = vmatpush.msra.mxu1 %v2896_v6  ;;  %v5028_v5 = vadd.f32 %v4805_v51, %v4803_v46 }
 0x1ad   : > { %v826_v59 = vpop.f32.mrf.mxu2  ;;  %v939_v22 = vpop.f32.mrf.mxu3 }
 0x1ae   : > { %v4927_v36 = vpop.f32.mrf.mxu0  ;;  %v4929_v52 = vpop.f32.mrf.mxu1  ;;  %v4935_v10 = vadd.f32 %v939_v22, %v826_v59 }
 0x1af   : > { %7742 = vst [vmem:[#allocation44_spill] sm:$0xff] %v4927_v36 }
 0x1b0   : > { %7743 = vst [vmem:[#allocation45_spill] sm:$0xff] %v4929_v52 }
 0x1b1   : > { %7745 = vst [vmem:[#allocation47_spill] sm:$0xff] %v4935_v10  ;;  %1006 = vmatmul.f32.gmra.mxu0 %v4691_v25  ;;  %1119 = vmatmul.f32.gmra.mxu1 %v4693_v26  ;;  %v3741_v10 = vmul.f32 -1.442695, %v4787_v13 }
 0x1b2   : > { %1232 = vmatmul.f32.gmra.mxu2 %v4691_v25  ;;  %1345 = vmatmul.f32.gmra.mxu3 %v4693_v26 }
 0x1b3   : > { %3900 = vpow2.f32 %v3741_v10 }
 0x1b5   : > { %v829_v23 = vpop.f32.mrf.mxu2  ;;  %v942_v24 = vpop.f32.mrf.mxu3 }
 0x1b6   : > { %v606_v20 = vpop.f32.mrf.mxu0  ;;  %v719_v1 = vpop.f32.mrf.mxu1 }
 0x1b9   : > { %1009 = vmatmul.f32.gmra.mxu0 %v4703_v31  ;;  %1122 = vmatmul.f32.gmra.mxu1 %v4705_v32 }
 0x1ba   : > { %1235 = vmatmul.f32.gmra.mxu2 %v4703_v31  ;;  %1348 = vmatmul.f32.gmra.mxu3 %v4705_v32  ;;  %v2865_v31 = vld [vmem:[%s4512_s7 + $0xd8] sm:$0xff] }
 0x1bb   : > { %v2897_v32 = vld [vmem:[%s4512_s7 + $0x1d8] sm:$0xff]  ;;  %3130 = vmatpush.msra.mxu2 %v2865_v31  ;;  %v4964_v31 = vadd.f32 %v942_v24, %v829_v23  ;;  %v2863_v23 = vld [vmem:[%s4512_s7 + $0xc8] sm:$0xff] }
 0x1bc   : > { %3243 = vmatpush.msra.mxu3 %v2897_v32  ;;  %v4966_v32 = vadd.f32 %v719_v1, %v606_v20  ;;  %v2895_v24 = vld [vmem:[%s4512_s7 + $0x1c8] sm:$0xff] }
 0x1bd   : > { %v832_v25 = vpop.f32.mrf.mxu2  ;;  %v945_v26 = vpop.f32.mrf.mxu3  ;;  %7746 = vst [vmem:[#allocation48_spill] sm:$0xff] %v4964_v31  ;;  %3131 = vmatpush.msra.mxu2 %v2863_v23 }
 0x1be   : > { %v609_v16 = vpop.f32.mrf.mxu0  ;;  %v722_v38 = vpop.f32.mrf.mxu1  ;;  %7747 = vst [vmem:[#allocation49_spill] sm:$0xff] %v4966_v32  ;;  %v4968_v52 = vadd.f32 %v945_v26, %v832_v25  ;;  %3244 = vmatpush.msra.mxu3 %v2895_v24  ;;  %v2893_v24 = vld [vmem:[%s4512_s7 + $0x1b8] sm:$0xff] }
 0x1c0   : > { %7748 = vst [vmem:[#allocation50_spill] sm:$0xff] %v4968_v52  ;;  %3245 = vmatpush.msra.mxu3 %v2893_v24 }
 0x1c1   : > { %1012 = vmatmul.f32.gmra.mxu0 %v4711_v33  ;;  %1125 = vmatmul.f32.gmra.mxu1 %v4713_v34 }
 0x1c2   : > { %1238 = vmatmul.f32.gmra.mxu2 %v4711_v33  ;;  %1351 = vmatmul.f32.gmra.mxu3 %v4713_v34 }
 0x1c5   : > { %v835_v43 = vpop.f32.mrf.mxu2  ;;  %v948_v17 = vpop.f32.mrf.mxu3 }
 0x1c6   : > { %v612_v59 = vpop.f32.mrf.mxu0  ;;  %v725_v22 = vpop.f32.mrf.mxu1  ;;  %v4976_v36 = vadd.f32 %v948_v17, %v835_v43 }
 0x1c8   : > { %7750 = vst [vmem:[#allocation52_spill] sm:$0xff] %v4976_v36 }
 0x1c9   : > { %1015 = vmatmul.f32.gmra.mxu0 %v4723_v39  ;;  %1128 = vmatmul.f32.gmra.mxu1 %v4725_v40 }
 0x1ca   : > { %1241 = vmatmul.f32.gmra.mxu2 %v4723_v39  ;;  %1354 = vmatmul.f32.gmra.mxu3 %v4725_v40  ;;  %v4970_v39 = vadd.f32 %v722_v38, %v609_v16  ;;  %v4974_v40 = vadd.f32 %v4791_v19, %v4789_v14  ;;  %v4988_v19 = vadd.f32 %v725_v22, %v612_v59  ;;  %v3899_v16 = vpop.eup %3898  ;;  %v2862_v59 = vld [vmem:[%s4512_s7 + $0xc0] sm:$0xff] }
 0x1cb   : > { %v5000_v17 = vadd.f32 1.0, %v3899_v16  ;;  %v2894_v22 = vld [vmem:[%s4512_s7 + $0x1c0] sm:$0xff]  ;;  %2905 = vmatpush.msra.mxu0 %v2862_v59 }
 0x1cc   : > { %7749 = vst [vmem:[#allocation51_spill] sm:$0xff] %v4970_v39  ;;  %v3742_v14 = vmul.f32 -1.442695, %v4974_v40  ;;  %3018 = vmatpush.msra.mxu1 %v2894_v22 }
 0x1cd   : > { %v838_v33 = vpop.f32.mrf.mxu2  ;;  %v951_v34 = vpop.f32.mrf.mxu3  ;;  %7751 = vst [vmem:[#allocation53_spill] sm:$0xff] %v4988_v19  ;;  %v1697_v19 = vand.u32 2147483648, %v5000_v17  ;;  %vm1691_vm0 = vweird.f32 %v5000_v17 }
 0x1ce   : > { %v615_v2 = vpop.f32.mrf.mxu0  ;;  %v728_v53 = vpop.f32.mrf.mxu1  ;;  %v4990_v25 = vadd.f32 %v951_v34, %v838_v33  ;;  %3902 = vpow2.f32 %v3742_v14  ;;  %v3743_v33 = vmul.f32 -1.442695, %v4793_v28  ;;  %v3746_v14 = vmul.f32 -1.442695, %v5028_v5 }
 0x1cf   : > { %v4994_v26 = vadd.f32 %v728_v53, %v615_v2  ;;  %3904 = vrcp.f32 %v5000_v17 }
 0x1d0   : > { %7752 = vst [vmem:[#allocation54_spill] sm:$0xff] %v4990_v25  ;;  %3906 = vpow2.f32 %v3743_v33  ;;  %v5058_v33 = vadd.f32 %v4813_v0, %v4811_v63  ;;  %v1695_v25 = vand.u32 2147483647, %v5000_v17 }
 0x1d1   : > { %1018 = vmatmul.f32.gmra.mxu0 %v4731_v41  ;;  %1131 = vmatmul.f32.gmra.mxu1 %v4733_v42  ;;  %7753 = vst [vmem:[#allocation55_spill] sm:$0xff] %v4994_v26 }
 0x1d2   : > { %1244 = vmatmul.f32.gmra.mxu2 %v4731_v41  ;;  %1357 = vmatmul.f32.gmra.mxu3 %v4733_v42  ;;  %v3901_v41 = vpop.eup %3900  ;;  %vm5102_vm2 = vcmp.eq.f32.partialorder %v1695_v25, 8.507059e+37 }
 0x1d3   : > { %v5014_v61 = vadd.f32 1.0, %v3901_v41  ;;  %v3747_v41 = vmul.f32 -1.442695, %v4809_v62 }
 0x1d4   : > { %v3903_v34 = vpop.eup %3902 }
 0x1d5   : > { %v4983_v20 = vpop.f32.mrf.mxu2  ;;  %v4985_v1 = vpop.f32.mrf.mxu3  ;;  %3908 = vrcp.f32 %v5014_v61  ;;  %vm1706_vm3 = vweird.f32 %v5014_v61 }
 0x1d6   : > { %v4996_v38 = vpop.f32.mrf.mxu0  ;;  %v4998_v43 = vpop.f32.mrf.mxu1  ;;  %v5085_v39 = vadd.f32 %v4985_v1, %v4983_v20 }
 0x1d7   : > { %v5033_v6 = vpop.eup %3904 }
 0x1d8   : > { %v1687_v16 = vmul.f32 %v5033_v6, %v5000_v17  ;;  %7754 = vst [vmem:[#allocation56_spill] sm:$0xff] %v5085_v39  ;;  %vm1692_vm1 = vweird.f32 %v5033_v6  ;;  %v1710_v39 = vand.u32 2147483647, %v5014_v61 }
 0x1d9   : > { %1021 = vmatmul.f32.gmra.mxu0 %v4743_v47  ;;  %1134 = vmatmul.f32.gmra.mxu1 %v4745_v48  ;;  %vm5120_vm5 = vmor %vm1691_vm0, %vm1692_vm1 }
 0x1da   : > { %1247 = vmatmul.f32.gmra.mxu2 %v4743_v47  ;;  %1360 = vmatmul.f32.gmra.mxu3 %v4745_v48  ;;  %v5022_v47 = vadd.f32 %v4797_v30, %v4795_v29  ;;  %v5024_v48 = vadd.f32 1.0, %v3903_v34  ;;  %v3745_v29 = vmul.f32 -1.442695, %v4801_v45  ;;  %v2861_v30 = vld [vmem:[%s4512_s7 + $0xb8] sm:$0xff]  ;;  %v1688_v34 = vsub.f32 1.0, %v1687_v16 }
 0x1db   : > { %3132 = vmatpush.msra.mxu2 %v2861_v30  ;;  %vm5165_vm7 = vcmp.eq.f32.partialorder %v1710_v39, 8.507059e+37 }
 0x1dc   : > { %v3744_v23 = vmul.f32 -1.442695, %v5022_v47  ;;  %3910 = vrcp.f32 %v5024_v48  ;;  %v1689_v16 = vmul.f32 %v5033_v6, %v1688_v34  ;;  %v5089_v34 = vadd.f32 %v4998_v43, %v4996_v38 }
 0x1dd   : > { %v5008_v42 = vpop.f32.mrf.mxu2  ;;  %v5010_v10 = vpop.f32.mrf.mxu3  ;;  %vm1721_vm4 = vweird.f32 %v5024_v48  ;;  %v1727_v31 = vand.u32 2147483648, %v5024_v48 }
 0x1de   : > { %v5016_v2 = vpop.f32.mrf.mxu0  ;;  %v5018_v53 = vpop.f32.mrf.mxu1  ;;  %3912 = vpow2.f32 %v3744_v23  ;;  %7755 = vst [vmem:[#allocation57_spill] sm:$0xff] %v5089_v34  ;;  %v1690_v20 = vadd.f32 %v5033_v6, %v1689_v16  ;;  %v2892_v34 = vld [vmem:[%s4512_s7 + $0x1b0] sm:$0xff]  ;;  %v1712_v16 = vand.u32 2147483648, %v5014_v61 }
 0x1df   : > { %3914 = vpow2.f32 %v3745_v29  ;;  %3019 = vmatpush.msra.mxu1 %v2892_v34  ;;  %v1728_v39 = vor.u32 1.1754944e-38, %v1727_v31 }
 0x1e0   : > { %3916 = vpow2.f32 %v3746_v14  ;;  %v3748_v14 = vmul.f32 -1.442695, %v5058_v33  ;;  %v1694_v17 = vsel %vm5120_vm5, %v5033_v6, %v1690_v20 }
 0x1e1   : > { %1024 = vmatmul.f32.gmra.mxu0 %v4751_v49  ;;  %1137 = vmatmul.f32.gmra.mxu1 %v4753_v50  ;;  %3918 = vpow2.f32 %v3747_v41 }
 0x1e2   : > { %1250 = vmatmul.f32.gmra.mxu2 %v4751_v49  ;;  %1363 = vmatmul.f32.gmra.mxu3 %v4753_v50  ;;  %v3907_v49 = vpop.eup %3906 }
 0x1e3   : > { %v5053_v50 = vpop.eup %3908  ;;  %v5066_v24 = vadd.f32 1.0, %v3907_v49 }
 0x1e4   : > { %v5062_v30 = vpop.eup %3910  ;;  %v1702_v23 = vmul.f32 %v5053_v50, %v5014_v61  ;;  %vm1707_vm6 = vweird.f32 %v5053_v50 }
 0x1e5   : > { %v5041_v46 = vpop.f32.mrf.mxu2  ;;  %v5043_v51 = vpop.f32.mrf.mxu3  ;;  %v1717_v49 = vmul.f32 %v5062_v30, %v5024_v48  ;;  %3920 = vrcp.f32 %v5066_v24  ;;  %vm5193_vm9 = vmor %vm1706_vm3, %vm1707_vm6  ;;  %vm1722_vm10 = vweird.f32 %v5062_v30  ;;  %vm1736_vm12 = vweird.f32 %v5066_v24 }
 0x1e6   : > { %v5049_v59 = vpop.f32.mrf.mxu0  ;;  %v5051_v22 = vpop.f32.mrf.mxu1  ;;  %v1703_v36 = vsub.f32 1.0, %v1702_v23  ;;  %3922 = vpow2.f32 %v3748_v14  ;;  %v2860_v14 = vld [vmem:[%s4512_s7 + $0xb0] sm:$0xff]  ;;  %v5150_v6 = vadd.f32 %v5043_v51, %v5041_v46  ;;  %v2859_v51 = vld [vmem:[%s4512_s7 + $0xa8] sm:$0xff]  ;;  %vm5222_vm11 = vmor %vm1721_vm4, %vm1722_vm10 }
 0x1e7   : > { %v3913_v0 = vpop.eup %3912  ;;  %v1718_v1 = vsub.f32 1.0, %v1717_v49  ;;  %2906 = vmatpush.msra.mxu0 %v2860_v14  ;;  %3133 = vmatpush.msra.mxu2 %v2859_v51 }
 0x1e8   : > { %v3915_v26 = vpop.eup %3914  ;;  %v5091_v52 = vadd.f32 1.0, %v3913_v0  ;;  %v1698_v0 = vor.u32 1.1754944e-38, %v1697_v19  ;;  %v1725_v19 = vand.u32 2147483647, %v5024_v48  ;;  %7762 = vst [vmem:[#allocation60_spill] sm:$0xff] %v5150_v6 }
 0x1e9   : > { %1027 = vmatmul.f32.gmra.mxu0 %v4763_v55  ;;  %1140 = vmatmul.f32.gmra.mxu1 %v4765_v56  ;;  %v5094_v32 = vadd.f32 1.0, %v3915_v26  ;;  %v1704_v26 = vmul.f32 %v5053_v50, %v1703_v36  ;;  %v1719_v34 = vmul.f32 %v5062_v30, %v1718_v1  ;;  %v5156_v1 = vadd.f32 %v4819_v12, %v4817_v11  ;;  %v2891_v36 = vld [vmem:[%s4512_s7 + $0x1a8] sm:$0xff]  ;;  %v4154_v11 = vld [vmem:[#allocation3 + $0xd0] sm:$0xff]  ;;  %v4155_v12 = vld [vmem:[#allocation3 + $0xd8] sm:$0xff] }
 0x1ea   : > { %1253 = vmatmul.f32.gmra.mxu2 %v4763_v55  ;;  %1366 = vmatmul.f32.gmra.mxu3 %v4765_v56  ;;  %v3917_v56 = vpop.eup %3916  ;;  %3924 = vrcp.f32 %v5091_v52  ;;  %vm5175_vm8 = vcmp.eq.f32.partialorder %v1725_v19, 8.507059e+37  ;;  %v1699_v6 = vsel %vm5102_vm2, %v1698_v0, %v1694_v17  ;;  %v1742_v0 = vand.u32 2147483648, %v5066_v24 }
 0x1eb   : > { %v3919_v23 = vpop.eup %3918  ;;  %v5100_v38 = vadd.f32 1.0, %v3917_v56  ;;  %3926 = vrcp.f32 %v5094_v32  ;;  %v5138_v21 = vadd.f32 %v5053_v50, %v1704_v26  ;;  %v5160_v26 = vadd.f32 %v5051_v22, %v5049_v59  ;;  %3246 = vmatpush.msra.mxu3 %v2891_v36  ;;  %v7775_v36 = vld [vmem:[#allocation16_spill] sm:$0xff] }
 0x1ec   : > { %v5114_v56 = vpop.eup %3920  ;;  %v5127_v14 = vadd.f32 1.0, %v3919_v23  ;;  %v1720_v19 = vadd.f32 %v5062_v30, %v1719_v34  ;;  %v3750_v17 = vmul.f32 -1.442695, %v5156_v1  ;;  %vm1751_vm13 = vweird.f32 %v5091_v52 }
 0x1ed   : > { %v5070_v29 = vpop.f32.mrf.mxu2  ;;  %v963_v63 = vpop.f32.mrf.mxu3  ;;  %3928 = vrcp.f32 %v5100_v38  ;;  %v1732_v20 = vmul.f32 %v5114_v56, %v5066_v24  ;;  %7763 = vst [vmem:[#allocation61_spill] sm:$0xff] %v5160_v26  ;;  %v1709_v43 = vsel %vm5193_vm9, %v5053_v50, %v5138_v21  ;;  %vm1737_vm14 = vweird.f32 %v5114_v56 }
 0x1ee   : > { %v5078_v41 = vpop.f32.mrf.mxu0  ;;  %v5080_v55 = vpop.f32.mrf.mxu1  ;;  %3930 = vrcp.f32 %v5127_v14  ;;  %vm1766_vm0 = vweird.f32 %v5094_v32  ;;  %vm5304_vm2 = vmor %vm1736_vm12, %vm1737_vm14  ;;  %vm1781_vm4 = vweird.f32 %v5100_v38 }
 0x1ef   : > { %v3923_v23 = vpop.eup %3922  ;;  %v1733_v61 = vsub.f32 1.0, %v1732_v20 }
 0x1f0   : > { %v5173_v59 = vpop.eup %3924 }
 0x1f1   : > { %1030 = vmatmul.f32.gmra.mxu0 %v4771_v57  ;;  %1143 = vmatmul.f32.gmra.mxu1 %v4773_v58  ;;  %v5185_v26 = vpop.eup %3926  ;;  %v1747_v34 = vmul.f32 %v5173_v59, %v5091_v52  ;;  %vm1752_vm1 = vweird.f32 %v5173_v59 }
 0x1f2   : > { %1256 = vmatmul.f32.gmra.mxu2 %v4771_v57  ;;  %1369 = vmatmul.f32.gmra.mxu3 %v4773_v58  ;;  %v5142_v57 = vadd.f32 %v5010_v10, %v5008_v42  ;;  %v5146_v58 = vadd.f32 %v5018_v53, %v5016_v2  ;;  %v5163_v42 = vadd.f32 %v963_v63, %v5070_v29  ;;  %v1713_v2 = vor.u32 1.1754944e-38, %v1712_v16  ;;  %v7767_v53 = vld [vmem:[#allocation13_spill] sm:$0xff]  ;;  %v7770_v63 = vld [vmem:[#allocation14_spill] sm:$0xff]  ;;  %v7771_v16 = vld [vmem:[#allocation15_spill] sm:$0xff] }
 0x1f3   : > { %v3749_v46 = vmul.f32 -1.442695, %v7767_v53  ;;  %v5179_v29 = vadd.f32 1.0, %v3923_v23  ;;  %v5201_v23 = vadd.f32 %v5080_v55, %v5078_v41  ;;  %v5203_v51 = vpop.eup %3928  ;;  %v2858_v41 = vld [vmem:[%s4512_s7 + $0xa0] sm:$0xff]  ;;  %v1762_v50 = vmul.f32 %v5185_v26, %v5094_v32 }
 0x1f4   : > { %7760 = vst [vmem:[#allocation58_spill] sm:$0xff] %v5142_v57  ;;  %v2890_v55 = vld [vmem:[%s4512_s7 + $0x1a0] sm:$0xff]  ;;  %2907 = vmatpush.msra.mxu0 %v2858_v41  ;;  %v5236_v48 = vpop.eup %3930  ;;  %v1777_v31 = vmul.f32 %v5203_v51, %v5100_v38  ;;  %v1757_v41 = vand.u32 2147483648, %v5091_v52  ;;  %v1748_v21 = vsub.f32 1.0, %v1747_v34  ;;  %v7783_v34 = vld [vmem:[#allocation19_spill] sm:$0xff]  ;;  %vm1767_vm5 = vweird.f32 %v5185_v26 }
 0x1f5   : > { %v853_v25 = vpop.f32.mrf.mxu2  ;;  %v966_v49 = vpop.f32.mrf.mxu3  ;;  %7761 = vst [vmem:[#allocation59_spill] sm:$0xff] %v5146_v58  ;;  %3932 = vpow2.f32 %v3749_v46  ;;  %3020 = vmatpush.msra.mxu1 %v2890_v55  ;;  %v1770_v57 = vand.u32 2147483647, %v5094_v32  ;;  %vm1782_vm6 = vweird.f32 %v5203_v51  ;;  %vm5360_vm9 = vmor %vm1766_vm0, %vm1767_vm5  ;;  %vm1797_vm12 = vweird.f32 %v5236_v48 }
 0x1f6   : > { %v630_v4 = vpop.f32.mrf.mxu0  ;;  %v743_v44 = vpop.f32.mrf.mxu1  ;;  %7764 = vst [vmem:[#allocation62_spill] sm:$0xff] %v5163_v42  ;;  %v5183_v42 = vadd.f32 %v7771_v16, %v7770_v63  ;;  %v3751_v63 = vmul.f32 -1.442695, %v7775_v36  ;;  %v5216_v16 = vadd.f32 %v966_v49, %v853_v25  ;;  %3934 = vrcp.f32 %v5179_v29 }
 0x1f7   : > { %7774 = vst [vmem:[#allocation13_spill] sm:$0xff] %v5201_v23  ;;  %v5230_v25 = vadd.f32 %v743_v44, %v630_v4  ;;  %v5246_v44 = vmul.f32 %v1699_v6, %v4955_v15  ;;  %v5248_v4 = vor.u32 1.1754944e-38, %v1742_v0  ;;  %3936 = vpow2.f32 %v3750_v17  ;;  %v4156_v15 = vld [vmem:[#allocation3 + $0xe0] sm:$0xff]  ;;  %v4157_v6 = vld [vmem:[#allocation3 + $0xe8] sm:$0xff] }
 0x1f8   : > { %7776 = vst [vmem:[#allocation14_spill] sm:$0xff] %v5216_v16  ;;  %v3752_v20 = vmul.f32 -1.442695, %v5183_v42  ;;  %3938 = vpow2.f32 %v3751_v63  ;;  %v1763_v17 = vsub.f32 1.0, %v1762_v50  ;;  %v1792_v16 = vmul.f32 %v5236_v48, %v5127_v14  ;;  %v7784_v50 = vld [vmem:[#allocation17_spill] sm:$0xff] }
 0x1f9   : > { %1033 = vmatmul.f32.gmra.mxu0 %v4154_v11  ;;  %1146 = vmatmul.f32.gmra.mxu1 %v4155_v12  ;;  %7779 = vst [vmem:[#allocation15_spill] sm:$0xff] %v5230_v25  ;;  %v3753_v63 = vmul.f32 -1.442695, %v7783_v34  ;;  %v1749_v58 = vmul.f32 %v5173_v59, %v1748_v21 }
 0x1fa   : > { %1259 = vmatmul.f32.gmra.mxu2 %v4154_v11  ;;  %1372 = vmatmul.f32.gmra.mxu3 %v4155_v12  ;;  %v1724_v11 = vsel %vm5222_vm11, %v5062_v30, %v1720_v19  ;;  %v1740_v12 = vand.u32 2147483647, %v5066_v24  ;;  %7780 = vst [vmem:[#allocation16_spill] sm:$0xff] %v5246_v44  ;;  %v1714_v30 = vsel %vm5165_vm7, %v1713_v2, %v1709_v43  ;;  %3940 = vpow2.f32 %v3752_v20  ;;  %v7785_v20 = vld [vmem:[#allocation18_spill] sm:$0xff]  ;;  %vm5345_vm7 = vmor %vm1751_vm13, %vm1752_vm1 }
 0x1fb   : > { %v1734_v19 = vmul.f32 %v5114_v56, %v1733_v61  ;;  %v1729_v0 = vsel %vm5175_vm8, %v1728_v39, %v1724_v11  ;;  %v3933_v10 = vpop.eup %3932  ;;  %v1755_v43 = vand.u32 2147483647, %v5091_v52  ;;  %v1778_v61 = vsub.f32 1.0, %v1777_v31  ;;  %vm5376_vm11 = vmor %vm1781_vm4, %vm1782_vm6 }
 0x1fc   : > { %vm5264_vm15 = vcmp.eq.f32.partialorder %v1740_v12, 8.507059e+37  ;;  %v5270_v23 = vpop.eup %3934  ;;  %v5273_v22 = vmul.f32 %v1714_v30, %v4787_v13  ;;  %v5275_v39 = vor.u32 1.1754944e-38, %v1757_v41  ;;  %v5280_v11 = vadd.f32 %v7785_v20, %v7784_v50 }
 0x1fd   : > { %v5232_v49 = vpop.f32.mrf.mxu2  ;;  %v5234_v46 = vpop.f32.mrf.mxu3  ;;  %v5283_v12 = vmul.f32 %v1729_v0, %v4974_v40  ;;  %v1735_v31 = vadd.f32 %v5114_v56, %v1734_v19  ;;  %v1764_v41 = vmul.f32 %v5185_v26, %v1763_v17  ;;  %v1772_v30 = vand.u32 2147483648, %v5094_v32 }
 0x1fe   : > { %v5251_v55 = vpop.f32.mrf.mxu0  ;;  %v5253_v25 = vpop.f32.mrf.mxu1  ;;  %v1793_v44 = vsub.f32 1.0, %v1792_v16  ;;  %v5290_v18 = vadd.f32 1.0, %v3933_v10  ;;  %v1779_v19 = vmul.f32 %v5203_v51, %v1778_v61  ;;  %v1807_v21 = vmul.f32 %v5270_v23, %v5179_v29  ;;  %v2857_v16 = vld [vmem:[%s4512_s7 + $0x98] sm:$0xff] }
 0x1ff   : > { %7786 = vst [vmem:[#allocation19_spill] sm:$0xff] %v5283_v12  ;;  %v3937_v13 = vpop.eup %3936  ;;  %3942 = vpow2.f32 %v3753_v63  ;;  %vm5308_vm3 = vcmp.eq.f32.partialorder %v1755_v43, 8.507059e+37  ;;  %v1785_v17 = vand.u32 2147483647, %v5100_v38  ;;  %v1787_v10 = vand.u32 2147483648, %v5100_v38  ;;  %3134 = vmatpush.msra.mxu2 %v2857_v16 }
 0x200   : > { %v3939_v0 = vpop.eup %3938  ;;  %v3754_v61 = vmul.f32 -1.442695, %v5280_v11  ;;  %v1739_v43 = vsel %vm5304_vm2, %v5114_v56, %v1735_v31  ;;  %v1750_v20 = vadd.f32 %v5173_v59, %v1749_v58  ;;  %v5325_v12 = vadd.f32 1.0, %v3937_v13  ;;  %v2889_v56 = vld [vmem:[%s4512_s7 + $0x198] sm:$0xff] }
 0x201   : > { %1036 = vmatmul.f32.gmra.mxu0 %v4156_v15  ;;  %1149 = vmatmul.f32.gmra.mxu1 %v4157_v6  ;;  %v1765_v8 = vadd.f32 %v5185_v26, %v1764_v41  ;;  %v1794_v9 = vmul.f32 %v5236_v48, %v1793_v44  ;;  %3944 = vrcp.f32 %v5290_v18  ;;  %v5330_v54 = vadd.f32 1.0, %v3939_v0 }
 0x202   : > { %1262 = vmatmul.f32.gmra.mxu2 %v4156_v15  ;;  %1375 = vmatmul.f32.gmra.mxu3 %v4157_v6  ;;  %v3941_v15 = vpop.eup %3940  ;;  %v1780_v58 = vadd.f32 %v5203_v51, %v1779_v19  ;;  %v1808_v31 = vsub.f32 1.0, %v1807_v21  ;;  %v1744_v41 = vsel %vm5264_vm15, %v5248_v4, %v1739_v43  ;;  %vm5349_vm8 = vcmp.eq.f32.partialorder %v1770_v57, 8.507059e+37 }
 0x203   : > { %v5336_v13 = vadd.f32 1.0, %v3941_v15  ;;  %3247 = vmatpush.msra.mxu3 %v2889_v56  ;;  %v1773_v19 = vor.u32 1.1754944e-38, %v1772_v30  ;;  %3946 = vpow2.f32 %v3754_v61  ;;  %v1754_v2 = vsel %vm5345_vm7, %v5173_v59, %v1750_v20 }
 0x204   : > { %vm5364_vm10 = vcmp.eq.f32.partialorder %v1785_v17, 8.507059e+37  ;;  %v1788_v4 = vor.u32 1.1754944e-38, %v1787_v10  ;;  %3948 = vrcp.f32 %v5325_v12  ;;  %v1769_v59 = vsel %vm5360_vm9, %v5185_v26, %v1765_v8  ;;  %v7801_v26 = vld [vmem:[#allocation20_spill] sm:$0xff] }
 0x205   : > { %v5292_v50 = vpop.f32.mrf.mxu2  ;;  %v5294_v40 = vpop.f32.mrf.mxu3  ;;  %v1795_v30 = vadd.f32 %v5236_v48, %v1794_v9  ;;  %3950 = vrcp.f32 %v5330_v54  ;;  %v1784_v8 = vsel %vm5376_vm11, %v5203_v51, %v1780_v58  ;;  %v1809_v38 = vmul.f32 %v5270_v23, %v1808_v31  ;;  %v4160_v58 = vld [vmem:[#allocation3 + $0x100] sm:$0xff]  ;;  %v4161_v31 = vld [vmem:[#allocation3 + $0x108] sm:$0xff] }
 0x206   : > { %v5316_v63 = vpop.f32.mrf.mxu0  ;;  %v5318_v24 = vpop.f32.mrf.mxu1  ;;  %3952 = vrcp.f32 %v5336_v13  ;;  %v3755_v15 = vmul.f32 -1.442695, %v7801_v26  ;;  %v5396_v9 = vmul.f32 %v1744_v41, %v4793_v28  ;;  %vm1796_vm13 = vweird.f32 %v5127_v14 }
 0x207   : > { %v3943_v21 = vpop.eup %3942  ;;  %v1802_v10 = vand.u32 2147483648, %v5127_v14  ;;  %v1759_v20 = vsel %vm5308_vm3, %v5275_v39, %v1754_v2  ;;  %v1774_v16 = vsel %vm5349_vm8, %v1773_v19, %v1769_v59  ;;  %vm5413_vm14 = vmor %vm1796_vm13, %vm1797_vm12  ;;  %v1800_v56 = vand.u32 2147483647, %v5127_v14 }
 0x208   : > { %v5393_v17 = vpop.eup %3944  ;;  %v5400_v61 = vadd.f32 1.0, %v3943_v21  ;;  %vm1811_vm15 = vweird.f32 %v5179_v29  ;;  %v1789_v39 = vsel %vm5364_vm10, %v1788_v4, %v1784_v8  ;;  %v1799_v6 = vsel %vm5413_vm14, %v5236_v48, %v1795_v30  ;;  %v7804_v21 = vld [vmem:[#allocation21_spill] sm:$0xff] }
 0x209   : > { %1039 = vmatmul.f32.gmra.mxu0 %v4158_v3  ;;  %1152 = vmatmul.f32.gmra.mxu1 %v4159_v37  ;;  %v3947_v41 = vpop.eup %3946  ;;  %vm1812_vm0 = vweird.f32 %v5270_v23  ;;  %v1815_v44 = vand.u32 2147483647, %v5179_v29  ;;  %v1810_v14 = vadd.f32 %v5270_v23, %v1809_v38  ;;  %v1822_v19 = vmul.f32 %v5393_v17, %v5290_v18 }
 0x20a   : > { %1265 = vmatmul.f32.gmra.mxu2 %v4158_v3  ;;  %1378 = vmatmul.f32.gmra.mxu3 %v4159_v37  ;;  %v5426_v0 = vpop.eup %3948  ;;  %3954 = vpow2.f32 %v3755_v15  ;;  %v3756_v2 = vmul.f32 -1.442695, %v7804_v21  ;;  %v5435_v57 = vmul.f32 %v1759_v20, %v5022_v47  ;;  %v1803_v48 = vor.u32 1.1754944e-38, %v1802_v10  ;;  %vm5454_vm2 = vmor %vm1811_vm15, %vm1812_vm0 }
 0x20b   : > { %v5432_v52 = vpop.eup %3950  ;;  %v1817_v4 = vand.u32 2147483648, %v5179_v29  ;;  %3956 = vrcp.f32 %v5400_v61  ;;  %v5442_v32 = vmul.f32 %v1774_v16, %v4801_v45  ;;  %vm1801_vm1 = vcmp.eq.f32.partialorder %v1800_v56, 8.507059e+37  ;;  %v2856_v56 = vld [vmem:[%s4512_s7 + $0x90] sm:$0xff] }
 0x20c   : > { %7805 = vst [vmem:[#allocation17_spill] sm:$0xff] %v5435_v57  ;;  %v5439_v59 = vpop.eup %3952  ;;  %v1832_v30 = vand.u32 2147483648, %v5290_v18  ;;  %v5445_v8 = vadd.f32 1.0, %v3947_v41  ;;  %v5448_v47 = vmul.f32 %v1789_v39, %v5028_v5  ;;  %v1804_v38 = vsel %vm1801_vm1, %v1803_v48, %v1799_v6  ;;  %2908 = vmatpush.msra.mxu0 %v2856_v56  ;;  %v7811_v48 = vld [vmem:[#allocation22_spill] sm:$0xff]  ;;  %v4162_v45 = vld [vmem:[#allocation3 + $0x110] sm:$0xff] }
 0x20d   : > { %v5383_v3 = vpop.f32.mrf.mxu2  ;;  %v5385_v37 = vpop.f32.mrf.mxu3  ;;  %vm5458_vm3 = vcmp.eq.f32.partialorder %v1815_v44, 8.507059e+37  ;;  %v1847_v10 = vand.u32 2147483648, %v5325_v12  ;;  %v1814_v5 = vsel %vm5454_vm2, %v5270_v23, %v1810_v14  ;;  %v1823_v28 = vsub.f32 1.0, %v1822_v19 }
 0x20e   : > { %v5402_v43 = vpop.f32.mrf.mxu0  ;;  %v5404_v51 = vpop.f32.mrf.mxu1  ;;  %7806 = vst [vmem:[#allocation18_spill] sm:$0xff] %v5448_v47  ;;  %v1862_v29 = vand.u32 2147483648, %v5330_v54  ;;  %3958 = vpow2.f32 %v3756_v2  ;;  %v1837_v41 = vmul.f32 %v5426_v0, %v5325_v12  ;;  %v1852_v39 = vmul.f32 %v5432_v52, %v5330_v54  ;;  %v4163_v47 = vld [vmem:[#allocation3 + $0x118] sm:$0xff] }
 0x20f   : > { %v1867_v6 = vmul.f32 %v5439_v59, %v5336_v13  ;;  %v1830_v19 = vand.u32 2147483647, %v5290_v18  ;;  %v5484_v2 = vor.u32 1.1754944e-38, %v1832_v30  ;;  %3960 = vrcp.f32 %v5445_v8 }
 0x210   : > { %v3955_v14 = vpop.eup %3954  ;;  %v5491_v56 = vmul.f32 %v1804_v38, %v4809_v62  ;;  %v5494_v21 = vor.u32 1.1754944e-38, %v1847_v10  ;;  %v1860_v30 = vand.u32 2147483647, %v5330_v54  ;;  %vm1827_vm4 = vweird.f32 %v5393_v17 }
 0x211   : > { %1042 = vmatmul.f32.gmra.mxu0 %v4160_v58  ;;  %1155 = vmatmul.f32.gmra.mxu1 %v4161_v31  ;;  %v5488_v57 = vpop.eup %3956  ;;  %vm1841_vm5 = vweird.f32 %v5325_v12  ;;  %v5502_v35 = vor.u32 1.1754944e-38, %v1862_v29  ;;  %vm1826_vm6 = vweird.f32 %v5290_v18  ;;  %v1838_v62 = vsub.f32 1.0, %v1837_v41 }
 0x212   : > { %1268 = vmatmul.f32.gmra.mxu2 %v4160_v58  ;;  %1381 = vmatmul.f32.gmra.mxu3 %v4161_v31  ;;  %v2888_v58 = vld [vmem:[%s4512_s7 + $0x190] sm:$0xff]  ;;  %v1818_v31 = vor.u32 1.1754944e-38, %v1817_v4  ;;  %v3757_v4 = vmul.f32 -1.442695, %v7811_v48  ;;  %v1824_v48 = vmul.f32 %v5393_v17, %v1823_v28  ;;  %v1853_v38 = vsub.f32 1.0, %v1852_v39  ;;  %vm5599_vm14 = vmor %vm1826_vm6, %vm1827_vm4 }
 0x213   : > { %3021 = vmatpush.msra.mxu1 %v2888_v58  ;;  %v1845_v58 = vand.u32 2147483647, %v5325_v12  ;;  %v1868_v26 = vsub.f32 1.0, %v1867_v6  ;;  %v5505_v10 = vadd.f32 1.0, %v3955_v14  ;;  %v1882_v15 = vmul.f32 %v5488_v57, %v5400_v61  ;;  %v2884_v12 = vld [vmem:[%s4512_s7 + $0x170] sm:$0xff] }
 0x214   : > { %v1819_v60 = vsel %vm5458_vm3, %v1818_v31, %v1814_v5  ;;  %v3959_v27 = vpop.eup %3958  ;;  %3962 = vpow2.f32 %v3757_v4  ;;  %v7812_v5 = vld [vmem:[#allocation25_spill] sm:$0xff]  ;;  %v5512_v29 = vadd.f32 %v5234_v46, %v5232_v49  ;;  %vm1842_vm7 = vweird.f32 %v5426_v0  ;;  %v7815_v46 = vld [vmem:[#allocation23_spill] sm:$0xff]  ;;  %v2855_v4 = vld [vmem:[%s4512_s7 + $0x88] sm:$0xff] }
 0x215   : > { %v5463_v20 = vpop.f32.mrf.mxu2  ;;  %v5465_v16 = vpop.f32.mrf.mxu3  ;;  %v3758_v28 = vmul.f32 -1.442695, %v7812_v5  ;;  %v5515_v31 = vmul.f32 %v1819_v60, %v5058_v33  ;;  %vm1856_vm8 = vweird.f32 %v5330_v54  ;;  %vm1857_vm9 = vweird.f32 %v5432_v52  ;;  %v7816_v60 = vld [vmem:[#allocation24_spill] sm:$0xff]  ;;  %3135 = vmatpush.msra.mxu2 %v2855_v4  ;;  %vm5618_vm1 = vmor %vm1841_vm5, %vm1842_vm7 }
 0x216   : > { %v5479_v44 = vpop.f32.mrf.mxu0  ;;  %v5481_v23 = vpop.f32.mrf.mxu1  ;;  %7813 = vst [vmem:[#allocation63_spill] sm:$0xff] %v5512_v29  ;;  %v1875_v41 = vand.u32 2147483647, %v5336_v13  ;;  %v5528_v49 = vadd.f32 %v5393_v17, %v1824_v48  ;;  %v5532_v33 = vadd.f32 %v7816_v60, %v7815_v46  ;;  %v5542_v29 = vadd.f32 %v5294_v40, %v5292_v50  ;;  %vm5633_vm2 = vmor %vm1856_vm8, %vm1857_vm9 }
 0x217   : > { %7814 = vst [vmem:[#allocation64_spill] sm:$0xff] %v5515_v31  ;;  %v5525_v14 = vpop.eup %3960  ;;  %vm5544_vm10 = vcmp.eq.f32.partialorder %v1830_v19, 8.507059e+37  ;;  %v1839_v48 = vmul.f32 %v5426_v0, %v1838_v62  ;;  %v1854_v5 = vmul.f32 %v5432_v52, %v1853_v38  ;;  %3964 = vrcp.f32 %v5505_v10  ;;  %v7821_v19 = vld [vmem:[#allocation26_spill] sm:$0xff] }
 0x218   : > { %7818 = vst [vmem:[#allocation24_spill] sm:$0xff] %v5542_v29  ;;  %v5551_v46 = vadd.f32 1.0, %v3959_v27  ;;  %v1869_v50 = vmul.f32 %v5439_v59, %v1868_v26  ;;  %v1883_v40 = vsub.f32 1.0, %v1882_v15  ;;  %3966 = vpow2.f32 %v3758_v28  ;;  %v4164_v29 = vld [vmem:[#allocation3 + $0x120] sm:$0xff]  ;;  %v4165_v62 = vld [vmem:[#allocation3 + $0x128] sm:$0xff] }
 0x219   : > { %1045 = vmatmul.f32.gmra.mxu0 %v4162_v45  ;;  %1158 = vmatmul.f32.gmra.mxu1 %v4163_v47  ;;  %v3759_v60 = vmul.f32 -1.442695, %v7821_v19  ;;  %vm5559_vm11 = vcmp.eq.f32.partialorder %v1845_v58, 8.507059e+37  ;;  %vm5563_vm12 = vcmp.eq.f32.partialorder %v1860_v30, 8.507059e+37  ;;  %v1897_v4 = vmul.f32 %v5525_v14, %v5445_v8 }
 0x21a   : > { %1271 = vmatmul.f32.gmra.mxu2 %v4162_v45  ;;  %1384 = vmatmul.f32.gmra.mxu3 %v4163_v47  ;;  %v5536_v47 = vadd.f32 %v5253_v25, %v5251_v55  ;;  %v2887_v45 = vld [vmem:[%s4512_s7 + $0x188] sm:$0xff]  ;;  %v5571_v26 = vadd.f32 %v5318_v24, %v5316_v63  ;;  %v5575_v15 = vadd.f32 %v5385_v37, %v5383_v3  ;;  %v3963_v30 = vpop.eup %3962  ;;  %v1877_v28 = vand.u32 2147483648, %v5336_v13 }
 0x21b   : > { %3248 = vmatpush.msra.mxu3 %v2887_v45  ;;  %v5579_v58 = vadd.f32 %v5404_v51, %v5402_v43  ;;  %v3760_v45 = vmul.f32 -1.442695, %v5532_v33  ;;  %v5589_v63 = vadd.f32 %v5481_v23, %v5479_v44  ;;  %v1840_v24 = vadd.f32 %v5426_v0, %v1839_v48  ;;  %v2854_v51 = vld [vmem:[%s4512_s7 + $0x80] sm:$0xff]  ;;  %v4167_v44 = vld [vmem:[#allocation3 + $0x138] sm:$0xff] }
 0x21c   : > { %7817 = vst [vmem:[#allocation23_spill] sm:$0xff] %v5536_v47  ;;  %v5585_v47 = vadd.f32 %v5465_v16, %v5463_v20  ;;  %v1855_v3 = vadd.f32 %v5432_v52, %v1854_v5  ;;  %vm1871_vm13 = vweird.f32 %v5336_v13  ;;  %3968 = vrcp.f32 %v5551_v46  ;;  %v2886_v20 = vld [vmem:[%s4512_s7 + $0x180] sm:$0xff]  ;;  %2909 = vmatpush.msra.mxu0 %v2854_v51  ;;  %v2852_v51 = vld [vmem:[%s4512_s7 + $0x70] sm:$0xff] }
 0x21d   : > { %v5521_v39 = vpop.f32.mrf.mxu2  ;;  %v5523_v6 = vpop.f32.mrf.mxu3  ;;  %7826 = vst [vmem:[#allocation26_spill] sm:$0xff] %v5571_v26  ;;  %vm1872_vm15 = vweird.f32 %v5439_v59  ;;  %v1884_v43 = vmul.f32 %v5488_v57, %v1883_v40  ;;  %vm1886_vm0 = vweird.f32 %v5400_v61  ;;  %3970 = vpow2.f32 %v3759_v60  ;;  %3022 = vmatpush.msra.mxu1 %v2886_v20  ;;  %v4166_v20 = vld [vmem:[#allocation3 + $0x130] sm:$0xff]  ;;  %v2883_v26 = vld [vmem:[%s4512_s7 + $0x168] sm:$0xff] }
 0x21e   : > { %v5553_v25 = vpop.f32.mrf.mxu0  ;;  %v5555_v55 = vpop.f32.mrf.mxu1  ;;  %7827 = vst [vmem:[#allocation65_spill] sm:$0xff] %v5575_v15  ;;  %v1829_v18 = vsel %vm5599_vm14, %v5393_v17, %v5528_v49  ;;  %v1870_v23 = vadd.f32 %v5439_v59, %v1869_v50  ;;  %v1898_v5 = vsub.f32 1.0, %v1897_v4  ;;  %vm5637_vm3 = vcmp.eq.f32.partialorder %v1875_v41, 8.507059e+37  ;;  %vm5652_vm4 = vmor %vm1871_vm13, %vm1872_vm15  ;;  %v2851_v15 = vld [vmem:[%s4512_s7 + $0x68] sm:$0xff]  ;;  %2910 = vmatpush.msra.mxu0 %v2852_v51 }
 0x21f   : > { %7828 = vst [vmem:[#allocation66_spill] sm:$0xff] %v5589_v63  ;;  %v5608_v16 = vpop.eup %3964  ;;  %v1878_v50 = vor.u32 1.1754944e-38, %v1877_v28  ;;  %v1890_v60 = vand.u32 2147483647, %v5400_v61  ;;  %3972 = vpow2.f32 %v3760_v45  ;;  %v1859_v54 = vsel %vm5633_vm2, %v5432_v52, %v1855_v3  ;;  %v2885_v3 = vld [vmem:[%s4512_s7 + $0x178] sm:$0xff]  ;;  %3023 = vmatpush.msra.mxu1 %v2884_v12  ;;  %v2879_v51 = vld [vmem:[%s4512_s7 + $0x148] sm:$0xff] }
 0x220   : > { %v3967_v17 = vpop.eup %3966  ;;  %v1892_v4 = vand.u32 2147483648, %v5400_v61  ;;  %v5666_v52 = vadd.f32 %v5488_v57, %v1884_v43  ;;  %vm1887_vm5 = vweird.f32 %v5488_v57  ;;  %v5671_v13 = vmul.f32 %v5608_v16, %v5505_v10  ;;  %3249 = vmatpush.msra.mxu3 %v2885_v3  ;;  %v2881_v61 = vld [vmem:[%s4512_s7 + $0x158] sm:$0xff]  ;;  %v2878_v12 = vld [vmem:[%s4512_s7 + $0x140] sm:$0xff] }
 0x221   : > { %1048 = vmatmul.f32.gmra.mxu0 %v4164_v29  ;;  %1161 = vmatmul.f32.gmra.mxu1 %v4165_v62  ;;  %v1874_v31 = vsel %vm5652_vm4, %v5439_v59, %v1870_v23  ;;  %v1899_v43 = vmul.f32 %v5525_v14, %v1898_v5  ;;  %v1864_v59 = vsel %vm5563_vm12, %v5502_v35, %v1859_v54  ;;  %vm5694_vm6 = vcmp.eq.f32.partialorder %v1890_v60, 8.507059e+37  ;;  %v2850_v5 = vld [vmem:[%s4512_s7 + $0x60] sm:$0xff]  ;;  %vm5705_vm8 = vmor %vm1886_vm0, %vm1887_vm5  ;;  %v2849_v60 = vld [vmem:[%s4512_s7 + $0x58] sm:$0xff] }
 0x222   : > { %1274 = vmatmul.f32.gmra.mxu2 %v4164_v29  ;;  %1387 = vmatmul.f32.gmra.mxu3 %v4165_v62  ;;  %v5623_v29 = vadd.f32 1.0, %v3963_v30  ;;  %v1844_v62 = vsel %vm5618_vm1, %v5426_v0, %v1840_v24  ;;  %v7839_v30 = vld [vmem:[#allocation27_spill] sm:$0xff]  ;;  %v1834_v0 = vsel %vm5544_vm10, %v5484_v2, %v1829_v18  ;;  %v2853_v24 = vld [vmem:[%s4512_s7 + $0x78] sm:$0xff]  ;;  %v5676_v2 = vpop.eup %3968  ;;  %v5683_v18 = vadd.f32 1.0, %v3967_v17  ;;  %v2882_v17 = vld [vmem:[%s4512_s7 + $0x160] sm:$0xff] }
 0x223   : > { %v3761_v28 = vmul.f32 -1.442695, %v7839_v30  ;;  %3136 = vmatpush.msra.mxu2 %v2853_v24  ;;  %v3971_v63 = vpop.eup %3970  ;;  %v1849_v41 = vsel %vm5559_vm11, %v5494_v21, %v1844_v62  ;;  %vm1901_vm7 = vweird.f32 %v5445_v8  ;;  %v1905_v35 = vand.u32 2147483647, %v5445_v8  ;;  %3250 = vmatpush.msra.mxu3 %v2883_v26  ;;  %v7845_v24 = vld [vmem:[#allocation28_spill] sm:$0xff]  ;;  %v4168_v21 = vld [vmem:[#allocation3 + $0x140] sm:$0xff] }
 0x224   : > { %3974 = vrcp.f32 %v5623_v29  ;;  %v5712_v38 = vmul.f32 %v5273_v22, %v5585_v47  ;;  %v1338_v27 = vadd.f32 %v5523_v6, %v5521_v39  ;;  %v1879_v54 = vsel %vm5637_vm3, %v1878_v50, %v1874_v31  ;;  %2911 = vmatpush.msra.mxu0 %v2850_v5  ;;  %3024 = vmatpush.msra.mxu1 %v2882_v17  ;;  %v2848_v39 = vld [vmem:[%s4512_s7 + $0x50] sm:$0xff] }
 0x225   : > { %v5625_v48 = vpop.f32.mrf.mxu2  ;;  %v5627_v40 = vpop.f32.mrf.mxu3  ;;  %3976 = vpow2.f32 %v3761_v28  ;;  %3137 = vmatpush.msra.mxu2 %v2851_v15  ;;  %v1889_v28 = vsel %vm5705_vm8, %v5488_v57, %v5666_v52  ;;  %vm1902_vm9 = vweird.f32 %v5525_v14  ;;  %v1913_v22 = vsub.f32 1.0, %v5671_v13  ;;  %v2880_v6 = vld [vmem:[%s4512_s7 + $0x150] sm:$0xff]  ;;  %3251 = vmatpush.msra.mxu3 %v2881_v61 }
 0x226   : > { %v5658_v45 = vpop.f32.mrf.mxu0  ;;  %v5660_v37 = vpop.f32.mrf.mxu1  ;;  %v1900_v47 = vadd.f32 %v5525_v14, %v1899_v43  ;;  %v5731_v26 = vmul.f32 %v5676_v2, %v5551_v46  ;;  %3978 = vrcp.f32 %v5683_v18  ;;  %v5734_v15 = vadd.f32 1.0, %v3971_v63  ;;  %v2847_v63 = vld [vmem:[%s4512_s7 + $0x48] sm:$0xff]  ;;  %2912 = vmatpush.msra.mxu0 %v2848_v39  ;;  %3025 = vmatpush.msra.mxu1 %v2880_v6  ;;  %v2846_v43 = vld [vmem:[%s4512_s7 + $0x40] sm:$0xff]  ;;  %vm5776_vm11 = vmor %vm1901_vm7, %vm1902_vm9 }
 0x227   : > { %v3973_v62 = vpop.eup %3972  ;;  %v5741_v50 = vmul.f32 %v1834_v0, %v7767_v53  ;;  %v5744_v52 = vmul.f32 %v1849_v41, %v5156_v1  ;;  %v1893_v13 = vor.u32 1.1754944e-38, %v1892_v4  ;;  %v3762_v3 = vmul.f32 -1.442695, %v7845_v24  ;;  %3138 = vmatpush.msra.mxu2 %v2849_v60  ;;  %3252 = vmatpush.msra.mxu3 %v2879_v51  ;;  %v7853_v51 = vld [vmem:[#allocation29_spill] sm:$0xff]  ;;  %v2845_v53 = vld [vmem:[%s4512_s7 + $0x38] sm:$0xff] }
 0x228   : > { %vm5754_vm10 = vcmp.eq.f32.partialorder %v1905_v35, 8.507059e+37  ;;  %v1907_v1 = vand.u32 2147483648, %v5445_v8  ;;  %v5759_v0 = vadd.f32 1.0, %v3973_v62  ;;  %v5768_v41 = vmul.f32 %v1879_v54, %v5183_v42  ;;  %v4169_v35 = vld [vmem:[#allocation3 + $0x148] sm:$0xff]  ;;  %2913 = vmatpush.msra.mxu0 %v2846_v43  ;;  %3026 = vmatpush.msra.mxu1 %v2878_v12  ;;  %v2877_v43 = vld [vmem:[%s4512_s7 + $0x138] sm:$0xff] }
 0x229   : > { %1051 = vmatmul.f32.gmra.mxu0 %v4166_v20  ;;  %1164 = vmatmul.f32.gmra.mxu1 %v4167_v44  ;;  %7844 = vst [vmem:[#allocation27_spill] sm:$0xff] %v5744_v52  ;;  %v1920_v5 = vand.u32 2147483647, %v5505_v10  ;;  %v1922_v17 = vand.u32 2147483648, %v5505_v10  ;;  %v1904_v23 = vsel %vm5776_vm11, %v5525_v14, %v1900_v47  ;;  %v1914_v60 = vmul.f32 %v5608_v16, %v1913_v22 }
 0x22a   : > { %1277 = vmatmul.f32.gmra.mxu2 %v4166_v20  ;;  %1390 = vmatmul.f32.gmra.mxu3 %v4167_v44  ;;  %v5749_v20 = vpop.eup %3974  ;;  %v5752_v44 = vmul.f32 %v1864_v59, %v7775_v36  ;;  %7848 = vst [vmem:[#allocation28_spill] sm:$0xff] %v5768_v41  ;;  %v1894_v36 = vsel %vm5694_vm6, %v1893_v13, %v1889_v28  ;;  %v1928_v8 = vsub.f32 1.0, %v5731_v26  ;;  %3980 = vrcp.f32 %v5734_v15 }
 0x22b   : > { %v3977_v42 = vpop.eup %3976  ;;  %3139 = vmatpush.msra.mxu2 %v2847_v63  ;;  %v1942_v61 = vmul.f32 %v5749_v20, %v5623_v29  ;;  %3982 = vpow2.f32 %v3762_v3  ;;  %v5791_v62 = vmul.f32 %v5396_v9, %v1338_v27  ;;  %v5795_v54 = vadd.f32 %v5555_v55, %v5553_v25  ;;  %3253 = vmatpush.msra.mxu3 %v2877_v43 }
 0x22c   : > { %v5797_v14 = vpop.eup %3978  ;;  %v1908_v28 = vor.u32 1.1754944e-38, %v1907_v1  ;;  %vm1916_vm12 = vweird.f32 %v5505_v10  ;;  %v1937_v22 = vand.u32 2147483648, %v5551_v46  ;;  %3984 = vrcp.f32 %v5759_v0 }
 0x22d   : > { %v5736_v57 = vpop.f32.mrf.mxu2  ;;  %v5738_v49 = vpop.f32.mrf.mxu3  ;;  %v5803_v39 = vmul.f32 %v1894_v36, %v7783_v34  ;;  %vm5805_vm13 = vcmp.eq.f32.partialorder %v1920_v5, 8.507059e+37  ;;  %v1952_v25 = vand.u32 2147483648, %v5623_v29  ;;  %v5810_v55 = vadd.f32 1.0, %v3977_v42  ;;  %3140 = vmatpush.msra.mxu2 %v2845_v53 }
 0x22e   : > { %v5761_v4 = vpop.f32.mrf.mxu0  ;;  %v5763_v31 = vpop.f32.mrf.mxu1  ;;  %v1909_v27 = vsel %vm5754_vm10, %v1908_v28, %v1904_v23  ;;  %v1915_v6 = vadd.f32 %v5608_v16, %v1914_v60  ;;  %vm1917_vm14 = vweird.f32 %v5608_v16  ;;  %v1923_v47 = vor.u32 1.1754944e-38, %v1922_v17 }
 0x22f   : > { %v1929_v13 = vmul.f32 %v5676_v2, %v1928_v8  ;;  %v1943_v3 = vsub.f32 1.0, %v1942_v61  ;;  %v5819_v63 = vmul.f32 %v5797_v14, %v5683_v18  ;;  %v3763_v1 = vmul.f32 -1.442695, %v7853_v51  ;;  %vm5837_vm0 = vmor %vm1916_vm12, %vm1917_vm14  ;;  %v4170_v8 = vld [vmem:[#allocation3 + $0x150] sm:$0xff]  ;;  %v4171_v61 = vld [vmem:[#allocation3 + $0x158] sm:$0xff] }
 0x230   : > { %v5824_v12 = vpop.eup %3980  ;;  %vm1931_vm15 = vweird.f32 %v5551_v46  ;;  %v1935_v36 = vand.u32 2147483647, %v5551_v46  ;;  %v5828_v59 = vor.u32 1.1754944e-38, %v1937_v22  ;;  %v1950_v5 = vand.u32 2147483647, %v5623_v29 }
 0x231   : > { %1054 = vmatmul.f32.gmra.mxu0 %v4168_v21  ;;  %1167 = vmatmul.f32.gmra.mxu1 %v4169_v35  ;;  %vm1932_vm1 = vweird.f32 %v5676_v2  ;;  %v5842_v23 = vor.u32 1.1754944e-38, %v1952_v25  ;;  %3986 = vrcp.f32 %v5810_v55  ;;  %v5849_v10 = vmul.f32 %v1909_v27, %v5280_v11  ;;  %v2844_v11 = vld [vmem:[%s4512_s7 + $0x30] sm:$0xff] }
 0x232   : > { %1280 = vmatmul.f32.gmra.mxu2 %v4168_v21  ;;  %1393 = vmatmul.f32.gmra.mxu3 %v4169_v35  ;;  %v3983_v35 = vpop.eup %3982  ;;  %v1919_v22 = vsel %vm5837_vm0, %v5608_v16, %v1915_v6  ;;  %vm1946_vm2 = vweird.f32 %v5623_v29  ;;  %v1967_v25 = vand.u32 2147483648, %v5683_v18  ;;  %v1341_v53 = vadd.f32 %v5627_v40, %v5625_v48  ;;  %v2876_v27 = vld [vmem:[%s4512_s7 + $0x130] sm:$0xff]  ;;  %vm5896_vm5 = vmor %vm1931_vm15, %vm1932_vm1 }
 0x233   : > { %v5846_v28 = vpop.eup %3984  ;;  %7856 = vst [vmem:[#allocation29_spill] sm:$0xff] %v5849_v10  ;;  %v5859_v43 = vadd.f32 %v5676_v2, %v1929_v13  ;;  %v1944_v60 = vmul.f32 %v5749_v20, %v1943_v3  ;;  %v1958_v41 = vsub.f32 1.0, %v5819_v63  ;;  %3988 = vpow2.f32 %v3763_v1  ;;  %2914 = vmatpush.msra.mxu0 %v2844_v11  ;;  %3027 = vmatpush.msra.mxu1 %v2876_v27 }
 0x234   : > { %vm5865_vm3 = vcmp.eq.f32.partialorder %v1935_v36, 8.507059e+37  ;;  %v1972_v16 = vmul.f32 %v5824_v12, %v5734_v15  ;;  %v5871_v6 = vadd.f32 1.0, %v3983_v35  ;;  %v5874_v48 = vmul.f32 %v5442_v32, %v1341_v53 }
 0x235   : > { %v1233_v34 = vpop.f32.mrf.mxu2  ;;  %v1346_v26 = vpop.f32.mrf.mxu3  ;;  %v5878_v40 = vadd.f32 %v5660_v37, %v5658_v45  ;;  %vm1961_vm4 = vweird.f32 %v5683_v18  ;;  %v1987_v13 = vmul.f32 %v5846_v28, %v5759_v0  ;;  %v3764_v3 = vmul.f32 -1.442695, %v4869_v7 }
 0x236   : > { %v5831_v17 = vpop.f32.mrf.mxu0  ;;  %v1123_v21 = vpop.f32.mrf.mxu1  ;;  %v1344_v63 = vadd.f32 %v5738_v49, %v5736_v57  ;;  %v5888_v32 = vadd.f32 %v5763_v31, %v5761_v4  ;;  %v1924_v45 = vsel %vm5805_vm13, %v1923_v47, %v1919_v22  ;;  %vm1947_vm6 = vweird.f32 %v5749_v20 }
 0x237   : > { %vm5901_vm7 = vcmp.eq.f32.partialorder %v1950_v5, 8.507059e+37  ;;  %v5905_v57 = vor.u32 1.1754944e-38, %v1967_v25  ;;  %v1347_v49 = vadd.f32 %v1346_v26, %v1233_v34  ;;  %v5907_v9 = vpop.eup %3986  ;;  %v1934_v46 = vsel %vm5896_vm5, %v5676_v2, %v5859_v43  ;;  %v7866_v43 = vld [vmem:[#allocation30_spill] sm:$0xff]  ;;  %vm5940_vm9 = vmor %vm1946_vm2, %vm1947_vm6 }
 0x238   : > { %7859 = vst [vmem:[#allocation67_spill] sm:$0xff] %v5888_v32  ;;  %v1945_v47 = vadd.f32 %v5749_v20, %v1944_v60  ;;  %v1980_v36 = vand.u32 2147483647, %v5734_v15  ;;  %v1982_v5 = vand.u32 2147483648, %v5734_v15  ;;  %v1959_v35 = vmul.f32 %v5797_v14, %v1958_v41  ;;  %v4173_v41 = vld [vmem:[#allocation3 + $0x168] sm:$0xff]  ;;  %v4183_v32 = vld [vmem:[#allocation3 + $0x1b8] sm:$0xff] }
 0x239   : > { %1057 = vmatmul.f32.gmra.mxu0 %v4170_v8  ;;  %1170 = vmatmul.f32.gmra.mxu1 %v4171_v61  ;;  %v1973_v34 = vsub.f32 1.0, %v1972_v16  ;;  %3990 = vrcp.f32 %v5871_v6  ;;  %v5919_v26 = vmul.f32 %v5491_v56, %v1344_v63  ;;  %v3989_v25 = vpop.eup %3988  ;;  %v1988_v53 = vsub.f32 1.0, %v1987_v13  ;;  %v7868_v13 = vld [vmem:[#allocation20_spill] sm:$0xff] }
 0x23a   : > { %1283 = vmatmul.f32.gmra.mxu2 %v4170_v8  ;;  %1396 = vmatmul.f32.gmra.mxu3 %v4171_v61  ;;  %3992 = vpow2.f32 %v3764_v3  ;;  %v5922_v2 = vmul.f32 %v5741_v50, %v1347_v49  ;;  %v5925_v60 = vadd.f32 %v1123_v21, %v5831_v17  ;;  %v4172_v61 = vld [vmem:[#allocation3 + $0x160] sm:$0xff]  ;;  %vm1976_vm8 = vweird.f32 %v5734_v15  ;;  %v7871_v3 = vld [vmem:[#allocation31_spill] sm:$0xff] }
 0x23b   : > { %v2002_v56 = vmul.f32 %v5907_v9, %v5810_v55  ;;  %v3765_v11 = vmul.f32 -1.442695, %v7866_v43  ;;  %v5934_v50 = vmul.f32 %v1924_v45, %v7868_v13  ;;  %vm1962_vm10 = vweird.f32 %v5797_v14 }
 0x23c   : > { %7864 = vst [vmem:[#allocation68_spill] sm:$0xff] %v5922_v2  ;;  %v1995_v21 = vand.u32 2147483647, %v5759_v0  ;;  %v3766_v63 = vmul.f32 -1.442695, %v7871_v3  ;;  %v1949_v37 = vsel %vm5940_vm9, %v5749_v20, %v1945_v47  ;;  %v1974_v29 = vmul.f32 %v5824_v12, %v1973_v34  ;;  %vm5988_vm15 = vmor %vm1961_vm4, %vm1962_vm10  ;;  %v4182_v2 = vld [vmem:[#allocation3 + $0x1b0] sm:$0xff] }
 0x23d   : > { %v1236_v4 = vpop.f32.mrf.mxu2  ;;  %v1349_v31 = vpop.f32.mrf.mxu3  ;;  %7865 = vst [vmem:[#allocation69_spill] sm:$0xff] %v5925_v60  ;;  %v7872_v45 = vand.u32 2147483647, %v5683_v18  ;;  %v5966_v20 = vor.u32 1.1754944e-38, %v1982_v5  ;;  %v1989_v47 = vmul.f32 %v5846_v28, %v1988_v53  ;;  %vm5971_vm12 = vcmp.eq.f32.partialorder %v1980_v36, 8.507059e+37  ;;  %v7878_v36 = vld [vmem:[#allocation34_spill] sm:$0xff] }
 0x23e   : > { %v1013_v8 = vpop.f32.mrf.mxu0  ;;  %v1126_v22 = vpop.f32.mrf.mxu1  ;;  %v1350_v27 = vadd.f32 %v1349_v31, %v1236_v4  ;;  %v5957_v4 = vadd.f32 1.0, %v3989_v25  ;;  %vm1991_vm13 = vweird.f32 %v5759_v0  ;;  %v2003_v42 = vsub.f32 1.0, %v2002_v56  ;;  %v2843_v53 = vld [vmem:[%s4512_s7 + $0x28] sm:$0xff] }
 0x23f   : > { %v5931_v16 = vadd.f32 %v1126_v22, %v1013_v8  ;;  %vm5952_vm11 = vcmp.eq.f32.partialorder %v7872_v45, 8.507059e+37  ;;  %v1939_v8 = vsel %vm5865_vm3, %v5828_v59, %v1934_v46  ;;  %v1960_v22 = vadd.f32 %v5797_v14, %v1959_v35  ;;  %v5969_v13 = vpop.eup %3990  ;;  %3141 = vmatpush.msra.mxu2 %v2843_v53  ;;  %v7888_v53 = vld [vmem:[#allocation35_spill] sm:$0xff] }
 0x240   : > { %v5960_v31 = vmul.f32 %v5752_v44, %v1350_v27  ;;  %v1997_v44 = vand.u32 2147483648, %v5759_v0  ;;  %3994 = vpow2.f32 %v3765_v11  ;;  %v3993_v46 = vpop.eup %3992  ;;  %v1954_v5 = vsel %vm5901_vm7, %v5842_v23, %v1949_v37  ;;  %v2875_v27 = vld [vmem:[%s4512_s7 + $0x128] sm:$0xff]  ;;  %v4175_v37 = vld [vmem:[#allocation3 + $0x178] sm:$0xff] }
 0x241   : > { %1060 = vmatmul.f32.gmra.mxu0 %v4172_v61  ;;  %1173 = vmatmul.f32.gmra.mxu1 %v4173_v41  ;;  %7867 = vst [vmem:[#allocation30_spill] sm:$0xff] %v5931_v16  ;;  %vm1977_vm14 = vweird.f32 %v5824_v12  ;;  %3996 = vpow2.f32 %v3766_v63  ;;  %v3767_v35 = vmul.f32 -1.442695, %v7878_v36  ;;  %v1975_v1 = vadd.f32 %v5824_v12, %v1974_v29  ;;  %v4174_v63 = vld [vmem:[#allocation3 + $0x170] sm:$0xff]  ;;  %v7922_v16 = vld [vmem:[#allocation40_spill] sm:$0xff] }
 0x242   : > { %7875 = vst [vmem:[#allocation20_spill] sm:$0xff] %v5960_v31  ;;  %1286 = vmatmul.f32.gmra.mxu2 %v4172_v61  ;;  %1399 = vmatmul.f32.gmra.mxu3 %v4173_v41  ;;  %vm5993_vm0 = vcmp.eq.f32.partialorder %v1995_v21, 8.507059e+37  ;;  %3998 = vrcp.f32 %v5957_v4  ;;  %v1964_v18 = vsel %vm5988_vm15, %v5797_v14, %v1960_v22  ;;  %v1990_v17 = vadd.f32 %v5846_v28, %v1989_v47  ;;  %v7885_v22 = vld [vmem:[#allocation21_spill] sm:$0xff]  ;;  %vm6018_vm2 = vmor %vm1976_vm8, %vm1977_vm14 }
 0x243   : > { %3254 = vmatpush.msra.mxu3 %v2875_v27  ;;  %vm1992_vm1 = vweird.f32 %v5846_v28  ;;  %v2004_v45 = vmul.f32 %v5907_v9, %v2003_v42  ;;  %v2017_v29 = vmul.f32 %v5969_v13, %v5871_v6  ;;  %v2662_v47 = vmul.f32 %v1939_v8, %v7885_v22  ;;  %v2874_v61 = vld [vmem:[%s4512_s7 + $0x120] sm:$0xff] }
 0x244   : > { %v2010_v42 = vand.u32 2147483647, %v5810_v55  ;;  %4000 = vpow2.f32 %v3767_v35  ;;  %v3768_v27 = vmul.f32 -1.442695, %v7888_v53  ;;  %v1979_v8 = vsel %vm6018_vm2, %v5824_v12, %v1975_v1  ;;  %3028 = vmatpush.msra.mxu1 %v2874_v61  ;;  %vm6040_vm3 = vmor %vm1991_vm13, %vm1992_vm1 }
 0x245   : > { %v1239_v59 = vpop.f32.mrf.mxu2  ;;  %v1352_v25 = vpop.f32.mrf.mxu3  ;;  %v1998_v15 = vor.u32 1.1754944e-38, %v1997_v44  ;;  %v1969_v35 = vsel %vm5952_vm11, %v5905_v57, %v1964_v18  ;;  %vm2006_vm4 = vweird.f32 %v5810_v55  ;;  %vm2007_vm5 = vweird.f32 %v5907_v9 }
 0x246   : > { %v1353_v41 = vadd.f32 %v1352_v25, %v1239_v59  ;;  %v1016_v56 = vpop.f32.mrf.mxu0  ;;  %v1129_v11 = vpop.f32.mrf.mxu1  ;;  %v6008_v59 = vadd.f32 1.0, %v3993_v46  ;;  %v2842_v46 = vld [vmem:[%s4512_s7 + $0x20] sm:$0xff]  ;;  %v2012_v12 = vand.u32 2147483648, %v5810_v55  ;;  %v1994_v57 = vsel %vm6040_vm3, %v5846_v28, %v1990_v17  ;;  %vm6072_vm7 = vmor %vm2006_vm4, %vm2007_vm5 }
 0x247   : > { %v6003_v21 = vadd.f32 %v1129_v11, %v1016_v56  ;;  %v3995_v56 = vpop.eup %3994  ;;  %v7890_v11 = vld [vmem:[#allocation36_spill] sm:$0xff]  ;;  %2915 = vmatpush.msra.mxu0 %v2842_v46  ;;  %v2005_v49 = vadd.f32 %v5907_v9, %v2004_v45  ;;  %v2018_v1 = vsub.f32 1.0, %v2017_v29  ;;  %v1984_v18 = vsel %vm5971_vm12, %v5966_v20, %v1979_v8 }
 0x248   : > { %v6011_v14 = vmul.f32 %v5803_v39, %v1353_v41  ;;  %v7889_v39 = vld [vmem:[#allocation22_spill] sm:$0xff]  ;;  %v3769_v22 = vmul.f32 -1.442695, %v7890_v11  ;;  %v3997_v10 = vpop.eup %3996  ;;  %4002 = vrcp.f32 %v6008_v59  ;;  %vm6057_vm6 = vcmp.eq.f32.partialorder %v2010_v42, 8.507059e+37  ;;  %v7897_v8 = vld [vmem:[#allocation32_spill] sm:$0xff] }
 0x249   : > { %7883 = vst [vmem:[#allocation31_spill] sm:$0xff] %v6003_v21  ;;  %1063 = vmatmul.f32.gmra.mxu0 %v4174_v63  ;;  %1176 = vmatmul.f32.gmra.mxu1 %v4175_v37  ;;  %v6027_v41 = vmul.f32 %v1954_v5, %v7889_v39  ;;  %v6047_v44 = vpop.eup %3998  ;;  %v6061_v46 = vadd.f32 1.0, %v3995_v56  ;;  %4004 = vpow2.f32 %v3768_v27  ;;  %v2025_v17 = vand.u32 2147483647, %v5871_v6  ;;  %v4176_v27 = vld [vmem:[#allocation3 + $0x180] sm:$0xff]  ;;  %v4177_v56 = vld [vmem:[#allocation3 + $0x188] sm:$0xff] }
 0x24a   : > { %7884 = vst [vmem:[#allocation34_spill] sm:$0xff] %v6011_v14  ;;  %1289 = vmatmul.f32.gmra.mxu2 %v4174_v63  ;;  %1402 = vmatmul.f32.gmra.mxu3 %v4175_v37  ;;  %v6064_v45 = vadd.f32 1.0, %v3997_v10  ;;  %4006 = vpow2.f32 %v3769_v22  ;;  %v4001_v39 = vpop.eup %4000  ;;  %v1999_v20 = vsel %vm5993_vm0, %v1998_v15, %v1994_v57  ;;  %v2027_v37 = vand.u32 2147483648, %v5871_v6  ;;  %v7898_v15 = vld [vmem:[#allocation33_spill] sm:$0xff] }
 0x24b   : > { %v2032_v10 = vmul.f32 %v6047_v44, %v5957_v4  ;;  %v2009_v23 = vsel %vm6072_vm7, %v5907_v9, %v2005_v49  ;;  %v2019_v55 = vmul.f32 %v5969_v13, %v2018_v1  ;;  %v6085_v22 = vadd.f32 %v7898_v15, %v7897_v8  ;;  %v7901_v57 = vld [vmem:[#allocation25_spill] sm:$0xff] }
 0x24c   : > { %4008 = vrcp.f32 %v6061_v46  ;;  %v6097_v9 = vmul.f32 %v1984_v18, %v7821_v19  ;;  %vm2021_vm8 = vweird.f32 %v5871_v6  ;;  %v6101_v49 = vadd.f32 1.0, %v4001_v39 }
 0x24d   : > { %v1242_v0 = vpop.f32.mrf.mxu2  ;;  %v1355_v28 = vpop.f32.mrf.mxu3  ;;  %7899 = vst [vmem:[#allocation21_spill] sm:$0xff] %v6085_v22  ;;  %4010 = vrcp.f32 %v6064_v45  ;;  %v6104_v1 = vmul.f32 %v1999_v20, %v5532_v33  ;;  %vm6108_vm9 = vcmp.eq.f32.partialorder %v2025_v17, 8.507059e+37  ;;  %v2033_v19 = vsub.f32 1.0, %v2032_v10  ;;  %v2841_v10 = vld [vmem:[%s4512_s7 + $0x18] sm:$0xff] }
 0x24e   : > { %v1356_v63 = vadd.f32 %v1355_v28, %v1242_v0  ;;  %v1019_v29 = vpop.f32.mrf.mxu0  ;;  %v1132_v61 = vpop.f32.mrf.mxu1  ;;  %v2664_v0 = vmul.f32 %v1969_v35, %v7901_v57  ;;  %v2013_v28 = vor.u32 1.1754944e-38, %v2012_v12  ;;  %v2020_v18 = vadd.f32 %v5969_v13, %v2019_v55  ;;  %3142 = vmatpush.msra.mxu2 %v2841_v10  ;;  %v7908_v10 = vld [vmem:[#allocation37_spill] sm:$0xff] }
 0x24f   : > { %v1133_v42 = vadd.f32 %v1132_v61, %v1019_v29  ;;  %v6094_v61 = vpop.eup %4002  ;;  %7903 = vst [vmem:[#allocation36_spill] sm:$0xff] %v6104_v1  ;;  %vm2022_vm10 = vweird.f32 %v5969_v13  ;;  %v3770_v39 = vmul.f32 -1.442695, %v6085_v22  ;;  %vm2036_vm11 = vweird.f32 %v5957_v4 }
 0x250   : > { %v6088_v5 = vmul.f32 %v5934_v50, %v1356_v63  ;;  %v4005_v50 = vpop.eup %4004  ;;  %v2014_v35 = vsel %vm6057_vm6, %v2013_v28, %v2009_v23  ;;  %v2028_v63 = vor.u32 1.1754944e-38, %v2027_v37  ;;  %v2040_v33 = vand.u32 2147483647, %v5957_v4  ;;  %vm6134_vm12 = vmor %vm2021_vm8, %vm2022_vm10 }
 0x251   : > { %1066 = vmatmul.f32.gmra.mxu0 %v4176_v27  ;;  %1179 = vmatmul.f32.gmra.mxu1 %v4177_v56  ;;  %v6092_v29 = vmul.f32 %v2662_v47, %v1133_v42  ;;  %v4007_v12 = vpop.eup %4006  ;;  %v2042_v25 = vand.u32 2147483648, %v5957_v4  ;;  %v2047_v17 = vmul.f32 %v6094_v61, %v6008_v59  ;;  %v2873_v42 = vld [vmem:[%s4512_s7 + $0x118] sm:$0xff]  ;;  %v6123_v23 = vmul.f32 %v2014_v35, %v7839_v30  ;;  %v4178_v35 = vld [vmem:[#allocation3 + $0x190] sm:$0xff] }
 0x252   : > { %7900 = vst [vmem:[#allocation35_spill] sm:$0xff] %v6088_v5  ;;  %1292 = vmatmul.f32.gmra.mxu2 %v4176_v27  ;;  %1405 = vmatmul.f32.gmra.mxu3 %v4177_v56  ;;  %4012 = vrcp.f32 %v6101_v49  ;;  %v6126_v37 = vadd.f32 1.0, %v4005_v50  ;;  %v6128_v15 = vpop.eup %4008  ;;  %v2034_v30 = vmul.f32 %v6047_v44, %v2033_v19  ;;  %v2057_v57 = vand.u32 2147483648, %v6008_v59 }
 0x253   : > { %7902 = vst [vmem:[#allocation22_spill] sm:$0xff] %v6092_v29  ;;  %3255 = vmatpush.msra.mxu3 %v2873_v42  ;;  %v6140_v28 = vadd.f32 1.0, %v4007_v12  ;;  %v2024_v6 = vsel %vm6134_vm12, %v5969_v13, %v2020_v18  ;;  %4014 = vpow2.f32 %v3770_v39  ;;  %v3771_v19 = vmul.f32 -1.442695, %v7908_v10  ;;  %v2872_v39 = vld [vmem:[%s4512_s7 + $0x110] sm:$0xff]  ;;  %v7927_v12 = vld [vmem:[#allocation41_spill] sm:$0xff] }
 0x254   : > { %vm6151_vm13 = vcmp.eq.f32.partialorder %v2040_v33, 8.507059e+37  ;;  %vm2037_vm14 = vweird.f32 %v6047_v44  ;;  %v2062_v13 = vmul.f32 %v6128_v15, %v6061_v46  ;;  %v2072_v18 = vand.u32 2147483648, %v6061_v46  ;;  %3029 = vmatpush.msra.mxu1 %v2872_v39 }
 0x255   : > { %v1245_v20 = vpop.f32.mrf.mxu2  ;;  %v1358_v34 = vpop.f32.mrf.mxu3  ;;  %4016 = vrcp.f32 %v6126_v37  ;;  %v2029_v33 = vsel %vm6108_vm9, %v2028_v63, %v2024_v6  ;;  %v2043_v56 = vor.u32 1.1754944e-38, %v2042_v25  ;;  %vm2051_vm15 = vweird.f32 %v6008_v59  ;;  %v7913_v6 = vld [vmem:[#allocation38_spill] sm:$0xff]  ;;  %vm6187_vm0 = vmor %vm2036_vm11, %vm2037_vm14 }
 0x256   : > { %v1359_v27 = vadd.f32 %v1358_v34, %v1245_v20  ;;  %v1022_v55 = vpop.f32.mrf.mxu0  ;;  %v1135_v8 = vpop.f32.mrf.mxu1  ;;  %v4179_v20 = vld [vmem:[#allocation3 + $0x198] sm:$0xff]  ;;  %4018 = vrcp.f32 %v6140_v28  ;;  %v2070_v63 = vand.u32 2147483647, %v6061_v46  ;;  %v3772_v1 = vmul.f32 -1.442695, %v7913_v6 }
 0x257   : > { %v1136_v50 = vadd.f32 %v1135_v8, %v1022_v55  ;;  %v6142_v34 = vpop.eup %4010  ;;  %v2048_v55 = vsub.f32 1.0, %v2047_v17  ;;  %v2055_v8 = vand.u32 2147483647, %v6008_v59  ;;  %v2035_v17 = vadd.f32 %v6047_v44, %v2034_v30 }
 0x258   : > { %v6149_v42 = vmul.f32 %v6027_v41, %v1359_v27  ;;  %v2840_v41 = vld [vmem:[%s4512_s7 + $0x10] sm:$0xff]  ;;  %v6171_v27 = vpop.eup %4012  ;;  %4020 = vpow2.f32 %v3771_v19  ;;  %v2087_v30 = vand.u32 2147483648, %v6064_v45  ;;  %v6181_v25 = vmul.f32 %v2029_v33, %v7845_v24 }
 0x259   : > { %1069 = vmatmul.f32.gmra.mxu0 %v4178_v35  ;;  %1182 = vmatmul.f32.gmra.mxu1 %v4179_v20  ;;  %v6156_v22 = vmul.f32 %v2664_v0, %v1136_v50  ;;  %v2077_v0 = vmul.f32 %v6142_v34, %v6064_v45  ;;  %v6174_v50 = vor.u32 1.1754944e-38, %v2057_v57  ;;  %v2049_v47 = vmul.f32 %v6094_v61, %v2048_v55 }
 0x25a   : > { %7909 = vst [vmem:[#allocation32_spill] sm:$0xff] %v6149_v42  ;;  %2916 = vmatpush.msra.mxu0 %v2840_v41  ;;  %1295 = vmatmul.f32.gmra.mxu2 %v4178_v35  ;;  %v2063_v35 = vsub.f32 1.0, %v2062_v13  ;;  %v6191_v19 = vor.u32 1.1754944e-38, %v2072_v18  ;;  %v2039_v29 = vsel %vm6187_vm0, %v6047_v44, %v2035_v17  ;;  %vm6196_vm1 = vcmp.eq.f32.partialorder %v2055_v8, 8.507059e+37  ;;  %v4180_v18 = vld [vmem:[#allocation3 + $0x1a0] sm:$0xff]  ;;  %v7919_v8 = vld [vmem:[#allocation39_spill] sm:$0xff] }
 0x25b   : > { %7912 = vst [vmem:[#allocation33_spill] sm:$0xff] %v6156_v22  ;;  %1408 = vmatmul.f32.gmra.mxu3 %v4179_v20  ;;  %v4015_v22 = vpop.eup %4014  ;;  %v2078_v33 = vsub.f32 1.0, %v2077_v0  ;;  %vm2081_vm2 = vweird.f32 %v6064_v45  ;;  %v2092_v4 = vmul.f32 %v6171_v27, %v6101_v49  ;;  %vm2052_vm3 = vweird.f32 %v6094_v61 }
 0x25c   : > { %vm2066_vm4 = vweird.f32 %v6061_v46  ;;  %v2085_v44 = vand.u32 2147483647, %v6064_v45  ;;  %v3773_v17 = vmul.f32 -1.442695, %v7919_v8  ;;  %4022 = vpow2.f32 %v3772_v1  ;;  %vm6233_vm6 = vmor %vm2051_vm15, %vm2052_vm3  ;;  %v7943_v46 = vld [vmem:[#allocation43_spill] sm:$0xff] }
 0x25d   : > { %v1248_v41 = vpop.f32.mrf.mxu2  ;;  %v1361_v39 = vpop.f32.mrf.mxu3  ;;  %v2044_v21 = vsel %vm6151_vm13, %v2043_v56, %v2039_v29  ;;  %v2064_v14 = vmul.f32 %v6128_v15, %v2063_v35  ;;  %vm2067_vm5 = vweird.f32 %v6128_v15  ;;  %vm6237_vm7 = vcmp.eq.f32.partialorder %v2070_v63, 8.507059e+37 }
 0x25e   : > { %v1362_v55 = vadd.f32 %v1361_v39, %v1248_v41  ;;  %v1025_v42 = vpop.f32.mrf.mxu0  ;;  %v1138_v20 = vpop.f32.mrf.mxu1  ;;  %v4181_v41 = vld [vmem:[#allocation3 + $0x1a8] sm:$0xff]  ;;  %vm2082_vm8 = vweird.f32 %v6142_v34  ;;  %4024 = vpow2.f32 %v3773_v17  ;;  %v3775_v56 = vmul.f32 -1.442695, %v7927_v12  ;;  %vm6277_vm11 = vmor %vm2066_vm4, %vm2067_vm5 }
 0x25f   : > { %v6203_v13 = vadd.f32 %v1138_v20, %v1025_v42  ;;  %v6205_v39 = vpop.eup %4016  ;;  %v2050_v42 = vadd.f32 %v6094_v61, %v2049_v47  ;;  %v6217_v20 = vor.u32 1.1754944e-38, %v2087_v30  ;;  %v2100_v47 = vand.u32 2147483647, %v6101_v49  ;;  %vm6294_vm12 = vmor %vm2081_vm2, %vm2082_vm8 }
 0x260   : > { %v6212_v0 = vmul.f32 %v6097_v9, %v1362_v55  ;;  %v6214_v57 = vpop.eup %4018  ;;  %v3774_v9 = vmul.f32 -1.442695, %v7922_v16  ;;  %v2079_v55 = vmul.f32 %v6142_v34, %v2078_v33  ;;  %v2102_v30 = vand.u32 2147483648, %v6101_v49 }
 0x261   : > { %7918 = vst [vmem:[#allocation25_spill] sm:$0xff] %v6203_v13  ;;  %1072 = vmatmul.f32.gmra.mxu0 %v4180_v18  ;;  %1185 = vmatmul.f32.gmra.mxu1 %v4181_v41  ;;  %v6219_v13 = vadd.f32 1.0, %v4015_v22  ;;  %v4021_v5 = vpop.eup %4020  ;;  %v2107_v1 = vmul.f32 %v6205_v39, %v6126_v37  ;;  %v6246_v59 = vmul.f32 %v2044_v21, %v7853_v51  ;;  %vm6251_vm9 = vcmp.eq.f32.partialorder %v2085_v44, 8.507059e+37  ;;  %v2839_v51 = vld [vmem:[%s4512_s7 + $0x8] sm:$0xff] }
 0x262   : > { %7920 = vst [vmem:[#allocation37_spill] sm:$0xff] %v6212_v0  ;;  %v2093_v0 = vsub.f32 1.0, %v2092_v4  ;;  %1298 = vmatmul.f32.gmra.mxu2 %v4180_v18  ;;  %v2054_v63 = vsel %vm6233_vm6, %v6094_v61, %v2050_v42  ;;  %vm2096_vm10 = vweird.f32 %v6101_v49  ;;  %v2122_v33 = vmul.f32 %v6214_v57, %v6140_v28  ;;  %v2871_v21 = vld [vmem:[%s4512_s7 + $0x108] sm:$0xff]  ;;  %v4023_v52 = vpop.eup %4022 }
 0x263   : > { %7921 = vst [vmem:[#allocation38_spill] sm:$0xff] %v6219_v13  ;;  %v6258_v4 = vadd.f32 1.0, %v4021_v5  ;;  %1411 = vmatmul.f32.gmra.mxu3 %v4181_v41  ;;  %v2065_v31 = vadd.f32 %v6128_v15, %v2064_v14  ;;  %v2117_v61 = vand.u32 2147483648, %v6126_v37  ;;  %4026 = vpow2.f32 %v3774_v9  ;;  %3143 = vmatpush.msra.mxu2 %v2839_v51 }
 0x264   : > { %3256 = vmatpush.msra.mxu3 %v2871_v21  ;;  %v2080_v60 = vadd.f32 %v6142_v34, %v2079_v55  ;;  %v2094_v5 = vmul.f32 %v6171_v27, %v2093_v0  ;;  %4028 = vrcp.f32 %v6219_v13  ;;  %v2059_v14 = vsel %vm6196_vm1, %v6174_v50, %v2054_v63  ;;  %v4025_v24 = vpop.eup %4024 }
 0x265   : > { %v1251_v18 = vpop.f32.mrf.mxu2  ;;  %v1364_v17 = vpop.f32.mrf.mxu3  ;;  %v2108_v9 = vsub.f32 1.0, %v2107_v1  ;;  %4030 = vpow2.f32 %v3775_v56  ;;  %v6281_v55 = vor.u32 1.1754944e-38, %v2102_v30  ;;  %vm2111_vm13 = vweird.f32 %v6126_v37  ;;  %v2870_v56 = vld [vmem:[%s4512_s7 + $0x100] sm:$0xff] }
 0x266   : > { %v1365_v44 = vadd.f32 %v1364_v17, %v1251_v18  ;;  %v1028_v42 = vpop.f32.mrf.mxu0  ;;  %v1141_v22 = vpop.f32.mrf.mxu1  ;;  %v2123_v17 = vsub.f32 1.0, %v2122_v33  ;;  %4032 = vrcp.f32 %v6258_v4  ;;  %v2115_v30 = vand.u32 2147483647, %v6126_v37  ;;  %3030 = vmatpush.msra.mxu1 %v2870_v56  ;;  %v7945_v56 = vld [vmem:[#allocation46_spill] sm:$0xff] }
 0x267   : > { %v1142_v41 = vadd.f32 %v1141_v22, %v1028_v42  ;;  %v6300_v1 = vadd.f32 1.0, %v4023_v52  ;;  %v2670_v63 = vmul.f32 %v2059_v14, %v4869_v7  ;;  %v2095_v45 = vadd.f32 %v6171_v27, %v2094_v5 }
 0x268   : > { %v6271_v18 = vmul.f32 %v6123_v23, %v1365_v44  ;;  %v2069_v23 = vsel %vm6277_vm11, %v6128_v15, %v2065_v31  ;;  %v2084_v31 = vsel %vm6294_vm12, %v6142_v34, %v2080_v60  ;;  %vm2097_vm14 = vweird.f32 %v6171_v27  ;;  %v7938_v60 = vld [vmem:[#allocation42_spill] sm:$0xff] }
 0x269   : > { %1075 = vmatmul.f32.gmra.mxu0 %v4182_v2  ;;  %1188 = vmatmul.f32.gmra.mxu1 %v4183_v32  ;;  %v6285_v50 = vmul.f32 %v6181_v25, %v1142_v41  ;;  %v2838_v25 = vld [vmem:[%s4512_s7] sm:$0xff]  ;;  %vm6310_vm15 = vcmp.eq.f32.partialorder %v2100_v47, 8.507059e+37  ;;  %vm2126_vm0 = vweird.f32 %v6140_v28  ;;  %v4027_v52 = vpop.eup %4026  ;;  %v2109_v33 = vmul.f32 %v6205_v39, %v2108_v9  ;;  %vm6336_vm1 = vmor %vm2096_vm10, %vm2097_vm14 }
 0x26a   : > { %7930 = vst [vmem:[#allocation39_spill] sm:$0xff] %v6271_v18  ;;  %2917 = vmatpush.msra.mxu0 %v2838_v25  ;;  %v6316_v7 = vor.u32 1.1754944e-38, %v2117_v61  ;;  %v2130_v51 = vand.u32 2147483647, %v6140_v28  ;;  %v3776_v34 = vmul.f32 -1.442695, %v7938_v60  ;;  %1301 = vmatmul.f32.gmra.mxu2 %v4182_v2  ;;  %v6320_v21 = vpop.eup %4028  ;;  %v2074_v47 = vsel %vm6237_vm7, %v6191_v19, %v2069_v23 }
 0x26b   : > { %7933 = vst [vmem:[#allocation40_spill] sm:$0xff] %v6285_v50  ;;  %v2124_v44 = vmul.f32 %v6214_v57, %v2123_v17  ;;  %v2132_v42 = vand.u32 2147483648, %v6140_v28  ;;  %v6327_v22 = vadd.f32 1.0, %v4025_v24  ;;  %1414 = vmatmul.f32.gmra.mxu3 %v4183_v32  ;;  %v4031_v41 = vpop.eup %4030  ;;  %v2089_v2 = vsel %vm6251_vm9, %v6217_v20, %v2084_v31  ;;  %v4184_v17 = vld [vmem:[#allocation3 + $0x1c0] sm:$0xff]  ;;  %v4185_v24 = vld [vmem:[#allocation3 + $0x1c8] sm:$0xff] }
 0x26c   : > { %vm2112_vm2 = vweird.f32 %v6205_v39  ;;  %4034 = vrcp.f32 %v6300_v1  ;;  %v6342_v9 = vpop.eup %4032  ;;  %v2099_v20 = vsel %vm6336_vm1, %v6171_v27, %v2095_v45  ;;  %vm6347_vm3 = vcmp.eq.f32.partialorder %v2115_v30, 8.507059e+37  ;;  %v7973_v50 = vld [vmem:[#allocation50_spill] sm:$0xff] }
 0x26d   : > { %v1254_v61 = vpop.f32.mrf.mxu2  ;;  %v1367_v5 = vpop.f32.mrf.mxu3  ;;  %vm2127_vm4 = vweird.f32 %v6214_v57  ;;  %v6352_v49 = vadd.f32 1.0, %v4027_v52  ;;  %v2110_v23 = vadd.f32 %v6205_v39, %v2109_v33  ;;  %4036 = vpow2.f32 %v3776_v34  ;;  %vm6376_vm5 = vmor %vm2111_vm13, %vm2112_vm2 }
 0x26e   : > { %v1368_v32 = vadd.f32 %v1367_v5, %v1254_v61  ;;  %v1031_v29 = vpop.f32.mrf.mxu0  ;;  %v1144_v14 = vpop.f32.mrf.mxu1  ;;  %v3777_v25 = vmul.f32 -1.442695, %v7943_v46  ;;  %v2125_v30 = vadd.f32 %v6214_v57, %v2124_v44  ;;  %4038 = vrcp.f32 %v6327_v22  ;;  %v7951_v5 = vld [vmem:[#allocation47_spill] sm:$0xff]  ;;  %vm6396_vm7 = vmor %vm2126_vm0, %vm2127_vm4 }
 0x26f   : > { %v1145_v0 = vadd.f32 %v1144_v14, %v1031_v29  ;;  %v3778_v31 = vmul.f32 -1.442695, %v7945_v56  ;;  %v2137_v52 = vmul.f32 %v6320_v21, %v6219_v13  ;;  %v2147_v61 = vand.u32 2147483648, %v6219_v13 }
 0x270   : > { %v6357_v27 = vmul.f32 %v6246_v59, %v1368_v32  ;;  %v2152_v33 = vmul.f32 %v6342_v9, %v6258_v4  ;;  %v6369_v34 = vadd.f32 1.0, %v4031_v41  ;;  %v2671_v59 = vmul.f32 %v2074_v47, %v7866_v43 }
 0x271   : > { %1078 = vmatmul.f32.gmra.mxu0 %v4184_v17  ;;  %1191 = vmatmul.f32.gmra.mxu1 %v4185_v24  ;;  %v6362_v45 = vmul.f32 %v2670_v63, %v1145_v0  ;;  %vm6380_vm6 = vcmp.eq.f32.partialorder %v2130_v51, 8.507059e+37  ;;  %4040 = vrcp.f32 %v6352_v49  ;;  %v3779_v19 = vmul.f32 -1.442695, %v7951_v5 }
 0x272   : > { %7944 = vst [vmem:[#allocation41_spill] sm:$0xff] %v6357_v27  ;;  %v6386_v41 = vpop.eup %4034  ;;  %v2672_v43 = vmul.f32 %v2089_v2, %v7871_v3  ;;  %v2104_v37 = vsel %vm6310_vm15, %v6281_v55, %v2099_v20  ;;  %v2133_v47 = vor.u32 1.1754944e-38, %v2132_v42  ;;  %4042 = vpow2.f32 %v3777_v25  ;;  %1304 = vmatmul.f32.gmra.mxu2 %v4184_v17  ;;  %v4187_v25 = vld [vmem:[#allocation3 + $0x1d8] sm:$0xff] }
 0x273   : > { %7946 = vst [vmem:[#allocation42_spill] sm:$0xff] %v6362_v45  ;;  %v2114_v32 = vsel %vm6376_vm5, %v6205_v39, %v2110_v23  ;;  %v2129_v3 = vsel %vm6396_vm7, %v6214_v57, %v2125_v30  ;;  %4044 = vpow2.f32 %v3778_v31  ;;  %1417 = vmatmul.f32.gmra.mxu3 %v4185_v24  ;;  %v4037_v28 = vpop.eup %4036  ;;  %v2138_v15 = vsub.f32 1.0, %v2137_v52  ;;  %v4186_v23 = vld [vmem:[#allocation3 + $0x1d0] sm:$0xff]  ;;  %v4191_v45 = vld [vmem:[#allocation3 + $0x1f8] sm:$0xff] }
 0x274   : > { %v6407_v2 = vor.u32 1.1754944e-38, %v2147_v61  ;;  %v2153_v29 = vsub.f32 1.0, %v2152_v33  ;;  %4046 = vrcp.f32 %v6369_v34  ;;  %v6410_v20 = vpop.eup %4038  ;;  %v6413_v39 = vmul.f32 %v2104_v37, %v7878_v36 }
 0x275   : > { %v1257_v42 = vpop.f32.mrf.mxu2  ;;  %v1370_v14 = vpop.f32.mrf.mxu3  ;;  %v2167_v57 = vmul.f32 %v6386_v41, %v6300_v1  ;;  %4048 = vpow2.f32 %v3779_v19  ;;  %v2119_v30 = vsel %vm6347_vm3, %v6316_v7, %v2114_v32  ;;  %v2134_v31 = vsel %vm6380_vm6, %v2133_v47, %v2129_v3 }
 0x276   : > { %7954 = vst [vmem:[#allocation43_spill] sm:$0xff] %v6407_v2  ;;  %v1371_v0 = vadd.f32 %v1370_v14, %v1257_v42  ;;  %v1034_v17 = vpop.f32.mrf.mxu0  ;;  %v1147_v24 = vpop.f32.mrf.mxu1  ;;  %v2162_v36 = vand.u32 2147483648, %v6258_v4  ;;  %v2160_v33 = vand.u32 2147483647, %v6258_v4  ;;  %v2177_v44 = vand.u32 2147483648, %v6300_v1 }
 0x277   : > { %v1148_v52 = vadd.f32 %v1147_v24, %v1034_v17  ;;  %v6423_v61 = vpop.eup %4040  ;;  %v6427_v19 = vadd.f32 1.0, %v4037_v28  ;;  %v6432_v35 = vmul.f32 %v6320_v21, %v2138_v15  ;;  %v2154_v7 = vmul.f32 %v6342_v9, %v2153_v29 }
 0x278   : > { %v6429_v37 = vmul.f32 %v2671_v59, %v1371_v0  ;;  %v4043_v51 = vpop.eup %4042  ;;  %v2182_v63 = vmul.f32 %v6410_v20, %v6327_v22  ;;  %v2674_v3 = vmul.f32 %v2119_v30, %v7888_v53  ;;  %v6441_v42 = vmul.f32 %v2134_v31, %v7890_v11 }
 0x279   : > { %1081 = vmatmul.f32.gmra.mxu0 %v4186_v23  ;;  %1194 = vmatmul.f32.gmra.mxu1 %v4187_v25  ;;  %v6437_v47 = vmul.f32 %v2672_v43, %v1148_v52  ;;  %v4045_v32 = vpop.eup %4044  ;;  %vm2156_vm8 = vweird.f32 %v6258_v4  ;;  %v2168_v59 = vsub.f32 1.0, %v2167_v57  ;;  %v2163_v15 = vor.u32 1.1754944e-38, %v2162_v36 }
 0x27a   : > { %7955 = vst [vmem:[#allocation46_spill] sm:$0xff] %v6429_v37  ;;  %v6444_v28 = vpop.eup %4046  ;;  %vm2171_vm9 = vweird.f32 %v6300_v1  ;;  %v2192_v29 = vand.u32 2147483648, %v6327_v22  ;;  %v2197_v43 = vmul.f32 %v6423_v61, %v6352_v49  ;;  %1307 = vmatmul.f32.gmra.mxu2 %v4186_v23  ;;  %vm6450_vm10 = vcmp.eq.f32.partialorder %v2160_v33, 8.507059e+37 }
 0x27b   : > { %7956 = vst [vmem:[#allocation47_spill] sm:$0xff] %v6437_v47  ;;  %v4049_v14 = vpop.eup %4048  ;;  %v2175_v11 = vand.u32 2147483647, %v6300_v1  ;;  %v6455_v0 = vor.u32 1.1754944e-38, %v2177_v44  ;;  %v2190_v57 = vand.u32 2147483647, %v6327_v22  ;;  %4050 = vrcp.f32 %v6427_v19  ;;  %1420 = vmatmul.f32.gmra.mxu3 %v4187_v25 }
 0x27c   : > { %v2155_v17 = vadd.f32 %v6342_v9, %v2154_v7  ;;  %vm2157_vm11 = vweird.f32 %v6342_v9  ;;  %v2183_v24 = vsub.f32 1.0, %v2182_v63  ;;  %v6461_v23 = vadd.f32 1.0, %v4043_v51  ;;  %v4188_v25 = vld [vmem:[#allocation3 + $0x1e0] sm:$0xff]  ;;  %v4189_v7 = vld [vmem:[#allocation3 + $0x1e8] sm:$0xff] }
 0x27d   : > { %v1260_v30 = vpop.f32.mrf.mxu2  ;;  %v1373_v31 = vpop.f32.mrf.mxu3  ;;  %v2169_v36 = vmul.f32 %v6386_v41, %v2168_v59  ;;  %v2212_v52 = vmul.f32 %v6444_v28, %v6369_v34  ;;  %v6466_v33 = vadd.f32 1.0, %v4045_v32  ;;  %v6468_v47 = vor.u32 1.1754944e-38, %v2192_v29  ;;  %vm6476_vm12 = vmor %vm2156_vm8, %vm2157_vm11 }
 0x27e   : > { %v1374_v44 = vadd.f32 %v1373_v31, %v1260_v30  ;;  %v1037_v55 = vpop.f32.mrf.mxu0  ;;  %v1150_v2 = vpop.f32.mrf.mxu1  ;;  %v2198_v51 = vsub.f32 1.0, %v2197_v43  ;;  %v6470_v63 = vadd.f32 1.0, %v4049_v14  ;;  %vm2172_vm13 = vweird.f32 %v6386_v41  ;;  %v7965_v31 = vld [vmem:[#allocation48_spill] sm:$0xff] }
 0x27f   : > { %v1151_v37 = vadd.f32 %v1150_v2, %v1037_v55  ;;  %vm6481_vm14 = vcmp.eq.f32.partialorder %v2175_v11, 8.507059e+37  ;;  %vm2186_vm15 = vweird.f32 %v6327_v22  ;;  %vm2201_vm0 = vweird.f32 %v6352_v49  ;;  %vm6521_vm3 = vmor %vm2171_vm9, %vm2172_vm13 }
 0x280   : > { %v2205_v55 = vand.u32 2147483647, %v6352_v49  ;;  %v6489_v2 = vmul.f32 %v6413_v39, %v1374_v44  ;;  %v2159_v4 = vsel %vm6476_vm12, %v6342_v9, %v2155_v17  ;;  %v2184_v29 = vmul.f32 %v6410_v20, %v2183_v24  ;;  %v7966_v9 = vld [vmem:[#allocation49_spill] sm:$0xff] }
 0x281   : > { %1084 = vmatmul.f32.gmra.mxu0 %v4188_v25  ;;  %1197 = vmatmul.f32.gmra.mxu1 %v4189_v7  ;;  %4052 = vrcp.f32 %v6461_v23  ;;  %v6496_v43 = vmul.f32 %v2674_v3, %v1151_v37  ;;  %v6498_v14 = vpop.eup %4050  ;;  %v2170_v11 = vadd.f32 %v6386_v41, %v2169_v36  ;;  %v2213_v30 = vsub.f32 1.0, %v2212_v52 }
 0x282   : > { %7963 = vst [vmem:[#allocation70_spill] sm:$0xff] %v6489_v2  ;;  %4054 = vrcp.f32 %v6466_v33  ;;  %v3781_v39 = vmul.f32 -1.442695, %v7965_v31  ;;  %v2199_v44 = vmul.f32 %v6423_v61, %v2198_v51  ;;  %v2207_v32 = vand.u32 2147483648, %v6352_v49  ;;  %1310 = vmatmul.f32.gmra.mxu2 %v4188_v25  ;;  %v4190_v2 = vld [vmem:[#allocation3 + $0x1f0] sm:$0xff] }
 0x283   : > { %7964 = vst [vmem:[#allocation71_spill] sm:$0xff] %v6496_v43  ;;  %4056 = vrcp.f32 %v6470_v63  ;;  %v3782_v17 = vmul.f32 -1.442695, %v7966_v9  ;;  %vm2187_vm1 = vweird.f32 %v6410_v20  ;;  %vm6508_vm2 = vcmp.eq.f32.partialorder %v2190_v57, 8.507059e+37  ;;  %1423 = vmatmul.f32.gmra.mxu3 %v4189_v7 }
 0x284   : > { %v2220_v3 = vand.u32 2147483647, %v6369_v34  ;;  %v2222_v24 = vand.u32 2147483648, %v6369_v34  ;;  %v2237_v36 = vand.u32 2147483648, %v6427_v19  ;;  %v2164_v52 = vsel %vm6450_vm10, %v2163_v15, %v2159_v4  ;;  %vm6559_vm7 = vmor %vm2186_vm15, %vm2187_vm1 }
 0x285   : > { %v2185_v57 = vadd.f32 %v6410_v20, %v2184_v29  ;;  %vm2202_vm4 = vweird.f32 %v6423_v61  ;;  %vm6527_vm5 = vcmp.eq.f32.partialorder %v2205_v55, 8.507059e+37  ;;  %vm2216_vm6 = vweird.f32 %v6369_v34  ;;  %v1263_v53 = vpop.f32.mrf.mxu2  ;;  %v1376_v7 = vpop.f32.mrf.mxu3 }
 0x286   : > { %v2227_v15 = vmul.f32 %v6498_v14, %v6427_v19  ;;  %v2174_v1 = vsel %vm6521_vm3, %v6386_v41, %v2170_v11  ;;  %v2214_v4 = vmul.f32 %v6444_v28, %v2213_v30  ;;  %4058 = vpow2.f32 %v3781_v39  ;;  %v1040_v43 = vpop.f32.mrf.mxu0  ;;  %v1153_v55 = vpop.f32.mrf.mxu1  ;;  %vm6578_vm11 = vmor %vm2201_vm0, %vm2202_vm4 }
 0x287   : > { %v1377_v29 = vadd.f32 %v1376_v7, %v1263_v53  ;;  %v6538_v13 = vpop.eup %4052  ;;  %v2200_v27 = vadd.f32 %v6423_v61, %v2199_v44  ;;  %4060 = vpow2.f32 %v3782_v17  ;;  %v3783_v18 = vmul.f32 -1.442695, %v7973_v50  ;;  %v7978_v17 = vld [vmem:[#allocation51_spill] sm:$0xff]  ;;  %v7981_v7 = vld [vmem:[#allocation52_spill] sm:$0xff] }
 0x288   : > { %v6542_v9 = vadd.f32 %v1153_v55, %v1040_v43  ;;  %v6544_v41 = vpop.eup %4054  ;;  %v2208_v11 = vor.u32 1.1754944e-38, %v2207_v32  ;;  %v2223_v30 = vor.u32 1.1754944e-38, %v2222_v24  ;;  %v2235_v39 = vand.u32 2147483647, %v6427_v19 }
 0x289   : > { %1087 = vmatmul.f32.gmra.mxu0 %v4190_v2  ;;  %1200 = vmatmul.f32.gmra.mxu1 %v4191_v45  ;;  %v6548_v25 = vmul.f32 %v6441_v42, %v1377_v29  ;;  %v6550_v53 = vpop.eup %4056  ;;  %v2179_v44 = vsel %vm6481_vm14, %v6455_v0, %v2174_v1  ;;  %vm2217_vm8 = vweird.f32 %v6444_v28  ;;  %vm6564_vm9 = vcmp.eq.f32.partialorder %v2220_v3, 8.507059e+37  ;;  %v7982_v29 = vld [vmem:[#allocation16_spill] sm:$0xff] }
 0x28a   : > { %v2228_v42 = vsub.f32 1.0, %v2227_v15  ;;  %vm2231_vm10 = vweird.f32 %v6427_v19  ;;  %v3784_v59 = vmul.f32 -1.442695, %v7978_v17  ;;  %v2677_v0 = vmul.f32 %v2164_v52, %v7908_v10  ;;  %1313 = vmatmul.f32.gmra.mxu2 %v4190_v2  ;;  %vm6609_vm13 = vmor %vm2216_vm6, %vm2217_vm8 }
 0x28b   : > { %v2189_v22 = vsel %vm6559_vm7, %v6410_v20, %v2185_v57  ;;  %v6582_v24 = vor.u32 1.1754944e-38, %v2237_v36  ;;  %v2242_v15 = vmul.f32 %v6538_v13, %v6461_v23  ;;  %v2204_v10 = vsel %vm6578_vm11, %v6423_v61, %v2200_v27  ;;  %1426 = vmatmul.f32.gmra.mxu3 %v4191_v45 }
 0x28c   : > { %v2215_v52 = vadd.f32 %v6444_v28, %v2214_v4  ;;  %v2257_v20 = vmul.f32 %v6544_v41, %v6466_v33  ;;  %4062 = vpow2.f32 %v3783_v18  ;;  %v4059_v49 = vpop.eup %4058  ;;  %v2678_v57 = vmul.f32 %v2179_v44, %v7913_v6 }
 0x28d   : > { %v2272_v36 = vmul.f32 %v6550_v53, %v6470_v63  ;;  %v3785_v1 = vmul.f32 -1.442695, %v7981_v7  ;;  %v2710_v55 = vmul.f32 %v7982_v29, %v5579_v58  ;;  %v4061_v27 = vpop.eup %4060  ;;  %v2194_v61 = vsel %vm6508_vm2, %v6468_v47, %v2189_v22  ;;  %v1266_v6 = vpop.f32.mrf.mxu2 }
 0x28e   : > { %v2229_v18 = vmul.f32 %v6498_v14, %v2228_v42  ;;  %vm2232_vm12 = vweird.f32 %v6498_v14  ;;  %4064 = vpow2.f32 %v3784_v59  ;;  %v1379_v2 = vpop.f32.mrf.mxu3  ;;  %v2209_v4 = vsel %vm6527_vm5, %v2208_v11, %v2204_v10  ;;  %v1043_v44 = vpop.f32.mrf.mxu0 }
 0x28f   : > { %v2243_v45 = vsub.f32 1.0, %v2242_v15  ;;  %v2252_v47 = vand.u32 2147483648, %v6461_v23  ;;  %v1380_v37 = vadd.f32 %v1379_v2, %v1266_v6  ;;  %v1156_v43 = vpop.f32.mrf.mxu1  ;;  %v2219_v51 = vsel %vm6609_vm13, %v6444_v28, %v2215_v52  ;;  %vm6648_vm1 = vmor %vm2231_vm10, %vm2232_vm12  ;;  %v7992_v2 = vld [vmem:[#allocation54_spill] sm:$0xff] }
 0x290   : > { %v2258_v11 = vsub.f32 1.0, %v2257_v20  ;;  %v6618_v42 = vadd.f32 1.0, %v4059_v49  ;;  %v1157_v34 = vadd.f32 %v1156_v43, %v1043_v44  ;;  %vm2246_vm14 = vweird.f32 %v6461_v23 }
 0x291   : > { %2918 = vmatmul.f32.vlgmr.msra.gmra.mxu0 %v2710_v55  ;;  %3031 = vmatmul.f32.vlgmr.msra.gmra.mxu1 %v5712_v38  ;;  %v2273_v59 = vsub.f32 1.0, %v2272_v36  ;;  %v6621_v22 = vadd.f32 1.0, %v4061_v27  ;;  %4066 = vpow2.f32 %v3785_v1  ;;  %v6623_v3 = vmul.f32 %v2677_v0, %v1380_v37  ;;  %v7990_v27 = vld [vmem:[#allocation66_spill] sm:$0xff] }
 0x292   : > { %v4063_v15 = vpop.eup %4062  ;;  %v2679_v10 = vmul.f32 %v2194_v61, %v7919_v8  ;;  %v2230_v29 = vadd.f32 %v6498_v14, %v2229_v18  ;;  %v2250_v6 = vand.u32 2147483647, %v6461_v23  ;;  %v6628_v28 = vmul.f32 %v2678_v57, %v1157_v34  ;;  %v7987_v57 = vld [vmem:[#allocation53_spill] sm:$0xff]  ;;  %3144 = vmatmul.f32.vlgmr.msra.gmra.mxu2 %v2710_v55  ;;  %v7991_v61 = vld [vmem:[#allocation19_spill] sm:$0xff] }
 0x293   : > { %v2680_v52 = vmul.f32 %v2209_v4, %v7922_v16  ;;  %v2224_v20 = vsel %vm6564_vm9, %v2223_v30, %v2219_v51  ;;  %vm6633_vm15 = vcmp.eq.f32.partialorder %v2235_v39, 8.507059e+37  ;;  %v2244_v0 = vmul.f32 %v6538_v13, %v2243_v45  ;;  %3257 = vmatmul.f32.vlgmr.msra.gmra.mxu3 %v5712_v38 }
 0x294   : > { %v6638_v36 = vor.u32 1.1754944e-38, %v2252_v47  ;;  %v4065_v8 = vpop.eup %4064  ;;  %vm2247_vm0 = vweird.f32 %v6538_v13  ;;  %v2259_v1 = vmul.f32 %v6544_v41, %v2258_v11  ;;  %4068 = vrcp.f32 %v6618_v42 }
 0x295   : > { %v3786_v16 = vmul.f32 -1.442695, %v7987_v57  ;;  %v2274_v39 = vmul.f32 %v6550_v53, %v2273_v59  ;;  %4070 = vrcp.f32 %v6621_v22  ;;  %v6654_v32 = vadd.f32 1.0, %v4063_v15  ;;  %v1269_v58 = vpop.f32.mrf.mxu2  ;;  %v7995_v15 = vld [vmem:[#allocation55_spill] sm:$0xff]  ;;  %vm6687_vm6 = vmor %vm2246_vm14, %vm2247_vm0 }
 0x296   : > { %v2712_v18 = vmul.f32 %v7991_v61, %v7990_v27  ;;  %v2234_v55 = vsel %vm6648_vm1, %v6498_v14, %v2230_v29  ;;  %vm2261_vm2 = vweird.f32 %v6466_v33  ;;  %v2267_v19 = vand.u32 2147483648, %v6466_v33  ;;  %v1382_v45 = vpop.f32.mrf.mxu3  ;;  %v1046_v43 = vpop.f32.mrf.mxu0 }
 0x297   : > { %v3787_v4 = vmul.f32 -1.442695, %v7992_v2  ;;  %v4067_v47 = vpop.eup %4066  ;;  %v2245_v37 = vadd.f32 %v6538_v13, %v2244_v0  ;;  %vm6666_vm3 = vcmp.eq.f32.partialorder %v2250_v6, 8.507059e+37  ;;  %vm2262_vm4 = vweird.f32 %v6544_v41  ;;  %v1159_v51 = vpop.f32.mrf.mxu1 }
 0x298   : > { %v6671_v38 = vadd.f32 1.0, %v4065_v8  ;;  %v1383_v14 = vadd.f32 %v1382_v45, %v1269_v58  ;;  %v2260_v11 = vadd.f32 %v6544_v41, %v2259_v1  ;;  %vm2277_vm5 = vweird.f32 %v6550_v53  ;;  %vm6702_vm7 = vmor %vm2261_vm2, %vm2262_vm4 }
 0x299   : > { %2921 = vmatmul.f32.gmra.mxu0 %v2712_v18  ;;  %3034 = vmatmul.f32.gmra.mxu1 %v5791_v62  ;;  %4072 = vpow2.f32 %v3786_v16  ;;  %v1160_v34 = vadd.f32 %v1159_v51, %v1046_v43  ;;  %v2275_v59 = vadd.f32 %v6550_v53, %v2274_v39  ;;  %v3788_v29 = vmul.f32 -1.442695, %v7995_v15 }
 0x29a   : > { %4074 = vrcp.f32 %v6654_v32  ;;  %v6679_v6 = vmul.f32 %v2679_v10, %v1383_v14  ;;  %v6681_v0 = vpop.eup %4068  ;;  %v2282_v1 = vand.u32 2147483648, %v6470_v63  ;;  %v6692_v16 = vadd.f32 1.0, %v4067_v47  ;;  %3147 = vmatmul.f32.gmra.mxu2 %v2712_v18 }
 0x29b   : > { %4076 = vpow2.f32 %v3787_v4  ;;  %v6694_v30 = vmul.f32 %v2680_v52, %v1160_v34  ;;  %v6696_v39 = vpop.eup %4070  ;;  %v2265_v23 = vand.u32 2147483647, %v6466_v33  ;;  %vm2276_vm8 = vweird.f32 %v6470_v63  ;;  %3260 = vmatmul.f32.gmra.mxu3 %v5791_v62 }
 0x29c   : > { %v2280_v27 = vand.u32 2147483647, %v6470_v63  ;;  %4078 = vrcp.f32 %v6671_v38  ;;  %v2681_v52 = vmul.f32 %v2224_v20, %v7927_v12  ;;  %v2239_v61 = vsel %vm6633_vm15, %v6582_v24, %v2234_v55  ;;  %vm6719_vm9 = vmor %vm2276_vm8, %vm2277_vm5  ;;  %v8002_v24 = vld [vmem:[#allocation17_spill] sm:$0xff] }
 0x29d   : > { %v2249_v4 = vsel %vm6687_vm6, %v6538_v13, %v2245_v37  ;;  %v2268_v58 = vor.u32 1.1754944e-38, %v2267_v19  ;;  %v2264_v12 = vsel %vm6702_vm7, %v6544_v41, %v2260_v11  ;;  %v2279_v63 = vsel %vm6719_vm9, %v6550_v53, %v2275_v59  ;;  %v1272_v41 = vpop.f32.mrf.mxu2 }
 0x29e   : > { %4080 = vpow2.f32 %v3788_v29  ;;  %v2714_v13 = vmul.f32 %v8002_v24, %v5795_v54  ;;  %v2283_v49 = vor.u32 1.1754944e-38, %v2282_v1  ;;  %v2302_v55 = vmul.f32 %v6681_v0, %v6618_v42  ;;  %v1385_v19 = vpop.f32.mrf.mxu3  ;;  %v1049_v62 = vpop.f32.mrf.mxu0 }
 0x29f   : > { %v4073_v20 = vpop.eup %4072  ;;  %v2317_v18 = vmul.f32 %v6696_v39, %v6621_v22  ;;  %4082 = vrcp.f32 %v6692_v16  ;;  %v2682_v53 = vmul.f32 %v2239_v61, %v7938_v60  ;;  %vm2266_vm10 = vcmp.eq.f32.partialorder %v2265_v23, 8.507059e+37  ;;  %v1162_v47 = vpop.f32.mrf.mxu1 }
 0x2a0   : > { %v6737_v45 = vpop.eup %4074  ;;  %vm2281_vm11 = vcmp.eq.f32.partialorder %v2280_v27, 8.507059e+37  ;;  %v1386_v54 = vadd.f32 %v1385_v19, %v1272_v41  ;;  %v2254_v14 = vsel %vm6666_vm3, %v6638_v36, %v2249_v4  ;;  %v2269_v43 = vsel %vm2266_vm10, %v2268_v58, %v2264_v12 }
 0x2a1   : > { %2924 = vmatmul.f32.gmra.mxu0 %v2714_v13  ;;  %3037 = vmatmul.f32.gmra.mxu1 %v5874_v48  ;;  %v4077_v37 = vpop.eup %4076  ;;  %v2284_v51 = vsel %vm2281_vm11, %v2283_v49, %v2279_v63  ;;  %v1163_v11 = vadd.f32 %v1162_v47, %v1049_v62  ;;  %v6748_v60 = vadd.f32 %v6320_v21, %v6432_v35  ;;  %v2312_v59 = vand.u32 2147483648, %v6618_v42  ;;  %v8005_v63 = vld [vmem:[#allocation18_spill] sm:$0xff] }
 0x2a2   : > { %v6744_v34 = vpop.eup %4078  ;;  %v2327_v29 = vand.u32 2147483648, %v6621_v22  ;;  %v6752_v8 = vmul.f32 %v2681_v52, %v1386_v54  ;;  %v2303_v1 = vsub.f32 1.0, %v2302_v55  ;;  %v2318_v10 = vsub.f32 1.0, %v2317_v18  ;;  %3150 = vmatmul.f32.gmra.mxu2 %v2714_v13 }
 0x2a3   : > { %v2332_v36 = vmul.f32 %v6737_v45, %v6654_v32  ;;  %v6756_v44 = vmul.f32 %v2682_v53, %v1163_v11  ;;  %v2683_v27 = vmul.f32 %v2254_v14, %v7943_v46  ;;  %v2684_v61 = vmul.f32 %v2269_v43, %v7945_v56  ;;  %3263 = vmatmul.f32.gmra.mxu3 %v5874_v48  ;;  %v8006_v53 = vld [vmem:[#allocation56_spill] sm:$0xff] }
 0x2a4   : > { %8003 = vst [vmem:[#allocation48_spill] sm:$0xff] %v6752_v8  ;;  %v4081_v23 = vpop.eup %4080  ;;  %v6761_v35 = vmul.f32 %v2284_v51, %v7951_v5  ;;  %v6763_v4 = vadd.f32 1.0, %v4073_v20  ;;  %v2310_v52 = vand.u32 2147483647, %v6618_v42  ;;  %vm2321_vm12 = vweird.f32 %v6621_v22 }
 0x2a5   : > { %8004 = vst [vmem:[#allocation50_spill] sm:$0xff] %v6756_v44  ;;  %v6765_v58 = vpop.eup %4082  ;;  %v2347_v33 = vmul.f32 %v6744_v34, %v6671_v38  ;;  %v6771_v12 = vadd.f32 1.0, %v4077_v37  ;;  %vm2306_vm13 = vweird.f32 %v6618_v42  ;;  %v6774_v46 = vor.u32 1.1754944e-38, %v2312_v59  ;;  %v1275_v13 = vpop.f32.mrf.mxu2  ;;  %v8007_v37 = vld [vmem:[#allocation57_spill] sm:$0xff] }
 0x2a6   : > { %v2325_v56 = vand.u32 2147483647, %v6621_v22  ;;  %v6777_v5 = vor.u32 1.1754944e-38, %v2327_v29  ;;  %v2716_v24 = vmul.f32 %v8005_v63, %v5878_v40  ;;  %v2304_v20 = vmul.f32 %v6681_v0, %v2303_v1  ;;  %v1388_v41 = vpop.f32.mrf.mxu3  ;;  %v1052_v40 = vpop.f32.mrf.mxu0 }
 0x2a7   : > { %v2319_v49 = vmul.f32 %v6696_v39, %v2318_v10  ;;  %v2333_v55 = vsub.f32 1.0, %v2332_v36  ;;  %v6784_v18 = vadd.f32 1.0, %v4081_v23  ;;  %v2362_v19 = vmul.f32 %v6765_v58, %v6692_v16  ;;  %v1165_v47 = vpop.f32.mrf.mxu1 }
 0x2a8   : > { %4084 = vrcp.f32 %v6763_v4  ;;  %v3789_v54 = vmul.f32 -1.442695, %v8006_v53  ;;  %v1389_v62 = vadd.f32 %v1388_v41, %v1275_v13  ;;  %v2348_v48 = vsub.f32 1.0, %v2347_v33  ;;  %v8015_v41 = vld [vmem:[#allocation64_spill] sm:$0xff] }
 0x2a9   : > { %2927 = vmatmul.f32.gmra.mxu0 %v2716_v24  ;;  %3040 = vmatmul.f32.gmra.mxu1 %v5919_v26  ;;  %4086 = vrcp.f32 %v6771_v12  ;;  %v3790_v14 = vmul.f32 -1.442695, %v8007_v37  ;;  %v1166_v43 = vadd.f32 %v1165_v47, %v1052_v40  ;;  %vm6793_vm14 = vcmp.eq.f32.partialorder %v2310_v52, 8.507059e+37 }
 0x2aa   : > { %vm2336_vm15 = vweird.f32 %v6654_v32  ;;  %v2340_v11 = vand.u32 2147483647, %v6654_v32  ;;  %v2342_v59 = vand.u32 2147483648, %v6654_v32  ;;  %v6800_v29 = vmul.f32 %v2683_v27, %v1389_v62  ;;  %3153 = vmatmul.f32.gmra.mxu2 %v2716_v24 }
 0x2ab   : > { %vm2307_vm0 = vweird.f32 %v6681_v0  ;;  %vm6803_vm1 = vcmp.eq.f32.partialorder %v2325_v56, 8.507059e+37  ;;  %v2355_v10 = vand.u32 2147483647, %v6671_v38  ;;  %4088 = vrcp.f32 %v6784_v18  ;;  %3266 = vmatmul.f32.gmra.mxu3 %v5919_v26 }
 0x2ac   : > { %8010 = vst [vmem:[#allocation51_spill] sm:$0xff] %v6800_v29  ;;  %v6809_v36 = vmul.f32 %v2684_v61, %v1166_v43  ;;  %v2305_v23 = vadd.f32 %v6681_v0, %v2304_v20  ;;  %v2334_v52 = vmul.f32 %v6737_v45, %v2333_v55  ;;  %v2363_v33 = vsub.f32 1.0, %v2362_v19  ;;  %v8014_v20 = vld [vmem:[#allocation67_spill] sm:$0xff]  ;;  %vm6829_vm4 = vmor %vm2306_vm13, %vm2307_vm0 }
 0x2ad   : > { %4090 = vpow2.f32 %v3789_v54  ;;  %v2320_v27 = vadd.f32 %v6696_v39, %v2319_v49  ;;  %vm2322_vm2 = vweird.f32 %v6696_v39  ;;  %v2349_v56 = vmul.f32 %v6744_v34, %v2348_v48  ;;  %v8041_v49 = vld [vmem:[#allocation60_spill] sm:$0xff] }
 0x2ae   : > { %8013 = vst [vmem:[#allocation52_spill] sm:$0xff] %v6809_v36  ;;  %4092 = vpow2.f32 %v3790_v14  ;;  %v6816_v63 = vpop.eup %4084  ;;  %v2343_v13 = vor.u32 1.1754944e-38, %v2342_v59  ;;  %vm2351_vm3 = vweird.f32 %v6671_v38  ;;  %v2357_v61 = vand.u32 2147483648, %v6671_v38  ;;  %vm6852_vm9 = vmor %vm2321_vm12, %vm2322_vm2  ;;  %v1278_v14 = vpop.f32.mrf.mxu2  ;;  %v8025_v36 = vld [vmem:[#allocation58_spill] sm:$0xff] }
 0x2af   : > { %v2718_v55 = vmul.f32 %v8015_v41, %v8014_v20  ;;  %v6823_v19 = vpop.eup %4086  ;;  %vm2337_vm5 = vweird.f32 %v6737_v45  ;;  %vm6834_vm6 = vcmp.eq.f32.partialorder %v2340_v11, 8.507059e+37  ;;  %vm6838_vm7 = vcmp.eq.f32.partialorder %v2355_v10, 8.507059e+37  ;;  %v1391_v43 = vpop.f32.mrf.mxu3  ;;  %v8024_v11 = vld [vmem:[#allocation68_spill] sm:$0xff] }
 0x2b0   : > { %vm2366_vm8 = vweird.f32 %v6692_v16  ;;  %v2370_v26 = vand.u32 2147483647, %v6692_v16  ;;  %v2372_v42 = vand.u32 2147483648, %v6692_v16  ;;  %v2309_v62 = vsel %vm6829_vm4, %v6681_v0, %v2305_v23  ;;  %v1168_v20 = vpop.f32.mrf.mxu1  ;;  %vm6880_vm11 = vmor %vm2336_vm15, %vm2337_vm5 }
 0x2b1   : > { %v2335_v47 = vadd.f32 %v6737_v45, %v2334_v52  ;;  %vm2352_vm10 = vweird.f32 %v6744_v34  ;;  %v2364_v48 = vmul.f32 %v6765_v58, %v2363_v33  ;;  %2930 = vmatmul.f32.gmra.mxu0 %v2718_v55  ;;  %3043 = vmatmul.f32.gmra.mxu1 %v8024_v11  ;;  %v6860_v0 = vpop.eup %4088  ;;  %v2324_v22 = vsel %vm6852_vm9, %v6696_v39, %v2320_v27  ;;  %v1055_v52 = vpop.f32.mrf.mxu0  ;;  %v8042_v27 = vld [vmem:[#allocation61_spill] sm:$0xff] }
 0x2b2   : > { %v2350_v59 = vadd.f32 %v6744_v34, %v2349_v56  ;;  %v2377_v10 = vmul.f32 %v6816_v63, %v6763_v4  ;;  %v1392_v23 = vadd.f32 %v1391_v43, %v1278_v14  ;;  %v2358_v41 = vor.u32 1.1754944e-38, %v2357_v61  ;;  %v8029_v61 = vld [vmem:[#allocation59_spill] sm:$0xff]  ;;  %vm6898_vm12 = vmor %vm2351_vm3, %vm2352_vm10  ;;  %3156 = vmatmul.f32.gmra.mxu2 %v2718_v55 }
 0x2b3   : > { %v4091_v33 = vpop.eup %4090  ;;  %v2392_v24 = vmul.f32 %v6823_v19, %v6771_v12  ;;  %v3791_v29 = vmul.f32 -1.442695, %v8025_v36  ;;  %v6871_v44 = vadd.f32 %v1168_v20, %v1055_v52  ;;  %v2314_v39 = vsel %vm6793_vm14, %v6774_v46, %v2309_v62  ;;  %3269 = vmatmul.f32.gmra.mxu3 %v8024_v11  ;;  %v8040_v52 = vld [vmem:[#allocation20_spill] sm:$0xff] }
 0x2b4   : > { %v4093_v8 = vpop.eup %4092  ;;  %v2373_v56 = vor.u32 1.1754944e-38, %v2372_v42  ;;  %v3792_v40 = vmul.f32 -1.442695, %v8029_v61  ;;  %v6886_v14 = vmul.f32 %v6761_v35, %v1392_v23  ;;  %v2329_v43 = vsel %vm6803_vm1, %v6777_v5, %v2324_v22  ;;  %v8037_v23 = vld [vmem:[#allocation49_spill] sm:$0xff] }
 0x2b5   : > { %8026 = vst [vmem:[#allocation16_spill] sm:$0xff] %v6871_v44  ;;  %v2339_v46 = vsel %vm6880_vm11, %v6737_v45, %v2335_v47  ;;  %v2365_v51 = vadd.f32 %v6765_v58, %v2364_v48  ;;  %vm2367_vm13 = vweird.f32 %v6765_v58  ;;  %vm6904_vm14 = vcmp.eq.f32.partialorder %v2370_v26, 8.507059e+37  ;;  %v8035_v47 = vld [vmem:[#allocation69_spill] sm:$0xff]  ;;  %v8036_v26 = vld [vmem:[#allocation27_spill] sm:$0xff] }
 0x2b6   : > { %8030 = vst [vmem:[#allocation53_spill] sm:$0xff] %v6886_v14  ;;  %v2354_v45 = vsel %vm6898_vm12, %v6744_v34, %v2350_v59  ;;  %v2378_v5 = vsub.f32 1.0, %v2377_v10  ;;  %v2407_v38 = vmul.f32 %v6860_v0, %v6784_v18  ;;  %v6913_v1 = vadd.f32 1.0, %v4091_v33  ;;  %vm6924_vm15 = vmor %vm2366_vm8, %vm2367_vm13  ;;  %v1281_v16 = vpop.f32.mrf.mxu2 }
 0x2b7   : > { %v2393_v42 = vsub.f32 1.0, %v2392_v24  ;;  %v6915_v62 = vadd.f32 1.0, %v4093_v8  ;;  %4094 = vpow2.f32 %v3791_v29  ;;  %v2720_v48 = vmul.f32 %v8036_v26, %v8035_v47  ;;  %v1394_v10 = vpop.f32.mrf.mxu3 }
 0x2b8   : > { %v2687_v22 = vmul.f32 %v2314_v39, %v7965_v31  ;;  %v2688_v34 = vmul.f32 %v2329_v43, %v8037_v23  ;;  %v2385_v55 = vand.u32 2147483647, %v6763_v4  ;;  %4096 = vpow2.f32 %v3792_v40  ;;  %v8048_v23 = vld [vmem:[#allocation28_spill] sm:$0xff] }
 0x2b9   : > { %v2344_v8 = vsel %vm6834_vm6, %v2343_v13, %v2339_v46  ;;  %v2359_v29 = vsel %vm6838_vm7, %v2358_v41, %v2354_v45  ;;  %v2369_v31 = vsel %vm6924_vm15, %v6765_v58, %v2365_v51  ;;  %v2387_v11 = vand.u32 2147483648, %v6763_v4  ;;  %2933 = vmatmul.f32.gmra.mxu0 %v2720_v48  ;;  %3046 = vmatmul.f32.gmra.mxu1 %v8040_v52  ;;  %v1058_v54 = vpop.f32.mrf.mxu0  ;;  %v1171_v41 = vpop.f32.mrf.mxu1 }
 0x2ba   : > { %v2379_v20 = vmul.f32 %v6816_v63, %v2378_v5  ;;  %4098 = vrcp.f32 %v6913_v1  ;;  %v3793_v13 = vmul.f32 -1.442695, %v8041_v49  ;;  %v1395_v33 = vadd.f32 %v1394_v10, %v1281_v16  ;;  %3159 = vmatmul.f32.gmra.mxu2 %v2720_v48  ;;  %v8051_v10 = vld [vmem:[#allocation34_spill] sm:$0xff] }
 0x2bb   : > { %v2394_v24 = vmul.f32 %v6823_v19, %v2393_v42  ;;  %v2408_v39 = vsub.f32 1.0, %v2407_v38  ;;  %4100 = vrcp.f32 %v6915_v62  ;;  %v1172_v58 = vadd.f32 %v1171_v41, %v1058_v54  ;;  %3272 = vmatmul.f32.gmra.mxu3 %v8040_v52 }
 0x2bc   : > { %vm2381_vm0 = vweird.f32 %v6763_v4  ;;  %vm2382_vm1 = vweird.f32 %v6816_v63  ;;  %v3794_v40 = vmul.f32 -1.442695, %v8042_v27  ;;  %v6946_v43 = vmul.f32 %v2687_v22, %v1395_v33  ;;  %v8047_v22 = vld [vmem:[#allocation30_spill] sm:$0xff] }
 0x2bd   : > { %v4095_v46 = vpop.eup %4094  ;;  %v2689_v32 = vmul.f32 %v2344_v8, %v7973_v50  ;;  %v2690_v51 = vmul.f32 %v2359_v29, %v7978_v17  ;;  %vm6950_vm2 = vcmp.eq.f32.partialorder %v2385_v55, 8.507059e+37  ;;  %v2388_v5 = vor.u32 1.1754944e-38, %v2387_v11  ;;  %vm6981_vm5 = vmor %vm2381_vm0, %vm2382_vm1 }
 0x2be   : > { %8043 = vst [vmem:[#allocation66_spill] sm:$0xff] %v6946_v43  ;;  %v6954_v38 = vmul.f32 %v2688_v34, %v1172_v58  ;;  %v4097_v42 = vpop.eup %4096  ;;  %v2374_v47 = vsel %vm6904_vm14, %v2373_v56, %v2369_v31  ;;  %v2380_v26 = vadd.f32 %v6816_v63, %v2379_v20  ;;  %vm2396_vm3 = vweird.f32 %v6771_v12  ;;  %v1284_v16 = vpop.f32.mrf.mxu2  ;;  %v8054_v20 = vld [vmem:[#allocation62_spill] sm:$0xff] }
 0x2bf   : > { %vm2397_vm4 = vweird.f32 %v6823_v19  ;;  %v2395_v50 = vadd.f32 %v6823_v19, %v2394_v24  ;;  %v2409_v17 = vmul.f32 %v6860_v0, %v2408_v39  ;;  %4102 = vpow2.f32 %v3793_v13  ;;  %v1397_v33 = vpop.f32.mrf.mxu3  ;;  %v8055_v24 = vld [vmem:[#allocation13_spill] sm:$0xff] }
 0x2c0   : > { %8046 = vst [vmem:[#allocation19_spill] sm:$0xff] %v6954_v38  ;;  %v2722_v34 = vmul.f32 %v8048_v23, %v8047_v22  ;;  %v6966_v59 = vpop.eup %4098  ;;  %v2400_v56 = vand.u32 2147483647, %v6771_v12  ;;  %v2402_v35 = vand.u32 2147483648, %v6771_v12  ;;  %v6970_v55 = vadd.f32 1.0, %v4095_v46  ;;  %vm6997_vm7 = vmor %vm2396_vm3, %vm2397_vm4 }
 0x2c1   : > { %4104 = vpow2.f32 %v3794_v40  ;;  %v6972_v48 = vpop.eup %4100  ;;  %v6975_v8 = vmul.f32 %v2374_v47, %v7981_v7  ;;  %vm2411_vm6 = vweird.f32 %v6784_v18  ;;  %v2415_v31 = vand.u32 2147483647, %v6784_v18  ;;  %3049 = vmatmul.f32.gmra.mxu1 %v8051_v10  ;;  %v1061_v54 = vpop.f32.mrf.mxu0 }
 0x2c2   : > { %v6987_v11 = vadd.f32 1.0, %v4097_v42  ;;  %2936 = vmatmul.f32.gmra.mxu0 %v2722_v34  ;;  %v2384_v7 = vsel %vm6981_vm5, %v6816_v63, %v2380_v26  ;;  %vm2412_vm8 = vweird.f32 %v6860_v0  ;;  %v2417_v52 = vand.u32 2147483648, %v6784_v18  ;;  %v1174_v58 = vpop.f32.mrf.mxu1  ;;  %3162 = vmatmul.f32.gmra.mxu2 %v2722_v34  ;;  %v8063_v18 = vld [vmem:[#allocation29_spill] sm:$0xff]  ;;  %v8064_v34 = vld [vmem:[#allocation14_spill] sm:$0xff] }
 0x2c3   : > { %v3795_v13 = vmul.f32 -1.442695, %v8054_v20  ;;  %v2399_v63 = vsel %vm6997_vm7, %v6823_v19, %v2395_v50  ;;  %v2410_v41 = vadd.f32 %v6860_v0, %v2409_v17  ;;  %v3796_v12 = vmul.f32 -1.442695, %v8055_v24  ;;  %vm7023_vm10 = vmor %vm2411_vm6, %vm2412_vm8  ;;  %3275 = vmatmul.f32.gmra.mxu3 %v8051_v10 }
 0x2c4   : > { %v1398_v39 = vadd.f32 %v1397_v33, %v1284_v16  ;;  %v2422_v40 = vmul.f32 %v6966_v59, %v6913_v1  ;;  %v2437_v46 = vmul.f32 %v6972_v48, %v6915_v62  ;;  %4106 = vrcp.f32 %v6970_v55  ;;  %v8065_v33 = vld [vmem:[#allocation15_spill] sm:$0xff] }
 0x2c5   : > { %v1175_v42 = vadd.f32 %v1174_v58, %v1061_v54  ;;  %v4103_v47 = vpop.eup %4102  ;;  %vm2401_vm9 = vcmp.eq.f32.partialorder %v2400_v56, 8.507059e+37  ;;  %v2403_v26 = vor.u32 1.1754944e-38, %v2402_v35  ;;  %4108 = vrcp.f32 %v6987_v11  ;;  %v8062_v35 = vld [vmem:[#allocation31_spill] sm:$0xff] }
 0x2c6   : > { %v7015_v19 = vmul.f32 %v2689_v32, %v1398_v39  ;;  %v2389_v17 = vsel %vm6950_vm2, %v2388_v5, %v2384_v7  ;;  %vm7027_vm11 = vcmp.eq.f32.partialorder %v2415_v31, 8.507059e+37  ;;  %4110 = vpow2.f32 %v3795_v13 }
 0x2c7   : > { %v4105_v50 = vpop.eup %4104  ;;  %v7031_v56 = vmul.f32 %v2690_v51, %v1175_v42  ;;  %v2404_v32 = vsel %vm2401_vm9, %v2403_v26, %v2399_v63  ;;  %v2414_v45 = vsel %vm7023_vm10, %v6860_v0, %v2410_v41  ;;  %v2418_v5 = vor.u32 1.1754944e-38, %v2417_v52  ;;  %v1287_v0 = vpop.f32.mrf.mxu2  ;;  %v8066_v52 = vld [vmem:[#allocation35_spill] sm:$0xff] }
 0x2c8   : > { %8056 = vst [vmem:[#allocation54_spill] sm:$0xff] %v7015_v19  ;;  %v2724_v29 = vmul.f32 %v8063_v18, %v8062_v35  ;;  %v2423_v16 = vsub.f32 1.0, %v2422_v40  ;;  %v2438_v31 = vsub.f32 1.0, %v2437_v46  ;;  %v7039_v7 = vadd.f32 1.0, %v4103_v47 }
 0x2c9   : > { %8061 = vst [vmem:[#allocation55_spill] sm:$0xff] %v7031_v56  ;;  %4112 = vpow2.f32 %v3796_v12  ;;  %v2692_v51 = vmul.f32 %v2389_v17, %v7987_v57  ;;  %v7042_v4 = vadd.f32 1.0, %v4105_v50  ;;  %v3797_v13 = vmul.f32 -1.442695, %v8064_v34  ;;  %3052 = vmatmul.f32.gmra.mxu1 %v8066_v52  ;;  %v1400_v12 = vpop.f32.mrf.mxu3  ;;  %v1064_v39 = vpop.f32.mrf.mxu0  ;;  %v8080_v56 = vld [vmem:[#allocation23_spill] sm:$0xff] }
 0x2ca   : > { %v3798_v54 = vmul.f32 -1.442695, %v8065_v33  ;;  %2939 = vmatmul.f32.gmra.mxu0 %v2724_v29  ;;  %v7047_v63 = vpop.eup %4106  ;;  %v7050_v10 = vmul.f32 %v2404_v32, %v7992_v2  ;;  %vm2426_vm12 = vweird.f32 %v6913_v1  ;;  %v2430_v41 = vand.u32 2147483647, %v6913_v1  ;;  %v1177_v2 = vpop.f32.mrf.mxu1  ;;  %3165 = vmatmul.f32.gmra.mxu2 %v2724_v29 }
 0x2cb   : > { %v2432_v57 = vand.u32 2147483648, %v6913_v1  ;;  %v7055_v58 = vpop.eup %4108  ;;  %v2419_v40 = vsel %vm7027_vm11, %v2418_v5, %v2414_v45  ;;  %v2445_v46 = vand.u32 2147483647, %v6915_v62  ;;  %v2447_v42 = vand.u32 2147483648, %v6915_v62  ;;  %3278 = vmatmul.f32.gmra.mxu3 %v8066_v52  ;;  %v8087_v1 = vld [vmem:[#allocation24_spill] sm:$0xff] }
 0x2cc   : > { %v1401_v47 = vadd.f32 %v1400_v12, %v1287_v0  ;;  %v4111_v26 = vpop.eup %4110  ;;  %v2424_v50 = vmul.f32 %v6966_v59, %v2423_v16  ;;  %v2439_v17 = vmul.f32 %v6972_v48, %v2438_v31  ;;  %4114 = vrcp.f32 %v7039_v7  ;;  %v8086_v31 = vld [vmem:[#allocation37_spill] sm:$0xff] }
 0x2cd   : > { %v1178_v22 = vadd.f32 %v1177_v2, %v1064_v39  ;;  %vm2441_vm13 = vweird.f32 %v6915_v62  ;;  %v2452_v23 = vmul.f32 %v7047_v63, %v6970_v55  ;;  %4116 = vrcp.f32 %v7042_v4 }
 0x2ce   : > { %v7069_v32 = vmul.f32 %v6975_v8, %v1401_v47  ;;  %v2694_v5 = vmul.f32 %v2419_v40, %v7995_v15  ;;  %v2433_v35 = vor.u32 1.1754944e-38, %v2432_v57  ;;  %v2467_v18 = vmul.f32 %v7055_v58, %v6987_v11 }
 0x2cf   : > { %v4113_v45 = vpop.eup %4112  ;;  %v7074_v16 = vmul.f32 %v2692_v51, %v1178_v22  ;;  %vm2427_vm14 = vweird.f32 %v6966_v59  ;;  %vm7077_vm15 = vcmp.eq.f32.partialorder %v2430_v41, 8.507059e+37  ;;  %vm7081_vm0 = vcmp.eq.f32.partialorder %v2445_v46, 8.507059e+37  ;;  %v1290_v40 = vpop.f32.mrf.mxu2  ;;  %v8073_v46 = vld [vmem:[#allocation22_spill] sm:$0xff] }
 0x2d0   : > { %8067 = vst [vmem:[#allocation17_spill] sm:$0xff] %v7069_v32  ;;  %v2448_v8 = vor.u32 1.1754944e-38, %v2447_v42  ;;  %v7085_v12 = vadd.f32 1.0, %v4111_v26  ;;  %4118 = vpow2.f32 %v3797_v13  ;;  %v2425_v15 = vadd.f32 %v6966_v59, %v2424_v50  ;;  %v8074_v13 = vld [vmem:[#allocation32_spill] sm:$0xff]  ;;  %vm7103_vm2 = vmor %vm2426_vm12, %vm2427_vm14 }
 0x2d1   : > { %8068 = vst [vmem:[#allocation18_spill] sm:$0xff] %v7074_v16  ;;  %v2440_v29 = vadd.f32 %v6972_v48, %v2439_v17  ;;  %vm2442_vm1 = vweird.f32 %v6972_v48  ;;  %4120 = vpow2.f32 %v3798_v54  ;;  %v2453_v51 = vsub.f32 1.0, %v2452_v23  ;;  %3055 = vmatmul.f32.gmra.mxu1 %v8074_v13  ;;  %v1403_v26 = vpop.f32.mrf.mxu3  ;;  %v1067_v50 = vpop.f32.mrf.mxu0  ;;  %v8079_v23 = vld [vmem:[#allocation63_spill] sm:$0xff] }
 0x2d2   : > { %v2460_v41 = vand.u32 2147483647, %v6970_v55  ;;  %v2462_v57 = vand.u32 2147483648, %v6970_v55  ;;  %v7093_v39 = vadd.f32 1.0, %v4113_v45  ;;  %2942 = vmatmul.f32.gmra.mxu0 %v8073_v46  ;;  %v7097_v52 = vpop.eup %4114  ;;  %v2468_v42 = vsub.f32 1.0, %v2467_v18  ;;  %vm7116_vm4 = vmor %vm2441_vm13, %vm2442_vm1  ;;  %v1180_v16 = vpop.f32.mrf.mxu1  ;;  %3168 = vmatmul.f32.gmra.mxu2 %v8073_v46 }
 0x2d3   : > { %vm2471_vm3 = vweird.f32 %v6987_v11  ;;  %v2475_v47 = vand.u32 2147483647, %v6987_v11  ;;  %v2477_v2 = vand.u32 2147483648, %v6987_v11  ;;  %v7110_v17 = vpop.eup %4116  ;;  %vm2456_vm5 = vweird.f32 %v6970_v55  ;;  %3281 = vmatmul.f32.gmra.mxu3 %v8074_v13  ;;  %v8100_v55 = vld [vmem:[#allocation65_spill] sm:$0xff] }
 0x2d4   : > { %v2492_v22 = vand.u32 2147483648, %v7039_v7  ;;  %4122 = vrcp.f32 %v7085_v12  ;;  %v3799_v45 = vmul.f32 -1.442695, %v8079_v23  ;;  %v1404_v18 = vadd.f32 %v1403_v26, %v1290_v40 }
 0x2d5   : > { %v2429_v32 = vsel %vm7103_vm2, %v6966_v59, %v2425_v15  ;;  %v2444_v62 = vsel %vm7116_vm4, %v6972_v48, %v2440_v29  ;;  %v3800_v19 = vmul.f32 -1.442695, %v8080_v56  ;;  %v1181_v38 = vadd.f32 %v1180_v16, %v1067_v50 }
 0x2d6   : > { %v4119_v43 = vpop.eup %4118  ;;  %v2454_v44 = vmul.f32 %v7047_v63, %v2453_v51  ;;  %v2482_v14 = vmul.f32 %v7097_v52, %v7039_v7  ;;  %4124 = vrcp.f32 %v7093_v39  ;;  %v7136_v40 = vmul.f32 %v7050_v10, %v1404_v18 }
 0x2d7   : > { %v4121_v54 = vpop.eup %4120  ;;  %v2463_v59 = vor.u32 1.1754944e-38, %v2462_v57  ;;  %v2469_v15 = vmul.f32 %v7055_v58, %v2468_v42  ;;  %v2497_v48 = vmul.f32 %v7110_v17, %v7042_v4  ;;  %v7141_v29 = vmul.f32 %v2694_v5, %v1181_v38 }
 0x2d8   : > { %vm7144_vm6 = vcmp.eq.f32.partialorder %v2460_v41, 8.507059e+37  ;;  %v2478_v51 = vor.u32 1.1754944e-38, %v2477_v2  ;;  %v2490_v26 = vand.u32 2147483647, %v7039_v7  ;;  %v7149_v10 = vor.u32 1.1754944e-38, %v2492_v22 }
 0x2d9   : > { %4126 = vpow2.f32 %v3799_v45  ;;  %v2434_v57 = vsel %vm7077_vm15, %v2433_v35, %v2429_v32  ;;  %v2449_v38 = vsel %vm7081_vm0, %v2448_v8, %v2444_v62  ;;  %vm7156_vm7 = vcmp.eq.f32.partialorder %v2475_v47, 8.507059e+37  ;;  %v1293_v32 = vpop.f32.mrf.mxu2  ;;  %v8085_v35 = vld [vmem:[#allocation33_spill] sm:$0xff]  ;;  %3058 = vmatmul.f32.gmra.mxu1 %v8086_v31  ;;  %v1406_v8 = vpop.f32.mrf.mxu3 }
 0x2da   : > { %v7160_v41 = vadd.f32 1.0, %v4119_v43  ;;  %4128 = vpow2.f32 %v3800_v19  ;;  %v7162_v46 = vpop.eup %4122  ;;  %v2455_v42 = vadd.f32 %v7047_v63, %v2454_v44  ;;  %vm2457_vm8 = vweird.f32 %v7047_v63  ;;  %2945 = vmatmul.f32.gmra.mxu0 %v8085_v35  ;;  %v1070_v47 = vpop.f32.mrf.mxu0  ;;  %3171 = vmatmul.f32.gmra.mxu2 %v8085_v35 }
 0x2db   : > { %v2483_v13 = vsub.f32 1.0, %v2482_v14  ;;  %v7166_v2 = vadd.f32 1.0, %v4121_v54  ;;  %v2470_v0 = vadd.f32 %v7055_v58, %v2469_v15  ;;  %vm2472_vm9 = vweird.f32 %v7055_v58  ;;  %v1183_v18 = vpop.f32.mrf.mxu1  ;;  %vm7183_vm11 = vmor %vm2456_vm5, %vm2457_vm8  ;;  %3284 = vmatmul.f32.gmra.mxu3 %v8086_v31 }
 0x2dc   : > { %v2498_v43 = vsub.f32 1.0, %v2497_v48  ;;  %v2505_v19 = vand.u32 2147483647, %v7042_v4  ;;  %v7173_v44 = vpop.eup %4124  ;;  %v2695_v14 = vmul.f32 %v2434_v57, %v8006_v53  ;;  %v2696_v50 = vmul.f32 %v2449_v38, %v8007_v37  ;;  %v8090_v53 = vld [vmem:[#allocation26_spill] sm:$0xff]  ;;  %vm7198_vm12 = vmor %vm2471_vm3, %vm2472_vm9 }
 0x2dd   : > { %vm2486_vm10 = vweird.f32 %v7039_v7  ;;  %v3801_v22 = vmul.f32 -1.442695, %v8087_v1  ;;  %v1407_v45 = vadd.f32 %v1406_v8, %v1293_v32  ;;  %v2512_v54 = vmul.f32 %v7162_v46, %v7085_v12 }
 0x2de   : > { %4130 = vrcp.f32 %v7160_v41  ;;  %v3802_v37 = vmul.f32 -1.442695, %v8090_v53  ;;  %v1184_v15 = vadd.f32 %v1183_v18, %v1070_v47  ;;  %v2459_v57 = vsel %vm7183_vm11, %v7047_v63, %v2455_v42 }
 0x2df   : > { %v4127_v48 = vpop.eup %4126  ;;  %v2484_v38 = vmul.f32 %v7097_v52, %v2483_v13  ;;  %4132 = vrcp.f32 %v7166_v2  ;;  %v7204_v32 = vmul.f32 %v2695_v14, %v1407_v45  ;;  %v2474_v47 = vsel %vm7198_vm12, %v7055_v58, %v2470_v0  ;;  %v8095_v45 = vld [vmem:[#allocation25_spill] sm:$0xff]  ;;  %v8096_v58 = vld [vmem:[#allocation36_spill] sm:$0xff] }
 0x2e0   : > { %v4129_v8 = vpop.eup %4128  ;;  %v2499_v63 = vmul.f32 %v7110_v17, %v2498_v43  ;;  %v2527_v11 = vmul.f32 %v7173_v44, %v7093_v39  ;;  %v7212_v42 = vmul.f32 %v2696_v50, %v1184_v15  ;;  %vm7215_vm13 = vcmp.eq.f32.partialorder %v2490_v26, 8.507059e+37  ;;  %v8097_v15 = vld [vmem:[#allocation39_spill] sm:$0xff] }
 0x2e1   : > { %vm2501_vm14 = vweird.f32 %v7042_v4  ;;  %v2507_v14 = vand.u32 2147483648, %v7042_v4  ;;  %4134 = vpow2.f32 %v3801_v22  ;;  %v2730_v0 = vmul.f32 %v8096_v58, %v8095_v45  ;;  %v1296_v62 = vpop.f32.mrf.mxu2  ;;  %3061 = vmatmul.f32.gmra.mxu1 %v8097_v15  ;;  %v1409_v5 = vpop.f32.mrf.mxu3 }
 0x2e2   : > { %v2464_v43 = vsel %vm7144_vm6, %v2463_v59, %v2459_v57  ;;  %v2513_v50 = vsub.f32 1.0, %v2512_v54  ;;  %v7226_v18 = vadd.f32 1.0, %v4127_v48  ;;  %4136 = vpow2.f32 %v3802_v37  ;;  %v1073_v54 = vpop.f32.mrf.mxu0 }
 0x2e3   : > { %v2479_v26 = vsel %vm7156_vm7, %v2478_v51, %v2474_v47  ;;  %v2485_v35 = vadd.f32 %v7097_v52, %v2484_v38  ;;  %vm2487_vm15 = vweird.f32 %v7097_v52  ;;  %v7232_v22 = vadd.f32 1.0, %v4129_v8  ;;  %2948 = vmatmul.f32.gmra.mxu0 %v2730_v0  ;;  %v1186_v47 = vpop.f32.mrf.mxu1  ;;  %3174 = vmatmul.f32.gmra.mxu2 %v2730_v0 }
 0x2e4   : > { %v7235_v31 = vpop.eup %4130  ;;  %v2500_v59 = vadd.f32 %v7110_v17, %v2499_v63  ;;  %vm2502_vm0 = vweird.f32 %v7110_v17  ;;  %vm7239_vm1 = vcmp.eq.f32.partialorder %v2505_v19, 8.507059e+37  ;;  %v2528_v51 = vsub.f32 1.0, %v2527_v11  ;;  %vm7253_vm2 = vmor %vm2486_vm10, %vm2487_vm15  ;;  %3287 = vmatmul.f32.gmra.mxu3 %v8097_v15  ;;  %v8106_v15 = vld [vmem:[#allocation41_spill] sm:$0xff]  ;;  %v8107_v19 = vld [vmem:[#allocation38_spill] sm:$0xff] }
 0x2e5   : > { %v7243_v37 = vpop.eup %4132  ;;  %v2697_v48 = vmul.f32 %v2464_v43, %v8025_v36  ;;  %v2522_v57 = vand.u32 2147483648, %v7085_v12  ;;  %v3803_v38 = vmul.f32 -1.442695, %v8100_v55  ;;  %v1410_v8 = vadd.f32 %v1409_v5, %v1296_v62  ;;  %vm7266_vm3 = vmor %vm2501_vm14, %vm2502_vm0 }
 0x2e6   : > { %v2698_v63 = vmul.f32 %v2479_v26, %v8029_v61  ;;  %v2514_v11 = vmul.f32 %v7162_v46, %v2513_v50  ;;  %4138 = vrcp.f32 %v7226_v18  ;;  %v1187_v36 = vadd.f32 %v1186_v47, %v1073_v54 }
 0x2e7   : > { %v4135_v45 = vpop.eup %4134  ;;  %v2489_v58 = vsel %vm7253_vm2, %v7097_v52, %v2485_v35  ;;  %v2542_v7 = vmul.f32 %v7235_v31, %v7160_v41  ;;  %4140 = vrcp.f32 %v7232_v22  ;;  %v7273_v43 = vmul.f32 %v2697_v48, %v1410_v8  ;;  %v8105_v8 = vld [vmem:[#allocation40_spill] sm:$0xff] }
 0x2e8   : > { %v4137_v50 = vpop.eup %4136  ;;  %v2504_v52 = vsel %vm7266_vm3, %v7110_v17, %v2500_v59  ;;  %v2529_v26 = vmul.f32 %v7173_v44, %v2528_v51  ;;  %v2557_v4 = vmul.f32 %v7243_v37, %v7166_v2  ;;  %v7281_v35 = vmul.f32 %v2698_v63, %v1187_v36 }
 0x2e9   : > { %v2508_v62 = vor.u32 1.1754944e-38, %v2507_v14  ;;  %vm2516_vm4 = vweird.f32 %v7085_v12  ;;  %v2520_v5 = vand.u32 2147483647, %v7085_v12  ;;  %4142 = vpow2.f32 %v3803_v38  ;;  %v1299_v38 = vpop.f32.mrf.mxu2  ;;  %3064 = vmatmul.f32.gmra.mxu1 %v8106_v15  ;;  %v1412_v16 = vpop.f32.mrf.mxu3 }
 0x2ea   : > { %v2494_v17 = vsel %vm7215_vm13, %v7149_v10, %v2489_v58  ;;  %v2515_v59 = vadd.f32 %v7162_v46, %v2514_v11  ;;  %vm2517_vm5 = vweird.f32 %v7162_v46  ;;  %v7291_v51 = vadd.f32 1.0, %v4135_v45  ;;  %v1076_v63 = vpop.f32.mrf.mxu0 }
 0x2eb   : > { %v2509_v14 = vsel %vm7239_vm1, %v2508_v62, %v2504_v52  ;;  %v2523_v0 = vor.u32 1.1754944e-38, %v2522_v57  ;;  %v2543_v54 = vsub.f32 1.0, %v2542_v7  ;;  %v7295_v48 = vadd.f32 1.0, %v4137_v50  ;;  %2951 = vmatmul.f32.gmra.mxu0 %v8105_v8  ;;  %vm7313_vm10 = vmor %vm2516_vm4, %vm2517_vm5  ;;  %v1189_v7 = vpop.f32.mrf.mxu1  ;;  %3177 = vmatmul.f32.gmra.mxu2 %v8105_v8 }
 0x2ec   : > { %v7299_v13 = vpop.eup %4138  ;;  %v2530_v10 = vadd.f32 %v7173_v44, %v2529_v26  ;;  %vm2531_vm6 = vweird.f32 %v7093_v39  ;;  %vm2532_vm7 = vweird.f32 %v7173_v44  ;;  %v2558_v47 = vsub.f32 1.0, %v2557_v4  ;;  %3290 = vmatmul.f32.gmra.mxu3 %v8106_v15 }
 0x2ed   : > { %v7304_v57 = vpop.eup %4140  ;;  %vm2141_vm8 = vweird.f32 %v8107_v19  ;;  %vm2142_vm9 = vweird.f32 %v6320_v21  ;;  %v2699_v11 = vmul.f32 %v2494_v17, %v8041_v49  ;;  %v2535_v45 = vand.u32 2147483647, %v7093_v39  ;;  %vm7328_vm11 = vmor %vm2531_vm6, %vm2532_vm7 }
 0x2ee   : > { %v2537_v58 = vand.u32 2147483648, %v7093_v39  ;;  %v1413_v61 = vadd.f32 %v1412_v16, %v1299_v38  ;;  %v2700_v50 = vmul.f32 %v2509_v14, %v8042_v27  ;;  %v2519_v49 = vsel %vm7313_vm10, %v7162_v46, %v2515_v59  ;;  %vm7397_vm4 = vmor %vm2141_vm8, %vm2142_vm9 }
 0x2ef   : > { %4144 = vrcp.f32 %v7291_v51  ;;  %v1190_v52 = vadd.f32 %v1189_v7, %v1076_v63  ;;  %v4143_v12 = vpop.eup %4142  ;;  %v2544_v4 = vmul.f32 %v7235_v31, %v2543_v54  ;;  %v2572_v27 = vmul.f32 %v7299_v13, %v7226_v18  ;;  %v8112_v63 = vld [vmem:[#allocation42_spill] sm:$0xff] }
 0x2f0   : > { %4146 = vrcp.f32 %v7295_v48  ;;  %v7336_v46 = vmul.f32 %v2699_v11, %v1413_v61  ;;  %v2534_v62 = vsel %vm7328_vm11, %v7173_v44, %v2530_v10  ;;  %v2559_v17 = vmul.f32 %v7243_v37, %v2558_v47  ;;  %v8113_v11 = vld [vmem:[#allocation46_spill] sm:$0xff] }
 0x2f1   : > { %v2587_v39 = vmul.f32 %v7304_v57, %v7232_v22  ;;  %v7344_v59 = vmul.f32 %v2700_v50, %v1190_v52  ;;  %vm2521_vm12 = vcmp.eq.f32.partialorder %v2520_v5, 8.507059e+37  ;;  %vm2536_vm13 = vcmp.eq.f32.partialorder %v2535_v45, 8.507059e+37  ;;  %v1302_v5 = vpop.f32.mrf.mxu2  ;;  %3067 = vmatmul.f32.gmra.mxu1 %v8113_v11  ;;  %v1415_v45 = vpop.f32.mrf.mxu3 }
 0x2f2   : > { %v2538_v14 = vor.u32 1.1754944e-38, %v2537_v58  ;;  %v2552_v54 = vand.u32 2147483648, %v7160_v41  ;;  %v2524_v38 = vsel %vm2521_vm12, %v2523_v0, %v2519_v49  ;;  %vm2546_vm14 = vweird.f32 %v7160_v41  ;;  %v1079_v58 = vpop.f32.mrf.mxu0 }
 0x2f3   : > { %v2550_v44 = vand.u32 2147483647, %v7160_v41  ;;  %v7351_v10 = vadd.f32 1.0, %v4143_v12  ;;  %v2545_v16 = vadd.f32 %v7235_v31, %v2544_v4  ;;  %vm2547_vm15 = vweird.f32 %v7235_v31  ;;  %2954 = vmatmul.f32.gmra.mxu0 %v8112_v63  ;;  %v1192_v12 = vpop.f32.mrf.mxu1  ;;  %3180 = vmatmul.f32.gmra.mxu2 %v8112_v63 }
 0x2f4   : > { %v2539_v47 = vsel %vm2536_vm13, %v2538_v14, %v2534_v62  ;;  %v2573_v8 = vsub.f32 1.0, %v2572_v27  ;;  %v2560_v0 = vadd.f32 %v7243_v37, %v2559_v17  ;;  %vm2561_vm0 = vweird.f32 %v7166_v2  ;;  %vm7371_vm2 = vmor %vm2546_vm14, %vm2547_vm15  ;;  %3293 = vmatmul.f32.gmra.mxu3 %v8113_v11 }
 0x2f5   : > { %v7357_v36 = vpop.eup %4144  ;;  %vm2562_vm1 = vweird.f32 %v7243_v37  ;;  %v2588_v15 = vsub.f32 1.0, %v2587_v39  ;;  %v2701_v7 = vmul.f32 %v2524_v38, %v8054_v20  ;;  %v2553_v50 = vor.u32 1.1754944e-38, %v2552_v54 }
 0x2f6   : > { %v7362_v61 = vpop.eup %4146  ;;  %v2567_v49 = vand.u32 2147483648, %v7166_v2  ;;  %v1416_v52 = vadd.f32 %v1415_v45, %v1302_v5  ;;  %v2702_v26 = vmul.f32 %v2539_v47, %v8055_v24  ;;  %v2565_v27 = vand.u32 2147483647, %v7166_v2  ;;  %vm7384_vm3 = vmor %vm2561_vm0, %vm2562_vm1  ;;  %v8124_v5 = vld [vmem:[#allocation45_spill] sm:$0xff] }
 0x2f7   : > { %4148 = vrcp.f32 %v7351_v10  ;;  %v1193_v20 = vadd.f32 %v1192_v12, %v1079_v58  ;;  %v2549_v62 = vsel %vm7371_vm2, %v7235_v31, %v2545_v16  ;;  %v2574_v41 = vmul.f32 %v7299_v13, %v2573_v8  ;;  %v8123_v8 = vld [vmem:[#allocation44_spill] sm:$0xff] }
 0x2f8   : > { %v2602_v17 = vmul.f32 %v7357_v36, %v7291_v51  ;;  %v7391_v39 = vmul.f32 %v2701_v7, %v1416_v52  ;;  %v8120_v2 = vand.u32 2147483647, %v8107_v19  ;;  %v2564_v54 = vsel %vm7384_vm3, %v7243_v37, %v2560_v0  ;;  %v8125_v7 = vld [vmem:[#allocation47_spill] sm:$0xff]  ;;  %v8126_v52 = vld [vmem:[#allocation70_spill] sm:$0xff] }
 0x2f9   : > { %v2589_v38 = vmul.f32 %v7304_v57, %v2588_v15  ;;  %v2617_v47 = vmul.f32 %v7362_v61, %v7295_v48  ;;  %v7413_v16 = vmul.f32 %v2702_v26, %v1193_v20  ;;  %v2144_v19 = vsel %vm7397_vm4, %v6320_v21, %v6748_v60  ;;  %v1305_v60 = vpop.f32.mrf.mxu2  ;;  %3070 = vmatmul.f32.gmra.mxu1 %v8126_v52 }
 0x2fa   : > { %vm7403_vm5 = vcmp.eq.f32.partialorder %v8120_v2, 8.507059e+37  ;;  %v7422_v45 = vadd.f32 %v8124_v5, %v8123_v8  ;;  %vm2551_vm6 = vcmp.eq.f32.partialorder %v2550_v44, 8.507059e+37  ;;  %v2568_v37 = vor.u32 1.1754944e-38, %v2567_v49  ;;  %v1418_v49 = vpop.f32.mrf.mxu3  ;;  %v1082_v12 = vpop.f32.mrf.mxu0 }
 0x2fb   : > { %v2554_v0 = vsel %vm2551_vm6, %v2553_v50, %v2549_v62  ;;  %vm2566_vm7 = vcmp.eq.f32.partialorder %v2565_v27, 8.507059e+37  ;;  %vm2576_vm8 = vweird.f32 %v7226_v18  ;;  %v2582_v15 = vand.u32 2147483648, %v7226_v18  ;;  %2957 = vmatmul.f32.gmra.mxu0 %v8125_v7  ;;  %v1195_v62 = vpop.f32.mrf.mxu1  ;;  %3183 = vmatmul.f32.gmra.mxu2 %v8125_v7 }
 0x2fc   : > { %v2569_v63 = vsel %vm2566_vm7, %v2568_v37, %v2564_v54  ;;  %v2575_v58 = vadd.f32 %v7299_v13, %v2574_v41  ;;  %vm2577_vm9 = vweird.f32 %v7299_v13  ;;  %v2603_v21 = vsub.f32 1.0, %v2602_v17  ;;  %3296 = vmatmul.f32.gmra.mxu3 %v8126_v52 }
 0x2fd   : > { %v7431_v44 = vpop.eup %4148  ;;  %v2590_v11 = vadd.f32 %v7304_v57, %v2589_v38  ;;  %vm2591_vm10 = vweird.f32 %v7232_v22  ;;  %vm2592_vm11 = vweird.f32 %v7304_v57  ;;  %v2618_v50 = vsub.f32 1.0, %v2617_v47  ;;  %vm7445_vm12 = vmor %vm2576_vm8, %vm2577_vm9 }
 0x2fe   : > { %v2703_v26 = vmul.f32 %v2554_v0, %v8064_v34  ;;  %v2580_v4 = vand.u32 2147483647, %v7226_v18  ;;  %v2597_v27 = vand.u32 2147483648, %v7232_v22  ;;  %v1419_v20 = vadd.f32 %v1418_v49, %v1305_v60  ;;  %vm7457_vm13 = vmor %vm2591_vm10, %vm2592_vm11  ;;  %v8132_v60 = vld [vmem:[#allocation71_spill] sm:$0xff] }
 0x2ff   : > { %v3780_v24 = vmul.f32 -1.442695, %v7422_v45  ;;  %v2704_v41 = vmul.f32 %v2569_v63, %v8065_v33  ;;  %v2595_v34 = vand.u32 2147483647, %v7232_v22  ;;  %v1196_v31 = vadd.f32 %v1195_v62, %v1082_v12  ;;  %v8131_v22 = vld [vmem:[#allocation43_spill] sm:$0xff] }
 0x300   : > { %v2579_v2 = vsel %vm7445_vm12, %v7299_v13, %v2575_v58  ;;  %v2604_v18 = vmul.f32 %v7357_v36, %v2603_v21  ;;  %v2632_v54 = vmul.f32 %v7431_v44, %v7351_v10  ;;  %v7464_v38 = vmul.f32 %v2703_v26, %v1419_v20 }
 0x301   : > { %v2583_v47 = vor.u32 1.1754944e-38, %v2582_v15  ;;  %v2594_v13 = vsel %vm7457_vm13, %v7304_v57, %v2590_v11  ;;  %v2619_v8 = vmul.f32 %v7362_v61, %v2618_v50  ;;  %v7470_v5 = vmul.f32 %v2704_v41, %v1196_v31  ;;  %v1308_v21 = vpop.f32.mrf.mxu2  ;;  %3073 = vmatmul.f32.gmra.mxu1 %v6548_v25 }
 0x302   : > { %v2149_v37 = vsel %vm7403_vm5, %v8131_v22, %v2144_v19  ;;  %vm2581_vm14 = vcmp.eq.f32.partialorder %v2580_v4, 8.507059e+37  ;;  %v2598_v0 = vor.u32 1.1754944e-38, %v2597_v27  ;;  %4150 = vpow2.f32 %v3780_v24  ;;  %v1421_v7 = vpop.f32.mrf.mxu3  ;;  %v1085_v52 = vpop.f32.mrf.mxu0 }
 0x303   : > { %v2584_v15 = vsel %vm2581_vm14, %v2583_v47, %v2579_v2  ;;  %vm2596_vm15 = vcmp.eq.f32.partialorder %v2595_v34, 8.507059e+37  ;;  %vm2606_vm0 = vweird.f32 %v7291_v51  ;;  %v2605_v63 = vadd.f32 %v7357_v36, %v2604_v18  ;;  %2960 = vmatmul.f32.gmra.mxu0 %v8132_v60  ;;  %v1198_v26 = vpop.f32.mrf.mxu1  ;;  %3186 = vmatmul.f32.gmra.mxu2 %v8132_v60 }
 0x304   : > { %v2599_v57 = vsel %vm2596_vm15, %v2598_v0, %v2594_v13  ;;  %vm2607_vm1 = vweird.f32 %v7357_v36  ;;  %v2633_v58 = vsub.f32 1.0, %v2632_v54  ;;  %v2612_v14 = vand.u32 2147483648, %v7291_v51  ;;  %3299 = vmatmul.f32.gmra.mxu3 %v6548_v25 }
 0x305   : > { %v2620_v19 = vadd.f32 %v7362_v61, %v2619_v8  ;;  %vm2621_vm2 = vweird.f32 %v7295_v48  ;;  %vm2622_vm3 = vweird.f32 %v7362_v61  ;;  %v2705_v11 = vmul.f32 %v2584_v15, %v8079_v23  ;;  %vm7494_vm4 = vmor %vm2606_vm0, %vm2607_vm1  ;;  %v8135_v23 = vld [vmem:[#allocation21_spill] sm:$0xff] }
 0x306   : > { %v2610_v50 = vand.u32 2147483647, %v7291_v51  ;;  %v2627_v49 = vand.u32 2147483648, %v7295_v48  ;;  %v1422_v12 = vadd.f32 %v1421_v7, %v1308_v21  ;;  %v2706_v4 = vmul.f32 %v2599_v57, %v8080_v56  ;;  %vm2623_vm5 = vmor %vm2621_vm2, %vm2622_vm3  ;;  %v2774_v7 = vld [vmem:[#allocation2 + $0xb0] sm:$0xff] }
 0x307   : > { %v2625_v20 = vand.u32 2147483647, %v7295_v48  ;;  %v1199_v62 = vadd.f32 %v1198_v26, %v1085_v52  ;;  %v2676_v24 = vmul.f32 %v2149_v37, %v8135_v23  ;;  %v2609_v41 = vsel %vm7494_vm4, %v7357_v36, %v2605_v63 }
 0x308   : > { %v2634_v56 = vmul.f32 %v7431_v44, %v2633_v58  ;;  %v7506_v17 = vmul.f32 %v2705_v11, %v1422_v12  ;;  %v4151_v51 = vpop.eup %4150  ;;  %v2613_v34 = vor.u32 1.1754944e-38, %v2612_v14  ;;  %v2624_v31 = vsel %vm2623_vm5, %v7362_v61, %v2620_v19 }
 0x309   : > { %v7509_v2 = vmul.f32 %v2706_v4, %v1199_v62  ;;  %vm2611_vm6 = vcmp.eq.f32.partialorder %v2610_v50, 8.507059e+37  ;;  %v2628_v33 = vor.u32 1.1754944e-38, %v2627_v49  ;;  %v2740_v18 = vmul.f32 %v2676_v24, %v6542_v9  ;;  %v1311_v47 = vpop.f32.mrf.mxu2  ;;  %3076 = vmatmul.f32.gmra.mxu1 %v6623_v3  ;;  %v8136_v4 = vld [vmem:[#allocation48_spill] sm:$0xff] }
 0x30a   : > { %v2614_v48 = vsel %vm2611_vm6, %v2613_v34, %v2609_v41  ;;  %vm2626_vm7 = vcmp.eq.f32.partialorder %v2625_v20, 8.507059e+37  ;;  %v2635_v54 = vadd.f32 %v7431_v44, %v2634_v56  ;;  %vm2637_vm8 = vweird.f32 %v7431_v44  ;;  %v1424_v8 = vpop.f32.mrf.mxu3  ;;  %v1088_v22 = vpop.f32.mrf.mxu0  ;;  %v2776_v24 = vld [vmem:[#allocation2 + $0xd8] sm:$0xff] }
 0x30b   : > { %v2629_v36 = vsel %vm2626_vm7, %v2628_v33, %v2624_v31  ;;  %2963 = vmatmul.f32.gmra.mxu0 %v2740_v18  ;;  %v7517_v61 = vadd.f32 1.0, %v4151_v51  ;;  %v2642_v13 = vand.u32 2147483648, %v7351_v10  ;;  %v2707_v9 = vmul.f32 %v2614_v48, %v8087_v1  ;;  %v1201_v0 = vpop.f32.mrf.mxu1  ;;  %3189 = vmatmul.f32.gmra.mxu2 %v2740_v18  ;;  %v8137_v31 = vld [vmem:[#allocation50_spill] sm:$0xff]  ;;  %v8138_v33 = vld [vmem:[#allocation51_spill] sm:$0xff]  ;;  %v2777_v18 = vld [vmem:[#allocation2 + $0x18] sm:$0xff] }
 0x30c   : > { %vm2636_vm9 = vweird.f32 %v7351_v10  ;;  %v2640_v25 = vand.u32 2147483647, %v7351_v10  ;;  %v1425_v37 = vadd.f32 %v1424_v8, %v1311_v47  ;;  %v2708_v15 = vmul.f32 %v2629_v36, %v8090_v53  ;;  %3302 = vmatmul.f32.gmra.mxu3 %v6623_v3 }
 0x30d   : > { %vm2638_vm10 = vmor %vm2636_vm9, %vm2637_vm8  ;;  %v1202_v57 = vadd.f32 %v1201_v0, %v1088_v22  ;;  %4152 = vrcp.f32 %v7517_v61  ;;  %v2643_v21 = vor.u32 1.1754944e-38, %v2642_v13  ;;  %vm2291_vm12 = vweird.f32 %v7517_v61  ;;  %v2778_v13 = vld [vmem:[#allocation2 + $0x50] sm:$0xff] }
 0x30e   : > { %v2639_v63 = vsel %vm2638_vm10, %v7431_v44, %v2635_v54  ;;  %v7525_v58 = vmul.f32 %v2707_v9, %v1425_v37  ;;  %vm2641_vm11 = vcmp.eq.f32.partialorder %v2640_v25, 8.507059e+37  ;;  %v2297_v8 = vand.u32 2147483648, %v7517_v61 }
 0x30f   : > { %v7528_v60 = vmul.f32 %v2708_v15, %v1202_v57  ;;  %v2644_v1 = vsel %vm2641_vm11, %v2643_v21, %v2639_v63  ;;  %v2295_v9 = vand.u32 2147483647, %v7517_v61  ;;  %v8139_v63 = vld [vmem:[#allocation52_spill] sm:$0xff]  ;;  %v8140_v21 = vld [vmem:[#allocation53_spill] sm:$0xff] }
 0x310   : > { %v2709_v44 = vmul.f32 %v2644_v1, %v8100_v55  ;;  %v2775_v55 = vld [vmem:[#allocation2 + $0x1b0] sm:$0xff]  ;;  %v2298_v15 = vor.u32 1.1754944e-38, %v2297_v8 }
 0x311   : > { %v1314_v10 = vpop.f32.mrf.mxu2  ;;  %3079 = vmatmul.f32.gmra.mxu1 %v6679_v6  ;;  %vm2296_vm15 = vcmp.eq.f32.partialorder %v2295_v9, 8.507059e+37  ;;  %v8145_v8 = vld [vmem:[#allocation55_spill] sm:$0xff]  ;;  %v2785_v9 = vld [vmem:[#allocation2 + $0x98] sm:$0xff] }
 0x312   : > { %v1427_v53 = vpop.f32.mrf.mxu3  ;;  %v2919_v14 = vpop.f32.mrf.mxu0 }
 0x313   : > { %2966 = vmatmul.f32.gmra.mxu0 %v6628_v28  ;;  %v1428_v19 = vadd.f32 %v1427_v53, %v1314_v10  ;;  %v3032_v52 = vpop.f32.mrf.mxu1  ;;  %v4153_v11 = vpop.eup %4152  ;;  %3192 = vmatmul.f32.gmra.mxu2 %v6628_v28  ;;  %v2779_v10 = vld [vmem:[#allocation2 + $0x168] sm:$0xff] }
 0x314   : > { %v3033_v50 = vadd.f32 %v3032_v52, %v2919_v14  ;;  %v2287_v3 = vmul.f32 %v4153_v11, %v7517_v61  ;;  %3305 = vmatmul.f32.gmra.mxu3 %v6679_v6  ;;  %vm2292_vm13 = vweird.f32 %v4153_v11 }
 0x315   : > { %v7534_v49 = vmul.f32 %v2709_v44, %v1428_v19  ;;  %vm2293_vm14 = vmor %vm2291_vm12, %vm2292_vm13  ;;  %v2780_v44 = vld [vmem:[#allocation2 + $0x130] sm:$0xff] }
 0x316   : > { %v3354_v12 = vadd.f32 %v3033_v50, %v2774_v7  ;;  %v2288_v62 = vsub.f32 1.0, %v2287_v3 }
 0x318   : > { %3418 = vst [vmem:[#allocation2 + $0xb0] sm:$0xff] %v3354_v12  ;;  %v2289_v34 = vmul.f32 %v4153_v11, %v2288_v62  ;;  %v8141_v12 = vld [vmem:[#allocation16_spill] sm:$0xff] }
 0x319   : > { %v3145_v26 = vpop.f32.mrf.mxu2  ;;  %3082 = vmatmul.f32.gmra.mxu1 %v8136_v4 }
 0x31a   : > { %v3258_v27 = vpop.f32.mrf.mxu3  ;;  %v2922_v20 = vpop.f32.mrf.mxu0  ;;  %v2290_v54 = vadd.f32 %v4153_v11, %v2289_v34  ;;  %v8144_v34 = vld [vmem:[#allocation54_spill] sm:$0xff] }
 0x31b   : > { %2969 = vmatmul.f32.gmra.mxu0 %v6694_v30  ;;  %v3259_v23 = vadd.f32 %v3258_v27, %v3145_v26  ;;  %v3035_v41 = vpop.f32.mrf.mxu1  ;;  %3195 = vmatmul.f32.gmra.mxu2 %v6694_v30 }
 0x31c   : > { %v3036_v56 = vadd.f32 %v3035_v41, %v2922_v20  ;;  %3308 = vmatmul.f32.gmra.mxu3 %v8136_v4  ;;  %v2294_v0 = vsel %vm2293_vm14, %v4153_v11, %v2290_v54  ;;  %v8142_v4 = vld [vmem:[#allocation66_spill] sm:$0xff] }
 0x31d   : > { %v3355_v51 = vadd.f32 %v3259_v23, %v2775_v55  ;;  %v2299_v1 = vsel %vm2296_vm15, %v2298_v15, %v2294_v0  ;;  %v2781_v55 = vld [vmem:[#allocation2 + $0x48] sm:$0xff]  ;;  %v2782_v23 = vld [vmem:[#allocation2 + $0x180] sm:$0xff] }
 0x31e   : > { %v3356_v28 = vadd.f32 %v3036_v56, %v2776_v24  ;;  %v2686_v52 = vmul.f32 %v2299_v1, %v7422_v45  ;;  %v2786_v15 = vld [vmem:[#allocation2 + $0x120] sm:$0xff] }
 0x31f   : > { %3419 = vst [vmem:[#allocation2 + $0x1b0] sm:$0xff] %v3355_v51 }
 0x320   : > { %3420 = vst [vmem:[#allocation2 + $0xd8] sm:$0xff] %v3356_v28  ;;  %v2750_v3 = vmul.f32 %v2686_v52, %v8141_v12  ;;  %v8143_v28 = vld [vmem:[#allocation19_spill] sm:$0xff] }
 0x321   : > { %v3148_v6 = vpop.f32.mrf.mxu2  ;;  %3085 = vmatmul.f32.gmra.mxu1 %v8138_v33 }
 0x322   : > { %v3261_v48 = vpop.f32.mrf.mxu3  ;;  %v2925_v36 = vpop.f32.mrf.mxu0 }
 0x323   : > { %2972 = vmatmul.f32.gmra.mxu0 %v8137_v31  ;;  %v3262_v47 = vadd.f32 %v3261_v48, %v3148_v6  ;;  %v3038_v30 = vpop.f32.mrf.mxu1  ;;  %3198 = vmatmul.f32.gmra.mxu2 %v8137_v31  ;;  %v2783_v6 = vld [vmem:[#allocation2 + $0x110] sm:$0xff]  ;;  %v2784_v48 = vld [vmem:[#allocation2 + $0x118] sm:$0xff] }
 0x324   : > { %v3039_v22 = vadd.f32 %v3038_v30, %v2925_v36  ;;  %3311 = vmatmul.f32.gmra.mxu3 %v8138_v33 }
 0x325   : > { %v3357_v25 = vadd.f32 %v3262_v47, %v2777_v18 }
 0x326   : > { %v3358_v37 = vadd.f32 %v3039_v22, %v2778_v13  ;;  %v8146_v22 = vld [vmem:[#allocation17_spill] sm:$0xff] }
 0x327   : > { %3421 = vst [vmem:[#allocation2 + $0x18] sm:$0xff] %v3357_v25 }
 0x328   : > { %3422 = vst [vmem:[#allocation2 + $0x50] sm:$0xff] %v3358_v37 }
 0x329   : > { %v3151_v57 = vpop.f32.mrf.mxu2  ;;  %3088 = vmatmul.f32.gmra.mxu1 %v8140_v21 }
 0x32a   : > { %v3264_v61 = vpop.f32.mrf.mxu3  ;;  %v2928_v53 = vpop.f32.mrf.mxu0 }
 0x32b   : > { %2975 = vmatmul.f32.gmra.mxu0 %v8139_v63  ;;  %v3265_v14 = vadd.f32 %v3264_v61, %v3151_v57  ;;  %v3041_v19 = vpop.f32.mrf.mxu1  ;;  %3201 = vmatmul.f32.gmra.mxu2 %v8139_v63  ;;  %v8147_v61 = vld [vmem:[#allocation18_spill] sm:$0xff] }
 0x32c   : > { %v3042_v7 = vadd.f32 %v3041_v19, %v2928_v53  ;;  %3314 = vmatmul.f32.gmra.mxu3 %v8140_v21  ;;  %v2787_v53 = vld [vmem:[#allocation2 + $0x150] sm:$0xff] }
 0x32d   : > { %v3359_v11 = vadd.f32 %v3265_v14, %v2779_v10 }
 0x32e   : > { %v3360_v50 = vadd.f32 %v3042_v7, %v2780_v44  ;;  %v2788_v7 = vld [vmem:[#allocation2 + $0x108] sm:$0xff] }
 0x32f   : > { %3423 = vst [vmem:[#allocation2 + $0x168] sm:$0xff] %v3359_v11 }
 0x330   : > { %3424 = vst [vmem:[#allocation2 + $0x130] sm:$0xff] %v3360_v50 }
 0x331   : > { %v3154_v26 = vpop.f32.mrf.mxu2  ;;  %3091 = vmatmul.f32.gmra.mxu1 %v8142_v4 }
 0x332   : > { %v3267_v27 = vpop.f32.mrf.mxu3  ;;  %v2931_v20 = vpop.f32.mrf.mxu0 }
 0x333   : > { %2978 = vmatmul.f32.gmra.mxu0 %v2750_v3  ;;  %v3268_v62 = vadd.f32 %v3267_v27, %v3154_v26  ;;  %v3044_v45 = vpop.f32.mrf.mxu1  ;;  %3204 = vmatmul.f32.gmra.mxu2 %v2750_v3  ;;  %v2789_v26 = vld [vmem:[#allocation2 + $0x60] sm:$0xff] }
 0x334   : > { %v3045_v24 = vadd.f32 %v3044_v45, %v2931_v20  ;;  %3317 = vmatmul.f32.gmra.mxu3 %v8142_v4  ;;  %v2790_v20 = vld [vmem:[#allocation2 + $0xe0] sm:$0xff] }
 0x335   : > { %v3361_v41 = vadd.f32 %v3268_v62, %v2781_v55 }
 0x336   : > { %v3362_v56 = vadd.f32 %v3045_v24, %v2782_v23 }
 0x337   : > { %3425 = vst [vmem:[#allocation2 + $0x48] sm:$0xff] %v3361_v41  ;;  %v2791_v41 = vld [vmem:[#allocation2 + $0x188] sm:$0xff] }
 0x338   : > { %3426 = vst [vmem:[#allocation2 + $0x180] sm:$0xff] %v3362_v56 }
 0x339   : > { %v3157_v51 = vpop.f32.mrf.mxu2  ;;  %3094 = vmatmul.f32.gmra.mxu1 %v8144_v34 }
 0x33a   : > { %v3270_v31 = vpop.f32.mrf.mxu3  ;;  %v2934_v33 = vpop.f32.mrf.mxu0 }
 0x33b   : > { %2981 = vmatmul.f32.gmra.mxu0 %v8143_v28  ;;  %v3271_v18 = vadd.f32 %v3270_v31, %v3157_v51  ;;  %v3047_v36 = vpop.f32.mrf.mxu1  ;;  %3207 = vmatmul.f32.gmra.mxu2 %v8143_v28 }
 0x33c   : > { %v3048_v54 = vadd.f32 %v3047_v36, %v2934_v33  ;;  %3320 = vmatmul.f32.gmra.mxu3 %v8144_v34  ;;  %v2792_v34 = vld [vmem:[#allocation2 + $0x138] sm:$0xff] }
 0x33d   : > { %v3363_v47 = vadd.f32 %v3271_v18, %v2783_v6 }
 0x33e   : > { %v3364_v13 = vadd.f32 %v3048_v54, %v2784_v48 }
 0x33f   : > { %3427 = vst [vmem:[#allocation2 + $0x110] sm:$0xff] %v3363_v47  ;;  %v2794_v47 = vld [vmem:[#allocation2 + $0x80] sm:$0xff] }
 0x340   : > { %3428 = vst [vmem:[#allocation2 + $0x118] sm:$0xff] %v3364_v13 }
 0x341   : > { %v3160_v30 = vpop.f32.mrf.mxu2  ;;  %3097 = vmatmul.f32.gmra.mxu1 %v8146_v22 }
 0x342   : > { %v3273_v25 = vpop.f32.mrf.mxu3  ;;  %v2937_v37 = vpop.f32.mrf.mxu0 }
 0x343   : > { %2984 = vmatmul.f32.gmra.mxu0 %v8145_v8  ;;  %v3274_v0 = vadd.f32 %v3273_v25, %v3160_v30  ;;  %v3050_v57 = vpop.f32.mrf.mxu1  ;;  %3210 = vmatmul.f32.gmra.mxu2 %v8145_v8 }
 0x344   : > { %v3051_v63 = vadd.f32 %v3050_v57, %v2937_v37  ;;  %3323 = vmatmul.f32.gmra.mxu3 %v8146_v22 }
 0x345   : > { %v3365_v21 = vadd.f32 %v3274_v0, %v2785_v9  ;;  %v2796_v0 = vld [vmem:[#allocation2 + $0x1b8] sm:$0xff] }
 0x346   : > { %v3366_v1 = vadd.f32 %v3051_v63, %v2786_v15 }
 0x347   : > { %3429 = vst [vmem:[#allocation2 + $0x98] sm:$0xff] %v3365_v21 }
 0x348   : > { %3430 = vst [vmem:[#allocation2 + $0x120] sm:$0xff] %v3366_v1 }
 0x349   : > { %v3163_v10 = vpop.f32.mrf.mxu2  ;;  %3100 = vmatmul.f32.gmra.mxu1 %v7136_v40 }
 0x34a   : > { %v3276_v14 = vpop.f32.mrf.mxu3  ;;  %v2940_v44 = vpop.f32.mrf.mxu0 }
 0x34b   : > { %2987 = vmatmul.f32.gmra.mxu0 %v8147_v61  ;;  %v3277_v19 = vadd.f32 %v3276_v14, %v3163_v10  ;;  %v3053_v52 = vpop.f32.mrf.mxu1  ;;  %3213 = vmatmul.f32.gmra.mxu2 %v8147_v61 }
 0x34c   : > { %v3054_v11 = vadd.f32 %v3053_v52, %v2940_v44  ;;  %3326 = vmatmul.f32.gmra.mxu3 %v7136_v40 }
 0x34d   : > { %v3367_v50 = vadd.f32 %v3277_v19, %v2787_v53  ;;  %v2798_v53 = vld [vmem:[#allocation2 + $0x1e8] sm:$0xff] }
 0x34e   : > { %v3368_v12 = vadd.f32 %v3054_v11, %v2788_v7 }
 0x34f   : > { %3431 = vst [vmem:[#allocation2 + $0x150] sm:$0xff] %v3367_v50 }
 0x350   : > { %3432 = vst [vmem:[#allocation2 + $0x108] sm:$0xff] %v3368_v12  ;;  %v2800_v12 = vld [vmem:[#allocation2 + $0x160] sm:$0xff] }
 0x351   : > { %v3166_v3 = vpop.f32.mrf.mxu2  ;;  %3103 = vmatmul.f32.gmra.mxu1 %v7204_v32 }
 0x352   : > { %v3279_v4 = vpop.f32.mrf.mxu3  ;;  %v2943_v55 = vpop.f32.mrf.mxu0 }
 0x353   : > { %2990 = vmatmul.f32.gmra.mxu0 %v7141_v29  ;;  %v3280_v27 = vadd.f32 %v3279_v4, %v3166_v3  ;;  %v3056_v62 = vpop.f32.mrf.mxu1  ;;  %3216 = vmatmul.f32.gmra.mxu2 %v7141_v29 }
 0x354   : > { %v3057_v23 = vadd.f32 %v3056_v62, %v2943_v55  ;;  %3329 = vmatmul.f32.gmra.mxu3 %v7204_v32  ;;  %v2793_v32 = vld [vmem:[#allocation2 + $0x140] sm:$0xff] }
 0x355   : > { %v3369_v45 = vadd.f32 %v3280_v27, %v2789_v26 }
 0x356   : > { %v3370_v24 = vadd.f32 %v3057_v23, %v2790_v20  ;;  %v2802_v23 = vld [vmem:[#allocation2 + $0x1e0] sm:$0xff] }
 0x357   : > { %3433 = vst [vmem:[#allocation2 + $0x60] sm:$0xff] %v3369_v45 }
 0x358   : > { %3434 = vst [vmem:[#allocation2 + $0xe0] sm:$0xff] %v3370_v24 }
 0x359   : > { %v3169_v40 = vpop.f32.mrf.mxu2  ;;  %3106 = vmatmul.f32.gmra.mxu1 %v7273_v43 }
 0x35a   : > { %v3282_v56 = vpop.f32.mrf.mxu3  ;;  %v2946_v51 = vpop.f32.mrf.mxu0 }
 0x35b   : > { %2993 = vmatmul.f32.gmra.mxu0 %v7212_v42  ;;  %v3283_v28 = vadd.f32 %v3282_v56, %v3169_v40  ;;  %v3059_v6 = vpop.f32.mrf.mxu1  ;;  %3219 = vmatmul.f32.gmra.mxu2 %v7212_v42 }
 0x35c   : > { %v3060_v31 = vadd.f32 %v3059_v6, %v2946_v51  ;;  %3332 = vmatmul.f32.gmra.mxu3 %v7273_v43  ;;  %v2795_v43 = vld [vmem:[#allocation2 + $0x1a8] sm:$0xff] }
 0x35d   : > { %v3371_v33 = vadd.f32 %v3283_v28, %v2791_v41 }
 0x35e   : > { %v3372_v18 = vadd.f32 %v3060_v31, %v2792_v34  ;;  %v2804_v34 = vld [vmem:[#allocation2 + $0xf0] sm:$0xff] }
 0x35f   : > { %3435 = vst [vmem:[#allocation2 + $0x188] sm:$0xff] %v3371_v33 }
 0x360   : > { %3436 = vst [vmem:[#allocation2 + $0x138] sm:$0xff] %v3372_v18 }
 0x361   : > { %v3172_v29 = vpop.f32.mrf.mxu2  ;;  %3109 = vmatmul.f32.gmra.mxu1 %v7336_v46 }
 0x362   : > { %v3285_v48 = vpop.f32.mrf.mxu3  ;;  %v2949_v36 = vpop.f32.mrf.mxu0 }
 0x363   : > { %2996 = vmatmul.f32.gmra.mxu0 %v7281_v35  ;;  %v3286_v54 = vadd.f32 %v3285_v48, %v3172_v29  ;;  %v3062_v13 = vpop.f32.mrf.mxu1  ;;  %3222 = vmatmul.f32.gmra.mxu2 %v7281_v35 }
 0x364   : > { %v3063_v30 = vadd.f32 %v3062_v13, %v2949_v36  ;;  %3335 = vmatmul.f32.gmra.mxu3 %v7336_v46  ;;  %v2797_v46 = vld [vmem:[#allocation2 + $0x28] sm:$0xff] }
 0x365   : > { %v3373_v8 = vadd.f32 %v3286_v54, %v2793_v32  ;;  %v2806_v36 = vld [vmem:[#allocation2 + $0x148] sm:$0xff] }
 0x366   : > { %v3374_v22 = vadd.f32 %v3063_v30, %v2794_v47 }
 0x367   : > { %3437 = vst [vmem:[#allocation2 + $0x140] sm:$0xff] %v3373_v8 }
 0x368   : > { %3438 = vst [vmem:[#allocation2 + $0x80] sm:$0xff] %v3374_v22  ;;  %v2807_v22 = vld [vmem:[#allocation2 + $0x1d0] sm:$0xff] }
 0x369   : > { %v3175_v42 = vpop.f32.mrf.mxu2  ;;  %3112 = vmatmul.f32.gmra.mxu1 %v7391_v39 }
 0x36a   : > { %v3288_v9 = vpop.f32.mrf.mxu3  ;;  %v2952_v25 = vpop.f32.mrf.mxu0 }
 0x36b   : > { %2999 = vmatmul.f32.gmra.mxu0 %v7344_v59  ;;  %v3289_v37 = vadd.f32 %v3288_v9, %v3175_v42  ;;  %v3065_v15 = vpop.f32.mrf.mxu1  ;;  %3225 = vmatmul.f32.gmra.mxu2 %v7344_v59  ;;  %v2808_v9 = vld [vmem:[#allocation2 + $0x100] sm:$0xff] }
 0x36c   : > { %v3066_v57 = vadd.f32 %v3065_v15, %v2952_v25  ;;  %3338 = vmatmul.f32.gmra.mxu3 %v7391_v39  ;;  %v2799_v39 = vld [vmem:[#allocation2 + $0xf8] sm:$0xff] }
 0x36d   : > { %v3375_v63 = vadd.f32 %v3289_v37, %v2795_v43 }
 0x36e   : > { %v3376_v21 = vadd.f32 %v3066_v57, %v2796_v0  ;;  %v2809_v57 = vld [vmem:[#allocation2 + $0xc8] sm:$0xff] }
 0x36f   : > { %3439 = vst [vmem:[#allocation2 + $0x1a8] sm:$0xff] %v3375_v63 }
 0x370   : > { %3440 = vst [vmem:[#allocation2 + $0x1b8] sm:$0xff] %v3376_v21 }
 0x371   : > { %v3178_v35 = vpop.f32.mrf.mxu2  ;;  %3115 = vmatmul.f32.gmra.mxu1 %v7464_v38 }
 0x372   : > { %v3291_v1 = vpop.f32.mrf.mxu3  ;;  %v2955_v10 = vpop.f32.mrf.mxu0 }
 0x373   : > { %3002 = vmatmul.f32.gmra.mxu0 %v7413_v16  ;;  %v3292_v61 = vadd.f32 %v3291_v1, %v3178_v35  ;;  %v3068_v14 = vpop.f32.mrf.mxu1  ;;  %3228 = vmatmul.f32.gmra.mxu2 %v7413_v16 }
 0x374   : > { %v3069_v44 = vadd.f32 %v3068_v14, %v2955_v10  ;;  %3341 = vmatmul.f32.gmra.mxu3 %v7464_v38  ;;  %v2801_v38 = vld [vmem:[#allocation2 + $0x30] sm:$0xff] }
 0x375   : > { %v3377_v19 = vadd.f32 %v3292_v61, %v2797_v46  ;;  %v2810_v46 = vld [vmem:[#allocation2 + $0x40] sm:$0xff] }
 0x376   : > { %v3378_v7 = vadd.f32 %v3069_v44, %v2798_v53  ;;  %v2811_v44 = vld [vmem:[#allocation2 + $0x1f8] sm:$0xff] }
 0x377   : > { %3441 = vst [vmem:[#allocation2 + $0x28] sm:$0xff] %v3377_v19 }
 0x378   : > { %3442 = vst [vmem:[#allocation2 + $0x1e8] sm:$0xff] %v3378_v7 }
 0x379   : > { %v3181_v59 = vpop.f32.mrf.mxu2  ;;  %3118 = vmatmul.f32.gmra.mxu1 %v7506_v17 }
 0x37a   : > { %v3294_v52 = vpop.f32.mrf.mxu3  ;;  %v2958_v11 = vpop.f32.mrf.mxu0 }
 0x37b   : > { %3005 = vmatmul.f32.gmra.mxu0 %v7470_v5  ;;  %v3295_v50 = vadd.f32 %v3294_v52, %v3181_v59  ;;  %v3071_v3 = vpop.f32.mrf.mxu1  ;;  %3231 = vmatmul.f32.gmra.mxu2 %v7470_v5 }
 0x37c   : > { %v3072_v26 = vadd.f32 %v3071_v3, %v2958_v11  ;;  %3344 = vmatmul.f32.gmra.mxu3 %v7506_v17  ;;  %v2803_v17 = vld [vmem:[#allocation2] sm:$0xff] }
 0x37d   : > { %v3379_v4 = vadd.f32 %v3295_v50, %v2799_v39  ;;  %v2812_v39 = vld [vmem:[#allocation2 + $0x20] sm:$0xff] }
 0x37e   : > { %v3380_v55 = vadd.f32 %v3072_v26, %v2800_v12  ;;  %v2813_v26 = vld [vmem:[#allocation2 + $0x128] sm:$0xff] }
 0x37f   : > { %3443 = vst [vmem:[#allocation2 + $0xf8] sm:$0xff] %v3379_v4 }
 0x380   : > { %3444 = vst [vmem:[#allocation2 + $0x160] sm:$0xff] %v3380_v55 }
 0x381   : > { %v3184_v16 = vpop.f32.mrf.mxu2  ;;  %3121 = vmatmul.f32.gmra.mxu1 %v7525_v58 }
 0x382   : > { %v3297_v27 = vpop.f32.mrf.mxu3  ;;  %v2961_v20 = vpop.f32.mrf.mxu0 }
 0x383   : > { %3008 = vmatmul.f32.gmra.mxu0 %v7509_v2  ;;  %v3298_v62 = vadd.f32 %v3297_v27, %v3184_v16  ;;  %v3074_v45 = vpop.f32.mrf.mxu1  ;;  %3234 = vmatmul.f32.gmra.mxu2 %v7509_v2 }
 0x384   : > { %v3075_v24 = vadd.f32 %v3074_v45, %v2961_v20  ;;  %3347 = vmatmul.f32.gmra.mxu3 %v7525_v58  ;;  %v2805_v58 = vld [vmem:[#allocation2 + $0x8] sm:$0xff] }
 0x385   : > { %v3381_v40 = vadd.f32 %v3298_v62, %v2801_v38  ;;  %v2814_v38 = vld [vmem:[#allocation2 + $0x1a0] sm:$0xff] }
 0x386   : > { %v3382_v41 = vadd.f32 %v3075_v24, %v2802_v23  ;;  %v2815_v24 = vld [vmem:[#allocation2 + $0x1f0] sm:$0xff] }
 0x387   : > { %3445 = vst [vmem:[#allocation2 + $0x30] sm:$0xff] %v3381_v40 }
 0x388   : > { %3446 = vst [vmem:[#allocation2 + $0x1e0] sm:$0xff] %v3382_v41 }
 0x389   : > { %v3187_v5 = vpop.f32.mrf.mxu2  ;;  %3124 = vmatmul.f32.gmra.mxu1 %v7534_v49 }
 0x38a   : > { %v3300_v56 = vpop.f32.mrf.mxu3  ;;  %v2964_v51 = vpop.f32.mrf.mxu0 }
 0x38b   : > { %3011 = vmatmul.f32.gmra.mxu0 %v7528_v60  ;;  %v3301_v28 = vadd.f32 %v3300_v56, %v3187_v5  ;;  %v3077_v6 = vpop.f32.mrf.mxu1  ;;  %3237 = vmatmul.f32.gmra.mxu2 %v7528_v60 }
 0x38c   : > { %v3078_v31 = vadd.f32 %v3077_v6, %v2964_v51  ;;  %3350 = vmatmul.f32.gmra.mxu3 %v7534_v49 }
 0x38d   : > { %v3383_v33 = vadd.f32 %v3301_v28, %v2803_v17  ;;  %v2816_v17 = vld [vmem:[#allocation2 + $0xe8] sm:$0xff] }
 0x38e   : > { %v3384_v18 = vadd.f32 %v3078_v31, %v2804_v34  ;;  %v2817_v31 = vld [vmem:[#allocation2 + $0x78] sm:$0xff] }
 0x38f   : > { %3447 = vst [vmem:[#allocation2] sm:$0xff] %v3383_v33 }
 0x390   : > { %3448 = vst [vmem:[#allocation2 + $0xf0] sm:$0xff] %v3384_v18 }
 0x391   : > { %v3190_v2 = vpop.f32.mrf.mxu2 }
 0x392   : > { %v3303_v29 = vpop.f32.mrf.mxu3  ;;  %v2967_v32 = vpop.f32.mrf.mxu0 }
 0x393   : > { %v3304_v48 = vadd.f32 %v3303_v29, %v3190_v2  ;;  %v3080_v54 = vpop.f32.mrf.mxu1 }
 0x394   : > { %v3081_v47 = vadd.f32 %v3080_v54, %v2967_v32 }
 0x395   : > { %v3385_v13 = vadd.f32 %v3304_v48, %v2805_v58  ;;  %v2818_v58 = vld [vmem:[#allocation2 + $0x70] sm:$0xff] }
 0x396   : > { %v3386_v30 = vadd.f32 %v3081_v47, %v2806_v36  ;;  %v2819_v47 = vld [vmem:[#allocation2 + $0x90] sm:$0xff] }
 0x397   : > { %3449 = vst [vmem:[#allocation2 + $0x8] sm:$0xff] %v3385_v13 }
 0x398   : > { %3450 = vst [vmem:[#allocation2 + $0x148] sm:$0xff] %v3386_v30 }
 0x399   : > { %v3193_v8 = vpop.f32.mrf.mxu2 }
 0x39a   : > { %v3306_v42 = vpop.f32.mrf.mxu3  ;;  %v2970_v60 = vpop.f32.mrf.mxu0 }
 0x39b   : > { %v3307_v43 = vadd.f32 %v3306_v42, %v3193_v8  ;;  %v3083_v49 = vpop.f32.mrf.mxu1 }
 0x39c   : > { %v3084_v25 = vadd.f32 %v3083_v49, %v2970_v60 }
 0x39d   : > { %v3387_v37 = vadd.f32 %v3307_v43, %v2807_v22  ;;  %v2820_v22 = vld [vmem:[#allocation2 + $0x1d8] sm:$0xff] }
 0x39e   : > { %v3388_v0 = vadd.f32 %v3084_v25, %v2808_v9  ;;  %v2821_v25 = vld [vmem:[#allocation2 + $0xd0] sm:$0xff] }
 0x39f   : > { %3451 = vst [vmem:[#allocation2 + $0x1d0] sm:$0xff] %v3387_v37 }
 0x3a0   : > { %3452 = vst [vmem:[#allocation2 + $0x100] sm:$0xff] %v3388_v0 }
 0x3a1   : > { %v3196_v15 = vpop.f32.mrf.mxu2 }
 0x3a2   : > { %v3309_v63 = vpop.f32.mrf.mxu3  ;;  %v2973_v21 = vpop.f32.mrf.mxu0 }
 0x3a3   : > { %v3310_v35 = vadd.f32 %v3309_v63, %v3196_v15  ;;  %v3086_v1 = vpop.f32.mrf.mxu1 }
 0x3a4   : > { %v3087_v10 = vadd.f32 %v3086_v1, %v2973_v21 }
 0x3a5   : > { %v3389_v61 = vadd.f32 %v3310_v35, %v2809_v57  ;;  %v2822_v57 = vld [vmem:[#allocation2 + $0xb8] sm:$0xff] }
 0x3a6   : > { %v3390_v53 = vadd.f32 %v3087_v10, %v2810_v46  ;;  %v2823_v10 = vld [vmem:[#allocation2 + $0x88] sm:$0xff] }
 0x3a7   : > { %3453 = vst [vmem:[#allocation2 + $0xc8] sm:$0xff] %v3389_v61 }
 0x3a8   : > { %3454 = vst [vmem:[#allocation2 + $0x40] sm:$0xff] %v3390_v53 }
 0x3a9   : > { %v3199_v14 = vpop.f32.mrf.mxu2 }
 0x3aa   : > { %v3312_v19 = vpop.f32.mrf.mxu3  ;;  %v2976_v7 = vpop.f32.mrf.mxu0 }
 0x3ab   : > { %v3313_v59 = vadd.f32 %v3312_v19, %v3199_v14  ;;  %v3089_v52 = vpop.f32.mrf.mxu1 }
 0x3ac   : > { %v3090_v11 = vadd.f32 %v3089_v52, %v2976_v7 }
 0x3ad   : > { %v3391_v50 = vadd.f32 %v3313_v59, %v2811_v44  ;;  %v2824_v44 = vld [vmem:[#allocation2 + $0xa8] sm:$0xff] }
 0x3ae   : > { %v3392_v12 = vadd.f32 %v3090_v11, %v2812_v39  ;;  %v2825_v11 = vld [vmem:[#allocation2 + $0x1c8] sm:$0xff] }
 0x3af   : > { %3455 = vst [vmem:[#allocation2 + $0x1f8] sm:$0xff] %v3391_v50 }
 0x3b0   : > { %3456 = vst [vmem:[#allocation2 + $0x20] sm:$0xff] %v3392_v12 }
 0x3b1   : > { %v3202_v3 = vpop.f32.mrf.mxu2 }
 0x3b2   : > { %v3315_v4 = vpop.f32.mrf.mxu3  ;;  %v2979_v55 = vpop.f32.mrf.mxu0 }
 0x3b3   : > { %v3316_v16 = vadd.f32 %v3315_v4, %v3202_v3  ;;  %v3092_v27 = vpop.f32.mrf.mxu1 }
 0x3b4   : > { %v3093_v20 = vadd.f32 %v3092_v27, %v2979_v55 }
 0x3b5   : > { %v3393_v62 = vadd.f32 %v3316_v16, %v2813_v26  ;;  %v2826_v26 = vld [vmem:[#allocation2 + $0x170] sm:$0xff] }
 0x3b6   : > { %v3394_v23 = vadd.f32 %v3093_v20, %v2814_v38  ;;  %v2827_v20 = vld [vmem:[#allocation2 + $0x178] sm:$0xff] }
 0x3b7   : > { %3457 = vst [vmem:[#allocation2 + $0x128] sm:$0xff] %v3393_v62 }
 0x3b8   : > { %3458 = vst [vmem:[#allocation2 + $0x1a0] sm:$0xff] %v3394_v23 }
 0x3b9   : > { %v3205_v45 = vpop.f32.mrf.mxu2 }
 0x3ba   : > { %v3318_v40 = vpop.f32.mrf.mxu3  ;;  %v2982_v41 = vpop.f32.mrf.mxu0 }
 0x3bb   : > { %v3319_v5 = vadd.f32 %v3318_v40, %v3205_v45  ;;  %v3095_v56 = vpop.f32.mrf.mxu1 }
 0x3bc   : > { %v3096_v51 = vadd.f32 %v3095_v56, %v2982_v41 }
 0x3bd   : > { %v3395_v28 = vadd.f32 %v3319_v5, %v2815_v24  ;;  %v2828_v24 = vld [vmem:[#allocation2 + $0x68] sm:$0xff] }
 0x3be   : > { %v3396_v34 = vadd.f32 %v3096_v51, %v2816_v17  ;;  %v2829_v51 = vld [vmem:[#allocation2 + $0x190] sm:$0xff] }
 0x3bf   : > { %3459 = vst [vmem:[#allocation2 + $0x1f0] sm:$0xff] %v3395_v28 }
 0x3c0   : > { %3460 = vst [vmem:[#allocation2 + $0xe8] sm:$0xff] %v3396_v34 }
 0x3c1   : > { %v3208_v6 = vpop.f32.mrf.mxu2 }
 0x3c2   : > { %v3321_v33 = vpop.f32.mrf.mxu3  ;;  %v2985_v18 = vpop.f32.mrf.mxu0 }
 0x3c3   : > { %v3322_v2 = vadd.f32 %v3321_v33, %v3208_v6  ;;  %v3098_v29 = vpop.f32.mrf.mxu1 }
 0x3c4   : > { %v3099_v32 = vadd.f32 %v3098_v29, %v2985_v18 }
 0x3c5   : > { %v3397_v48 = vadd.f32 %v3322_v2, %v2817_v31  ;;  %v2830_v31 = vld [vmem:[#allocation2 + $0x198] sm:$0xff] }
 0x3c6   : > { %v3398_v36 = vadd.f32 %v3099_v32, %v2818_v58  ;;  %v2831_v32 = vld [vmem:[#allocation2 + $0x38] sm:$0xff] }
 0x3c7   : > { %3461 = vst [vmem:[#allocation2 + $0x78] sm:$0xff] %v3397_v48 }
 0x3c8   : > { %3462 = vst [vmem:[#allocation2 + $0x70] sm:$0xff] %v3398_v36 }
 0x3c9   : > { %v3211_v54 = vpop.f32.mrf.mxu2 }
 0x3ca   : > { %v3324_v13 = vpop.f32.mrf.mxu3  ;;  %v2988_v30 = vpop.f32.mrf.mxu0 }
 0x3cb   : > { %v3325_v8 = vadd.f32 %v3324_v13, %v3211_v54  ;;  %v3101_v42 = vpop.f32.mrf.mxu1 }
 0x3cc   : > { %v3102_v60 = vadd.f32 %v3101_v42, %v2988_v30 }
 0x3cd   : > { %v3399_v43 = vadd.f32 %v3325_v8, %v2819_v47  ;;  %v2832_v47 = vld [vmem:[#allocation2 + $0xc0] sm:$0xff] }
 0x3ce   : > { %v3400_v9 = vadd.f32 %v3102_v60, %v2820_v22  ;;  %v2833_v60 = vld [vmem:[#allocation2 + $0x1c0] sm:$0xff] }
 0x3cf   : > { %3463 = vst [vmem:[#allocation2 + $0x90] sm:$0xff] %v3399_v43 }
 0x3d0   : > { %3464 = vst [vmem:[#allocation2 + $0x1d8] sm:$0xff] %v3400_v9 }
 0x3d1   : > { %v3214_v49 = vpop.f32.mrf.mxu2 }
 0x3d2   : > { %v3327_v37 = vpop.f32.mrf.mxu3  ;;  %v2991_v0 = vpop.f32.mrf.mxu0 }
 0x3d3   : > { %v3328_v15 = vadd.f32 %v3327_v37, %v3214_v49  ;;  %v3104_v63 = vpop.f32.mrf.mxu1 }
 0x3d4   : > { %v3105_v21 = vadd.f32 %v3104_v63, %v2991_v0 }
 0x3d5   : > { %v3401_v35 = vadd.f32 %v3328_v15, %v2821_v25  ;;  %v2834_v25 = vld [vmem:[#allocation2 + $0x158] sm:$0xff] }
 0x3d6   : > { %v3402_v46 = vadd.f32 %v3105_v21, %v2822_v57  ;;  %v2835_v21 = vld [vmem:[#allocation2 + $0x10] sm:$0xff] }
 0x3d7   : > { %3465 = vst [vmem:[#allocation2 + $0xd0] sm:$0xff] %v3401_v35 }
 0x3d8   : > { %3466 = vst [vmem:[#allocation2 + $0xb8] sm:$0xff] %v3402_v46 }
 0x3d9   : > { %v3217_v1 = vpop.f32.mrf.mxu2 }
 0x3da   : > { %v3330_v61 = vpop.f32.mrf.mxu3  ;;  %v2994_v53 = vpop.f32.mrf.mxu0 }
 0x3db   : > { %v3331_v14 = vadd.f32 %v3330_v61, %v3217_v1  ;;  %v3107_v19 = vpop.f32.mrf.mxu1 }
 0x3dc   : > { %v3108_v7 = vadd.f32 %v3107_v19, %v2994_v53 }
 0x3dd   : > { %v3403_v59 = vadd.f32 %v3331_v14, %v2823_v10  ;;  %v2836_v10 = vld [vmem:[#allocation2 + $0x58] sm:$0xff] }
 0x3de   : > { %v3404_v39 = vadd.f32 %v3108_v7, %v2824_v44  ;;  %v2837_v7 = vld [vmem:[#allocation2 + $0xa0] sm:$0xff] }
 0x3df   : > { %3467 = vst [vmem:[#allocation2 + $0x88] sm:$0xff] %v3403_v59 }
 0x3e0   : > { %3468 = vst [vmem:[#allocation2 + $0xa8] sm:$0xff] %v3404_v39 }
 0x3e1   : > { %v3220_v52 = vpop.f32.mrf.mxu2 }
 0x3e2   : > { %v3333_v50 = vpop.f32.mrf.mxu3  ;;  %v2997_v12 = vpop.f32.mrf.mxu0 }
 0x3e3   : > { %v3334_v3 = vadd.f32 %v3333_v50, %v3220_v52  ;;  %v3110_v4 = vpop.f32.mrf.mxu1 }
 0x3e4   : > { %v3111_v55 = vadd.f32 %v3110_v4, %v2997_v12 }
 0x3e5   : > { %v3405_v16 = vadd.f32 %v3334_v3, %v2825_v11 }
 0x3e6   : > { %v3406_v38 = vadd.f32 %v3111_v55, %v2826_v26 }
 0x3e7   : > { %3469 = vst [vmem:[#allocation2 + $0x1c8] sm:$0xff] %v3405_v16 }
 0x3e8   : > { %3470 = vst [vmem:[#allocation2 + $0x170] sm:$0xff] %v3406_v38 }
 0x3e9   : > { %v3223_v27 = vpop.f32.mrf.mxu2 }
 0x3ea   : > { %v3336_v62 = vpop.f32.mrf.mxu3  ;;  %v3000_v23 = vpop.f32.mrf.mxu0 }
 0x3eb   : > { %v3337_v45 = vadd.f32 %v3336_v62, %v3223_v27  ;;  %v3113_v40 = vpop.f32.mrf.mxu1 }
 0x3ec   : > { %v3114_v41 = vadd.f32 %v3113_v40, %v3000_v23 }
 0x3ed   : > { %v3407_v5 = vadd.f32 %v3337_v45, %v2827_v20 }
 0x3ee   : > { %v3408_v17 = vadd.f32 %v3114_v41, %v2828_v24 }
 0x3ef   : > { %3471 = vst [vmem:[#allocation2 + $0x178] sm:$0xff] %v3407_v5 }
 0x3f0   : > { %3472 = vst [vmem:[#allocation2 + $0x68] sm:$0xff] %v3408_v17 }
 0x3f1   : > { %v3226_v56 = vpop.f32.mrf.mxu2 }
 0x3f2   : > { %v3339_v28 = vpop.f32.mrf.mxu3  ;;  %v3003_v34 = vpop.f32.mrf.mxu0 }
 0x3f3   : > { %v3340_v6 = vadd.f32 %v3339_v28, %v3226_v56  ;;  %v3116_v33 = vpop.f32.mrf.mxu1 }
 0x3f4   : > { %v3117_v18 = vadd.f32 %v3116_v33, %v3003_v34 }
 0x3f5   : > { %v3409_v2 = vadd.f32 %v3340_v6, %v2829_v51 }
 0x3f6   : > { %v3410_v58 = vadd.f32 %v3117_v18, %v2830_v31 }
 0x3f7   : > { %3473 = vst [vmem:[#allocation2 + $0x190] sm:$0xff] %v3409_v2 }
 0x3f8   : > { %3474 = vst [vmem:[#allocation2 + $0x198] sm:$0xff] %v3410_v58 }
 0x3f9   : > { %v3229_v29 = vpop.f32.mrf.mxu2 }
 0x3fa   : > { %v3342_v48 = vpop.f32.mrf.mxu3  ;;  %v3006_v36 = vpop.f32.mrf.mxu0 }
 0x3fb   : > { %v3343_v54 = vadd.f32 %v3342_v48, %v3229_v29  ;;  %v3119_v13 = vpop.f32.mrf.mxu1 }
 0x3fc   : > { %v3120_v30 = vadd.f32 %v3119_v13, %v3006_v36 }
 0x3fd   : > { %v3411_v8 = vadd.f32 %v3343_v54, %v2831_v32 }
 0x3fe   : > { %v3412_v22 = vadd.f32 %v3120_v30, %v2832_v47 }
 0x3ff   : > { %3475 = vst [vmem:[#allocation2 + $0x38] sm:$0xff] %v3411_v8 }
 0x400   : > { %3476 = vst [vmem:[#allocation2 + $0xc0] sm:$0xff] %v3412_v22 }
 0x401   : > { %v3232_v42 = vpop.f32.mrf.mxu2 }
 0x402   : > { %v3345_v43 = vpop.f32.mrf.mxu3  ;;  %v3009_v9 = vpop.f32.mrf.mxu0 }
 0x403   : > { %v3346_v49 = vadd.f32 %v3345_v43, %v3232_v42  ;;  %v3122_v37 = vpop.f32.mrf.mxu1 }
 0x404   : > { %v3123_v0 = vadd.f32 %v3122_v37, %v3009_v9 }
 0x405   : > { %v3413_v15 = vadd.f32 %v3346_v49, %v2833_v60 }
 0x406   : > { %v3414_v57 = vadd.f32 %v3123_v0, %v2834_v25 }
 0x407   : > { %3477 = vst [vmem:[#allocation2 + $0x1c0] sm:$0xff] %v3413_v15 }
 0x408   : > { %3478 = vst [vmem:[#allocation2 + $0x158] sm:$0xff] %v3414_v57 }
 0x409   : > { %v3235_v63 = vpop.f32.mrf.mxu2 }
 0x40a   : > { %v3348_v35 = vpop.f32.mrf.mxu3  ;;  %v3012_v46 = vpop.f32.mrf.mxu0 }
 0x40b   : > { %v3349_v1 = vadd.f32 %v3348_v35, %v3235_v63  ;;  %v3125_v61 = vpop.f32.mrf.mxu1 }
 0x40c   : > { %v3126_v53 = vadd.f32 %v3125_v61, %v3012_v46 }
 0x40d   : > { %v3415_v14 = vadd.f32 %v3349_v1, %v2835_v21 }
 0x40e   : > { %v3416_v44 = vadd.f32 %v3126_v53, %v2836_v10 }
 0x40f   : > { %3479 = vst [vmem:[#allocation2 + $0x10] sm:$0xff] %v3415_v14 }
 0x410   : > { %3480 = vst [vmem:[#allocation2 + $0x58] sm:$0xff] %v3416_v44 }
 0x411   : > { %v3238_v19 = vpop.f32.mrf.mxu2 }
 0x412   : > { %v3351_v59 = vpop.f32.mrf.mxu3 }
 0x413   : > { %v3352_v39 = vadd.f32 %v3351_v59, %v3238_v19  ;;  %3485 = sbr.rel (%p3804_p2) target bundleno = 1113 (0x459), region = 52 }
 0x415   : > { %v3417_v52 = vadd.f32 %v3352_v39, %v2837_v7 }
 0x417   : > { %3481 = vst [vmem:[#allocation2 + $0xa0] sm:$0xff] %v3417_v52 }
 0x418   : > { %v3486_v11 = vld [vmem:[#allocation2 + $0xb0] sm:$0xff]  ;;  %v3488_v12 = vld [vmem:[#allocation2 + $0xd8] sm:$0xff]  ;;  %v3491_v4 = vld [vmem:[#allocation2 + $0x168] sm:$0xff] }
 0x419   : > { %v3487_v50 = vld [vmem:[#allocation2 + $0x1b0] sm:$0xff]  ;;  %3550 = vst [vmem:[#allocation9] sm:$0xff] %v3486_v11  ;;  %v3489_v3 = vld [vmem:[#allocation2 + $0x18] sm:$0xff]  ;;  %v3493_v16 = vld [vmem:[#allocation2 + $0x48] sm:$0xff] }
 0x41a   : > { %3551 = vst [vmem:[#allocation9 + $0x8] sm:$0xff] %v3487_v50  ;;  %v3490_v26 = vld [vmem:[#allocation2 + $0x50] sm:$0xff]  ;;  %v3494_v38 = vld [vmem:[#allocation2 + $0x180] sm:$0xff]  ;;  %v3496_v20 = vld [vmem:[#allocation2 + $0x118] sm:$0xff] }
 0x41b   : > { %3552 = vst [vmem:[#allocation9 + $0x10] sm:$0xff] %v3488_v12  ;;  %v3492_v55 = vld [vmem:[#allocation2 + $0x130] sm:$0xff]  ;;  %v3497_v62 = vld [vmem:[#allocation2 + $0x98] sm:$0xff]  ;;  %v3498_v23 = vld [vmem:[#allocation2 + $0x120] sm:$0xff] }
 0x41c   : > { %3553 = vst [vmem:[#allocation9 + $0x18] sm:$0xff] %v3489_v3  ;;  %v3495_v27 = vld [vmem:[#allocation2 + $0x110] sm:$0xff]  ;;  %v3500_v24 = vld [vmem:[#allocation2 + $0x108] sm:$0xff]  ;;  %v3501_v40 = vld [vmem:[#allocation2 + $0x60] sm:$0xff] }
 0x41d   : > { %3554 = vst [vmem:[#allocation9 + $0x20] sm:$0xff] %v3490_v26  ;;  %v3499_v45 = vld [vmem:[#allocation2 + $0x150] sm:$0xff]  ;;  %v3502_v41 = vld [vmem:[#allocation2 + $0xe0] sm:$0xff]  ;;  %v3503_v5 = vld [vmem:[#allocation2 + $0x188] sm:$0xff] }
 0x41e   : > { %3555 = vst [vmem:[#allocation9 + $0x28] sm:$0xff] %v3491_v4  ;;  %v3504_v17 = vld [vmem:[#allocation2 + $0x138] sm:$0xff]  ;;  %v3505_v56 = vld [vmem:[#allocation2 + $0x140] sm:$0xff]  ;;  %v3507_v28 = vld [vmem:[#allocation2 + $0x1a8] sm:$0xff] }
 0x41f   : > { %3556 = vst [vmem:[#allocation9 + $0x30] sm:$0xff] %v3492_v55  ;;  %v3506_v51 = vld [vmem:[#allocation2 + $0x80] sm:$0xff]  ;;  %v3508_v34 = vld [vmem:[#allocation2 + $0x1b8] sm:$0xff]  ;;  %v3509_v6 = vld [vmem:[#allocation2 + $0x28] sm:$0xff] }
 0x420   : > { %3557 = vst [vmem:[#allocation9 + $0x38] sm:$0xff] %v3493_v16  ;;  %v3510_v31 = vld [vmem:[#allocation2 + $0x1e8] sm:$0xff]  ;;  %v3511_v33 = vld [vmem:[#allocation2 + $0xf8] sm:$0xff]  ;;  %v3512_v18 = vld [vmem:[#allocation2 + $0x160] sm:$0xff] }
 0x421   : > { %3558 = vst [vmem:[#allocation9 + $0x40] sm:$0xff] %v3494_v38  ;;  %v3513_v2 = vld [vmem:[#allocation2 + $0x30] sm:$0xff]  ;;  %v3514_v58 = vld [vmem:[#allocation2 + $0x1e0] sm:$0xff]  ;;  %v3517_v48 = vld [vmem:[#allocation2 + $0x8] sm:$0xff] }
 0x422   : > { %3559 = vst [vmem:[#allocation9 + $0x48] sm:$0xff] %v3495_v27  ;;  %v3515_v29 = vld [vmem:[#allocation2] sm:$0xff]  ;;  %v3516_v32 = vld [vmem:[#allocation2 + $0xf0] sm:$0xff]  ;;  %v3518_v36 = vld [vmem:[#allocation2 + $0x148] sm:$0xff] }
 0x423   : > { %3560 = vst [vmem:[#allocation9 + $0x50] sm:$0xff] %v3496_v20  ;;  %v3519_v54 = vld [vmem:[#allocation2 + $0x1d0] sm:$0xff]  ;;  %v3520_v47 = vld [vmem:[#allocation2 + $0x100] sm:$0xff]  ;;  %v3521_v13 = vld [vmem:[#allocation2 + $0xc8] sm:$0xff] }
 0x424   : > { %3561 = vst [vmem:[#allocation9 + $0x58] sm:$0xff] %v3497_v62  ;;  %v3522_v30 = vld [vmem:[#allocation2 + $0x40] sm:$0xff]  ;;  %v3523_v8 = vld [vmem:[#allocation2 + $0x1f8] sm:$0xff]  ;;  %v3525_v42 = vld [vmem:[#allocation2 + $0x128] sm:$0xff] }
 0x425   : > { %3562 = vst [vmem:[#allocation9 + $0x60] sm:$0xff] %v3498_v23  ;;  %v3524_v22 = vld [vmem:[#allocation2 + $0x20] sm:$0xff]  ;;  %v3527_v43 = vld [vmem:[#allocation2 + $0x1f0] sm:$0xff]  ;;  %v3528_v9 = vld [vmem:[#allocation2 + $0xe8] sm:$0xff] }
 0x426   : > { %3563 = vst [vmem:[#allocation9 + $0x68] sm:$0xff] %v3499_v45  ;;  %v3526_v60 = vld [vmem:[#allocation2 + $0x1a0] sm:$0xff]  ;;  %v3529_v49 = vld [vmem:[#allocation2 + $0x78] sm:$0xff]  ;;  %v3530_v25 = vld [vmem:[#allocation2 + $0x70] sm:$0xff] }
 0x427   : > { %3564 = vst [vmem:[#allocation9 + $0x70] sm:$0xff] %v3500_v24  ;;  %v3531_v37 = vld [vmem:[#allocation2 + $0x90] sm:$0xff]  ;;  %v3532_v0 = vld [vmem:[#allocation2 + $0x1d8] sm:$0xff]  ;;  %v3535_v63 = vld [vmem:[#allocation2 + $0x88] sm:$0xff] }
 0x428   : > { %3565 = vst [vmem:[#allocation9 + $0x78] sm:$0xff] %v3501_v40  ;;  %v3533_v15 = vld [vmem:[#allocation2 + $0xd0] sm:$0xff]  ;;  %v3534_v57 = vld [vmem:[#allocation2 + $0xb8] sm:$0xff]  ;;  %v3536_v21 = vld [vmem:[#allocation2 + $0xa8] sm:$0xff] }
 0x429   : > { %3566 = vst [vmem:[#allocation9 + $0x80] sm:$0xff] %v3502_v41  ;;  %v3537_v35 = vld [vmem:[#allocation2 + $0x1c8] sm:$0xff]  ;;  %v3538_v46 = vld [vmem:[#allocation2 + $0x170] sm:$0xff]  ;;  %v3539_v1 = vld [vmem:[#allocation2 + $0x178] sm:$0xff] }
 0x42a   : > { %3567 = vst [vmem:[#allocation9 + $0x88] sm:$0xff] %v3503_v5  ;;  %v3540_v10 = vld [vmem:[#allocation2 + $0x68] sm:$0xff]  ;;  %v3541_v61 = vld [vmem:[#allocation2 + $0x190] sm:$0xff]  ;;  %v3542_v53 = vld [vmem:[#allocation2 + $0x198] sm:$0xff] }
 0x42b   : > { %3568 = vst [vmem:[#allocation9 + $0x90] sm:$0xff] %v3504_v17  ;;  %v3543_v14 = vld [vmem:[#allocation2 + $0x38] sm:$0xff]  ;;  %v3544_v44 = vld [vmem:[#allocation2 + $0xc0] sm:$0xff]  ;;  %v3547_v59 = vld [vmem:[#allocation2 + $0x10] sm:$0xff] }
 0x42c   : > { %3569 = vst [vmem:[#allocation9 + $0x98] sm:$0xff] %v3505_v56  ;;  %v3545_v19 = vld [vmem:[#allocation2 + $0x1c0] sm:$0xff]  ;;  %v3546_v7 = vld [vmem:[#allocation2 + $0x158] sm:$0xff] }
 0x42d   : > { %3570 = vst [vmem:[#allocation9 + $0xa0] sm:$0xff] %v3506_v51  ;;  %v3548_v39 = vld [vmem:[#allocation2 + $0x58] sm:$0xff]  ;;  %v3549_v52 = vld [vmem:[#allocation2 + $0xa0] sm:$0xff] }
 0x42e   : > { %3571 = vst [vmem:[#allocation9 + $0xa8] sm:$0xff] %v3507_v28 }
 0x42f   : > { %3572 = vst [vmem:[#allocation9 + $0xb0] sm:$0xff] %v3508_v34 }
 0x430   : > { %3573 = vst [vmem:[#allocation9 + $0xb8] sm:$0xff] %v3509_v6 }
 0x431   : > { %3574 = vst [vmem:[#allocation9 + $0xc0] sm:$0xff] %v3510_v31 }
 0x432   : > { %3575 = vst [vmem:[#allocation9 + $0xc8] sm:$0xff] %v3511_v33 }
 0x433   : > { %3576 = vst [vmem:[#allocation9 + $0xd0] sm:$0xff] %v3512_v18 }
 0x434   : > { %3577 = vst [vmem:[#allocation9 + $0xd8] sm:$0xff] %v3513_v2 }
 0x435   : > { %3578 = vst [vmem:[#allocation9 + $0xe0] sm:$0xff] %v3514_v58 }
 0x436   : > { %3579 = vst [vmem:[#allocation9 + $0xe8] sm:$0xff] %v3515_v29 }
 0x437   : > { %3580 = vst [vmem:[#allocation9 + $0xf0] sm:$0xff] %v3516_v32 }
 0x438   : > { %3581 = vst [vmem:[#allocation9 + $0xf8] sm:$0xff] %v3517_v48 }
 0x439   : > { %3582 = vst [vmem:[#allocation9 + $0x100] sm:$0xff] %v3518_v36 }
 0x43a   : > { %3583 = vst [vmem:[#allocation9 + $0x108] sm:$0xff] %v3519_v54 }
 0x43b   : > { %3584 = vst [vmem:[#allocation9 + $0x110] sm:$0xff] %v3520_v47 }
 0x43c   : > { %3585 = vst [vmem:[#allocation9 + $0x118] sm:$0xff] %v3521_v13 }
 0x43d   : > { %3586 = vst [vmem:[#allocation9 + $0x120] sm:$0xff] %v3522_v30 }
 0x43e   : > { %3587 = vst [vmem:[#allocation9 + $0x128] sm:$0xff] %v3523_v8 }
 0x43f   : > { %3588 = vst [vmem:[#allocation9 + $0x130] sm:$0xff] %v3524_v22 }
 0x440   : > { %3589 = vst [vmem:[#allocation9 + $0x138] sm:$0xff] %v3525_v42 }
 0x441   : > { %3590 = vst [vmem:[#allocation9 + $0x140] sm:$0xff] %v3526_v60 }
 0x442   : > { %3591 = vst [vmem:[#allocation9 + $0x148] sm:$0xff] %v3527_v43 }
 0x443   : > { %3592 = vst [vmem:[#allocation9 + $0x150] sm:$0xff] %v3528_v9 }
 0x444   : > { %3593 = vst [vmem:[#allocation9 + $0x158] sm:$0xff] %v3529_v49 }
 0x445   : > { %3594 = vst [vmem:[#allocation9 + $0x160] sm:$0xff] %v3530_v25 }
 0x446   : > { %3595 = vst [vmem:[#allocation9 + $0x168] sm:$0xff] %v3531_v37 }
 0x447   : > { %3596 = vst [vmem:[#allocation9 + $0x170] sm:$0xff] %v3532_v0 }
 0x448   : > { %3597 = vst [vmem:[#allocation9 + $0x178] sm:$0xff] %v3533_v15 }
 0x449   : > { %3598 = vst [vmem:[#allocation9 + $0x180] sm:$0xff] %v3534_v57 }
 0x44a   : > { %3599 = vst [vmem:[#allocation9 + $0x188] sm:$0xff] %v3535_v63 }
 0x44b   : > { %3600 = vst [vmem:[#allocation9 + $0x190] sm:$0xff] %v3536_v21 }
 0x44c   : > { %3601 = vst [vmem:[#allocation9 + $0x198] sm:$0xff] %v3537_v35 }
 0x44d   : > { %3602 = vst [vmem:[#allocation9 + $0x1a0] sm:$0xff] %v3538_v46 }
 0x44e   : > { %3603 = vst [vmem:[#allocation9 + $0x1a8] sm:$0xff] %v3539_v1 }
 0x44f   : > { %3604 = vst [vmem:[#allocation9 + $0x1b0] sm:$0xff] %v3540_v10 }
 0x450   : > { %3605 = vst [vmem:[#allocation9 + $0x1b8] sm:$0xff] %v3541_v61 }
 0x451   : > { %3606 = vst [vmem:[#allocation9 + $0x1c0] sm:$0xff] %v3542_v53 }
 0x452   : > { %3607 = vst [vmem:[#allocation9 + $0x1c8] sm:$0xff] %v3543_v14 }
 0x453   : > { %3608 = vst [vmem:[#allocation9 + $0x1d0] sm:$0xff] %v3544_v44 }
 0x454   : > { %3609 = vst [vmem:[#allocation9 + $0x1d8] sm:$0xff] %v3545_v19 }
 0x455   : > { %3610 = vst [vmem:[#allocation9 + $0x1e0] sm:$0xff] %v3546_v7 }
 0x456   : > { %3611 = vst [vmem:[#allocation9 + $0x1e8] sm:$0xff] %v3547_v59 }
 0x457   : > { %3612 = vst [vmem:[#allocation9 + $0x1f0] sm:$0xff] %v3548_v39 }
 0x458   : > { %3613 = vst [vmem:[#allocation9 + $0x1f8] sm:$0xff] %v3549_v52 }
 0x459 PF: > { %p3838_p3 = scmp.eq.s32.totalorder %s4467_s11, 1  ;;  %s3625_s24 = sshll.u32 %s7628_s3, 4  ;;  %s3626_s24 = int_to_ptr.hbm [resolvable:$true] %s3625_s24 }
 0x45a   : > { %s4377_s27 = smov [#allocation9]   ;;  %s4378_s29 = smov 256  }
 0x45b   : > { %s3623_s28 = sshll.u32 %s4377_s27, 4  ;;  %s4379_s30 = smov 16   ;;  %s3624_s28 = int_to_ptr.vmem [resolvable:$true] %s3623_s28 }
 0x45c   : > { %3821 = dma.vmem_to_hbm [thread:$0]  (%p3838_p3), %s3624_s28, 8192, %s3626_s24, [#allocation5], %s4378_s29, %s4378_s29, %s4379_s30  }
 0x45d   : > { %4343 = dma.done.wait (%p3838_p3), [#allocation5], 8192  }
 0x45e   : > { %4345 = vsyncadd (%p3838_p3), [#allocation5], 4294959104 }
 0x45f PF: > { %s18_s17 = sadd.s32 1, %s4368_s17   ;;  %s8148_s12 = smov %s4352_s13 }
 0x460   : > { %p15_p4 = scmp.ge.s32.totalorder %s18_s17, 4   ;;  %s8149_s13 = smov %s4356_s14 }
 0x461   : > { %s8150_s14 = smov %s4448_s25  ;;  %s8151_s15 = smov %s4364_s16 }
 0x462   : > { %s8152_s16 = smov %s8154_s18  ;;  %17 = sbr.rel (!%p15_p4) target bundleno = 6 (0x6), region = 95 }
 0x467   :  { %3642 = vsyncpa [#allocation4], 1 }
 0x468   :  { %3644 = vsyncpa [#allocation4 + $0x1], 1 }
 0x469   :  { %3645 = vsyncpa [#allocation7], 1 }
 0x46a   :  { %3647 = vsyncpa [#allocation7 + $0x1], 1 }
 0x46b   :  { %3648 = vsyncpa [#allocation5], 1 }
 0x46c   :  { %3650 = vsyncpa [#allocation5 + $0x1], 1 }

</bundles_post_ra>
